<compile_context>
chip_gen: v7x
topology: tpu7x:2x2x1
jax: 0.10.0
libtpu: 0.0.40
codegen_flags: <defaults>
</compile_context>

<pallas_src>
import jax
import jax.numpy as jnp
from jax.experimental import pallas as pl
from jax.experimental.pallas import tpu as pltpu

EPS = 1e-5

_b2 = lambda i: (0, 0)
_b3 = lambda i: (0, 0, 0)
_COMPILER = pltpu.CompilerParams(dimension_semantics=("arbitrary",))


# ----------------------------------------------------------------------------
# Pallas kernels (lane-dense: activations are (channels, voxels))
# ----------------------------------------------------------------------------
def _conv12_pool_kernel(xg_ref, w1_ref, b1_ref, w2_ref, b2_ref, o_ref):
    """relu(maxpool(W2 @ relu(W1 @ x + b1) + b2)) with pool = max over parity groups."""
    w1 = w1_ref[...]
    b1 = b1_ref[...]
    w2 = w2_ref[...]
    b2 = b2_ref[...]
    m = None
    for g in range(xg_ref.shape[0]):                      # 8 pooling parities, static unroll
        x = xg_ref[g]                                     # (Cin, Nvox)
        h = jnp.maximum(jnp.dot(w1, x, preferred_element_type=jnp.float32) + b1, 0.0)
        y = jnp.dot(w2, h, preferred_element_type=jnp.float32) + b2
        m = y if m is None else jnp.maximum(m, y)
    o_ref[...] = jnp.maximum(m, 0.0)


def _convk3_pool_kernel(cols_ref, w_ref, b_ref, o_ref):
    """relu(maxpool(W @ im2col(x) + b)) with pool = max over parity groups."""
    w = w_ref[...]
    b = b_ref[...]
    m = None
    for g in range(cols_ref.shape[0]):
        y = jnp.dot(w, cols_ref[g], preferred_element_type=jnp.float32) + b
        m = y if m is None else jnp.maximum(m, y)
    o_ref[...] = jnp.maximum(m, 0.0)


def _conv4_fc_kernel(cols_ref, w4_ref, b4_ref, wl1_ref, bl1_ref,
                     wl2_ref, bl2_ref, wl3_ref, bl3_ref, o_ref):
    """Conv4+BN4+pool+ReLU, then the whole FC head (BN1d folded) in one kernel."""
    w4 = w4_ref[...]
    b4 = b4_ref[...]
    m = None
    for g in range(cols_ref.shape[0]):
        y = jnp.dot(w4, cols_ref[g], preferred_element_type=jnp.float32) + b4
        m = y if m is None else jnp.maximum(m, y)
    f = jnp.maximum(m, 0.0)                               # (Ch, B): per-column = Flatten(sample)
    h = jnp.maximum(jnp.dot(wl1_ref[...], f, preferred_element_type=jnp.float32) + bl1_ref[...], 0.0)
    h = jnp.maximum(jnp.dot(wl2_ref[...], h, preferred_element_type=jnp.float32) + bl2_ref[...], 0.0)
    z = jnp.dot(wl3_ref[...], h, preferred_element_type=jnp.float32) + bl3_ref[...]
    o_ref[...] = jax.nn.sigmoid(z)


# ----------------------------------------------------------------------------
# pallas_call wrappers (single full-slab step; everything fits VMEM easily)
# ----------------------------------------------------------------------------
def conv12_pool(xg, w1, b1, w2, b2):
    G, C, N = xg.shape
    Co = w1.shape[0]
    return pl.pallas_call(
        _conv12_pool_kernel,
        out_shape=jax.ShapeDtypeStruct((Co, N), jnp.float32),
        grid=(1,),
        in_specs=[pl.BlockSpec((G, C, N), _b3),
                  pl.BlockSpec((Co, C), _b2), pl.BlockSpec((Co, 1), _b2),
                  pl.BlockSpec((Co, Co), _b2), pl.BlockSpec((Co, 1), _b2)],
        out_specs=pl.BlockSpec((Co, N), _b2),
        compiler_params=_COMPILER,
    )(xg, w1, b1.reshape(Co, 1), w2, b2.reshape(Co, 1))


def convk3_pool(cols, w, b):
    G, K, N = cols.shape
    Co = w.shape[0]
    return pl.pallas_call(
        _convk3_pool_kernel,
        out_shape=jax.ShapeDtypeStruct((Co, N), jnp.float32),
        grid=(1,),
        in_specs=[pl.BlockSpec((G, K, N), _b3),
                  pl.BlockSpec((Co, K), _b2), pl.BlockSpec((Co, 1), _b2)],
        out_specs=pl.BlockSpec((Co, N), _b2),
        compiler_params=_COMPILER,
    )(cols, w, b.reshape(Co, 1))


def conv4_fc_head(cols, w4, b4, wl1, bl1, wl2, bl2, wl3, bl3):
    G, K, N = cols.shape
    Co = w4.shape[0]
    Hd = wl1.shape[0]
    return pl.pallas_call(
        _conv4_fc_kernel,
        out_shape=jax.ShapeDtypeStruct((1, N), jnp.float32),
        grid=(1,),
        in_specs=[pl.BlockSpec((G, K, N), _b3),
                  pl.BlockSpec((Co, K), _b2), pl.BlockSpec((Co, 1), _b2),
                  pl.BlockSpec((Hd, Co), _b2), pl.BlockSpec((Hd, 1), _b2),
                  pl.BlockSpec((Hd, Hd), _b2), pl.BlockSpec((Hd, 1), _b2),
                  pl.BlockSpec((1, Hd), _b2), pl.BlockSpec((1, 1), _b2)],
        out_specs=pl.BlockSpec((1, N), _b2),
        compiler_params=_COMPILER,
    )(cols, w4, b4.reshape(Co, 1), wl1, bl1.reshape(Hd, 1),
      wl2, bl2.reshape(Hd, 1), wl3, bl3.reshape(1, 1))


# ----------------------------------------------------------------------------
# JAX glue: BN folding, pooling-parity regroup, grouped im2col
# ----------------------------------------------------------------------------
def bn_fold(gamma, beta, mean, var):
    s = gamma / jnp.sqrt(var + EPS)
    t = beta - mean * s
    return s, t


def fold_params(p):
    Ch, C = p["conv1_w"].shape[0], p["conv1_w"].shape[1]
    s0, t0 = bn_fold(*p["bn0"]); s1, t1 = bn_fold(*p["bn1"])
    s2, t2 = bn_fold(*p["bn2"]); s3, t3 = bn_fold(*p["bn3"])
    s4, t4 = bn_fold(*p["bn4"]); sf, tf = bn_fold(*p["bn_fc"])

    w1 = p["conv1_w"].reshape(Ch, C)           # (out, in)
    w2 = p["conv2_w"].reshape(Ch, Ch)
    w3 = p["conv3_w"].reshape(Ch, Ch * 27)     # column idx = ci*27 + (kd*9+kh*3+kw)
    w4 = p["conv4_w"].reshape(Ch, Ch * 27)
    wl1 = p["lin1_w"]                          # (128, flatten)

    return {
        # BN0 folded on input side, BN1 on output side of conv1
        "w1": (w1 * s0[None, :]) * s1[:, None],
        "b1": s1 * (jnp.sum(w1 * t0[None, :], axis=1) + p["conv1_b"]) + t1,
        "w2": w2 * s2[:, None], "b2": s2 * p["conv2_b"] + t2,
        "w3": w3 * s3[:, None], "b3": s3 * p["conv3_b"] + t3,
        "w4": w4 * s4[:, None], "b4": s4 * p["conv4_b"] + t4,
        # BN1d folded into the first linear layer
        "wl1": wl1 * sf[None, :],
        "bl1": jnp.sum(wl1 * tf[None, :], axis=1) + p["lin1_b"],
        "wl2": p["lin2_w"], "bl2": p["lin2_b"],
        "wl3": p["lin3_w"], "bl3": p["lin3_b"],
    }


def pool_groups_1x1(x):
    """(C,B,D,H,W) -> (8, C, B*(D//2)*(H//2)*(W//2)); group g = (d%2,h%2,w%2)."""
    C, B, D, H, W = x.shape
    Dp, Hp, Wp = D // 2, H // 2, W // 2
    x = x[:, :, :2 * Dp, :2 * Hp, :2 * Wp]
    x = x.reshape(C, B, Dp, 2, Hp, 2, Wp, 2)
    x = jnp.transpose(x, (3, 5, 7, 0, 1, 2, 4, 6))
    return x.reshape(8, C, B * Dp * Hp * Wp)


def im2col_pool_groups(x, K=3):
    """(C,B,D,H,W) -> (8, C*K^3, B*Dp*Hp*Wp) cols for a valid K-conv followed by pool(2)."""
    C, B, D, H, W = x.shape
    Do, Ho, Wo = D - K + 1, H - K + 1, W - K + 1
    Dp, Hp, Wp = Do // 2, Ho // 2, Wo // 2
    taps = []
    for kd in range(K):
        for kh in range(K):
            for kw in range(K):
                taps.append(x[:, :, kd:kd + Do, kh:kh + Ho, kw:kw + Wo])
    p = jnp.stack(taps, axis=1)                           # (C, K^3, B, Do, Ho, Wo)
    p = p[:, :, :, :2 * Dp, :2 * Hp, :2 * Wp]
    p = p.reshape(C, K * K * K, B, Dp, 2, Hp, 2, Wp, 2)
    p = jnp.transpose(p, (4, 6, 8, 0, 1, 2, 3, 5, 7))     # (2,2,2, C, K^3, B, Dp, Hp, Wp)
    return p.reshape(8, C * K * K * K, B * Dp * Hp * Wp)


def forward(x_ncdhw, p):
    """Forward pass. x_ncdhw: (B, C, D, H, W) float32 -> (B, 1)."""
    B, C, D, H, W = x_ncdhw.shape
    Ch = C // 2
    fp = fold_params(p)

    x = jnp.transpose(x_ncdhw, (1, 0, 2, 3, 4)).astype(jnp.float32)   # (C,B,D,H,W)

    # Stage 1: BN0+Conv1(1x1)+BN1+ReLU+Conv2(1x1)+BN2+MaxPool+ReLU  (kernel K1)
    a = conv12_pool(pool_groups_1x1(x), fp["w1"], fp["b1"], fp["w2"], fp["b2"])
    D1, H1, W1 = D // 2, H // 2, W // 2
    a = a.reshape(Ch, B, D1, H1, W1)

    # Stage 2: Conv3(3x3x3)+BN3+MaxPool+ReLU  (kernel K2)
    a = convk3_pool(im2col_pool_groups(a), fp["w3"], fp["b3"])
    D2, H2, W2 = (D1 - 2) // 2, (H1 - 2) // 2, (W1 - 2) // 2
    a = a.reshape(Ch, B, D2, H2, W2)

    # Stage 3: Conv4+BN4+MaxPool+ReLU + Flatten+BN1d+Lin+ReLU+Lin+ReLU+Lin+Sigmoid (kernel K3)
    D3, H3, W3 = (D2 - 2) // 2, (H2 - 2) // 2, (W2 - 2) // 2
    assert (D3, H3, W3) == (1, 1, 1), "fused FC head assumes the conv stack ends at 1x1x1"
    out = conv4_fc_head(im2col_pool_groups(a), fp["w4"], fp["b4"],
                        fp["wl1"], fp["bl1"], fp["wl2"], fp["bl2"],
                        fp["wl3"], fp["bl3"])             # (1, B)
    return out.T                                          # (B, 1)


# ----------------------------------------------------------------------------
# Pure-JAX reference (eval-mode semantics) for a numerical self-check
# ----------------------------------------------------------------------------
def reference_forward(x, p):
    with jax.default_matmul_precision("float32"):
        def bn3d(x, prm):
            g, b, m, v = prm
            shp = (1, -1, 1, 1, 1)
            return (x - m.reshape(shp)) * (g.reshape(shp) / jnp.sqrt(v.reshape(shp) + EPS)) + b.reshape(shp)

        def conv(x, w, b):
            y = jax.lax.conv_general_dilated(
                x, w, window_strides=(1, 1, 1), padding="VALID",
                dimension_numbers=("NCDHW", "OIDHW", "NCDHW"),
                precision=jax.lax.Precision.HIGHEST)
            return y + b.reshape(1, -1, 1, 1, 1)

        def pool(x):
            return jax.lax.reduce_window(
                x, -jnp.inf, jax.lax.max,
                window_dimensions=(1, 1, 2, 2, 2),
                window_strides=(1, 1, 2, 2, 2), padding="VALID")

        x = bn3d(x, p["bn0"])
        x = jax.nn.relu(bn3d(conv(x, p["conv1_w"], p["conv1_b"]), p["bn1"]))
        x = jax.nn.relu(pool(bn3d(conv(x, p["conv2_w"], p["conv2_b"]), p["bn2"])))
        x = jax.nn.relu(pool(bn3d(conv(x, p["conv3_w"], p["conv3_b"]), p["bn3"])))
        x = jax.nn.relu(pool(bn3d(conv(x, p["conv4_w"], p["conv4_b"]), p["bn4"])))
        B = x.shape[0]
        f = x.reshape(B, -1)
        g, b, m, v = p["bn_fc"]
        f = (f - m) * (g / jnp.sqrt(v + EPS)) + b
        h = jax.nn.relu(jnp.dot(f, p["lin1_w"].T) + p["lin1_b"])
        h = jax.nn.relu(jnp.dot(h, p["lin2_w"].T) + p["lin2_b"])
        return jax.nn.sigmoid(jnp.dot(h, p["lin3_w"].T) + p["lin3_b"])


# ----------------------------------------------------------------------------
# Deterministic parameter init (shapes follow the PyTorch module __init__)
# ----------------------------------------------------------------------------
def init_params(key, C, flatten_shape):
    Ch = C // 2
    ks = iter(jax.random.split(key, 32))

    def bn(n):  # non-trivial running stats so BN folding is actually exercised
        return (jax.random.uniform(next(ks), (n,), jnp.float32, 0.5, 1.5),
                0.1 * jax.random.normal(next(ks), (n,), jnp.float32),
                0.1 * jax.random.normal(next(ks), (n,), jnp.float32),
                jax.random.uniform(next(ks), (n,), jnp.float32, 0.5, 1.5))

    def w(shape, fan_in):
        return jax.random.normal(next(ks), shape, jnp.float32) / jnp.sqrt(float(fan_in))

    return {
        "bn0": bn(C),
        "conv1_w": w((Ch, C, 1, 1, 1), C), "conv1_b": jnp.zeros((Ch,), jnp.float32),
        "bn1": bn(Ch),
        "conv2_w": w((Ch, Ch, 1, 1, 1), Ch), "conv2_b": jnp.zeros((Ch,), jnp.float32),
        "bn2": bn(Ch),
        "conv3_w": w((Ch, Ch, 3, 3, 3), Ch * 27), "conv3_b": jnp.zeros((Ch,), jnp.float32),
        "bn3": bn(Ch),
        "conv4_w": w((Ch, Ch, 3, 3, 3), Ch * 27), "conv4_b": jnp.zeros((Ch,), jnp.float32),
        "bn4": bn(Ch),
        "bn_fc": bn(flatten_shape),
        "lin1_w": w((128, flatten_shape), flatten_shape), "lin1_b": jnp.zeros((128,), jnp.float32),
        "lin2_w": w((128, 128), 128), "lin2_b": jnp.zeros((128,), jnp.float32),
        "lin3_w": w((1, 128), 128), "lin3_b": jnp.zeros((1,), jnp.float32),
    }


if __name__ == "__main__":
    key = jax.random.PRNGKey(0)
    # input_shape = (C, D, H, W) = (8, 20, 20, 20): 20 ->(pool) 10 ->(k3,pool) 4 ->(k3,pool) 1
    B, C, S = 2, 8, 20
    Ch = C // 2
    flatten_shape = Ch * 1 * 1 * 1

    k_x, k_p = jax.random.split(key)
    x = jax.random.normal(k_x, (B, C, S, S, S), jnp.float32)
    params = init_params(k_p, C, flatten_shape)

    y = jax.jit(forward)(x, params)
    jax.block_until_ready(y)

    y_ref = jax.jit(reference_forward)(x, params)
    jax.block_until_ready(y_ref)

    assert y.shape == (B, 1)
    assert bool(jnp.all(jnp.isfinite(y)))
    assert bool(jnp.all((y >= 0.0) & (y <= 1.0)))
    assert bool(jnp.allclose(y, y_ref, atol=1e-3, rtol=1e-3)), (y, y_ref)
    print("KERNEL_OK")
</pallas_src>

<mosaic_0001>
module attributes {stable_mosaic.version = 11 : i64} {
  func.func @_conv12_pool_kernel(%arg0: i32, %arg1: memref<8x8x2000xf32, #tpu.memory_space<vmem>>, %arg2: memref<4x8xf32, #tpu.memory_space<vmem>>, %arg3: memref<4x1xf32, #tpu.memory_space<vmem>>, %arg4: memref<4x4xf32, #tpu.memory_space<vmem>>, %arg5: memref<4x1xf32, #tpu.memory_space<vmem>>, %arg6: memref<4x2000xf32, #tpu.memory_space<vmem>>) attributes {dimension_semantics = [#tpu.dimension_semantics<arbitrary>], iteration_bounds = array<i64: 1>, scalar_prefetch = 0 : i64, scratch_operands = 0 : i64, tpu.core_type = #tpu.core_type<tc>, window_params = [{pipeline_mode = #tpu.pipeline_mode<synchronous>, transform_indices = @transform_0, window_bounds = array<i64: 8, 8, 2000>}, {pipeline_mode = #tpu.pipeline_mode<synchronous>, transform_indices = @transform_1, window_bounds = array<i64: 4, 8>}, {pipeline_mode = #tpu.pipeline_mode<synchronous>, transform_indices = @transform_2, window_bounds = array<i64: 4, 1>}, {pipeline_mode = #tpu.pipeline_mode<synchronous>, transform_indices = @transform_3, window_bounds = array<i64: 4, 4>}, {pipeline_mode = #tpu.pipeline_mode<synchronous>, transform_indices = @transform_4, window_bounds = array<i64: 4, 1>}, {pipeline_mode = #tpu.pipeline_mode<synchronous>, transform_indices = @transform_5, window_bounds = array<i64: 4, 2000>}]} {
    %c0 = arith.constant 0 : index
    %c0_0 = arith.constant 0 : index
    %0 = vector.load %arg2[%c0, %c0_0] : memref<4x8xf32, #tpu.memory_space<vmem>>, vector<4x8xf32>
    %c0_1 = arith.constant 0 : index
    %c0_2 = arith.constant 0 : index
    %1 = vector.load %arg3[%c0_1, %c0_2] : memref<4x1xf32, #tpu.memory_space<vmem>>, vector<4x1xf32>
    %c0_3 = arith.constant 0 : index
    %c0_4 = arith.constant 0 : index
    %2 = vector.load %arg4[%c0_3, %c0_4] : memref<4x4xf32, #tpu.memory_space<vmem>>, vector<4x4xf32>
    %c0_5 = arith.constant 0 : index
    %c0_6 = arith.constant 0 : index
    %3 = vector.load %arg5[%c0_5, %c0_6] : memref<4x1xf32, #tpu.memory_space<vmem>>, vector<4x1xf32>
    %c0_7 = arith.constant 0 : index
    %c0_8 = arith.constant 0 : index
    %c0_9 = arith.constant 0 : index
    %4 = vector.load %arg1[%c0_7, %c0_8, %c0_9] : memref<8x8x2000xf32, #tpu.memory_space<vmem>>, vector<1x8x2000xf32>
    %5 = vector.shape_cast %4 : vector<1x8x2000xf32> to vector<8x2000xf32>
    %cst = arith.constant dense<0.000000e+00> : vector<4x2000xf32>
    %6 = tpu.matmul %0, %5, %cst {dimension_numbers = #tpu.dot_dimension_numbers<[1], [0], [0], [1], [0, 0, 1, 1], [], []>} : vector<4x8xf32>, vector<8x2000xf32>, vector<4x2000xf32> -> vector<4x2000xf32>
    %7 = vector.broadcast %1 : vector<4x1xf32> to vector<4x2000xf32>
    %8 = arith.addf %6, %7 : vector<4x2000xf32>
    %cst_10 = arith.constant 0.000000e+00 : f32
    %9 = vector.broadcast %cst_10 : f32 to vector<4x2000xf32>
    %10 = arith.maximumf %8, %9 : vector<4x2000xf32>
    %cst_11 = arith.constant dense<0.000000e+00> : vector<4x2000xf32>
    %11 = tpu.matmul %2, %10, %cst_11 {dimension_numbers = #tpu.dot_dimension_numbers<[1], [0], [0], [1], [0, 0, 1, 1], [], []>} : vector<4x4xf32>, vector<4x2000xf32>, vector<4x2000xf32> -> vector<4x2000xf32>
    %12 = vector.broadcast %3 : vector<4x1xf32> to vector<4x2000xf32>
    %13 = arith.addf %11, %12 : vector<4x2000xf32>
    %c1 = arith.constant 1 : index
    %c0_12 = arith.constant 0 : index
    %c0_13 = arith.constant 0 : index
    %14 = vector.load %arg1[%c1, %c0_12, %c0_13] : memref<8x8x2000xf32, #tpu.memory_space<vmem>>, vector<1x8x2000xf32>
    %15 = vector.shape_cast %14 : vector<1x8x2000xf32> to vector<8x2000xf32>
    %cst_14 = arith.constant dense<0.000000e+00> : vector<4x2000xf32>
    %16 = tpu.matmul %0, %15, %cst_14 {dimension_numbers = #tpu.dot_dimension_numbers<[1], [0], [0], [1], [0, 0, 1, 1], [], []>} : vector<4x8xf32>, vector<8x2000xf32>, vector<4x2000xf32> -> vector<4x2000xf32>
    %17 = vector.broadcast %1 : vector<4x1xf32> to vector<4x2000xf32>
    %18 = arith.addf %16, %17 : vector<4x2000xf32>
    %cst_15 = arith.constant 0.000000e+00 : f32
    %19 = vector.broadcast %cst_15 : f32 to vector<4x2000xf32>
    %20 = arith.maximumf %18, %19 : vector<4x2000xf32>
    %cst_16 = arith.constant dense<0.000000e+00> : vector<4x2000xf32>
    %21 = tpu.matmul %2, %20, %cst_16 {dimension_numbers = #tpu.dot_dimension_numbers<[1], [0], [0], [1], [0, 0, 1, 1], [], []>} : vector<4x4xf32>, vector<4x2000xf32>, vector<4x2000xf32> -> vector<4x2000xf32>
    %22 = vector.broadcast %3 : vector<4x1xf32> to vector<4x2000xf32>
    %23 = arith.addf %21, %22 : vector<4x2000xf32>
    %24 = arith.maximumf %13, %23 : vector<4x2000xf32>
    %c2 = arith.constant 2 : index
    %c0_17 = arith.constant 0 : index
    %c0_18 = arith.constant 0 : index
    %25 = vector.load %arg1[%c2, %c0_17, %c0_18] : memref<8x8x2000xf32, #tpu.memory_space<vmem>>, vector<1x8x2000xf32>
    %26 = vector.shape_cast %25 : vector<1x8x2000xf32> to vector<8x2000xf32>
    %cst_19 = arith.constant dense<0.000000e+00> : vector<4x2000xf32>
    %27 = tpu.matmul %0, %26, %cst_19 {dimension_numbers = #tpu.dot_dimension_numbers<[1], [0], [0], [1], [0, 0, 1, 1], [], []>} : vector<4x8xf32>, vector<8x2000xf32>, vector<4x2000xf32> -> vector<4x2000xf32>
    %28 = vector.broadcast %1 : vector<4x1xf32> to vector<4x2000xf32>
    %29 = arith.addf %27, %28 : vector<4x2000xf32>
    %cst_20 = arith.constant 0.000000e+00 : f32
    %30 = vector.broadcast %cst_20 : f32 to vector<4x2000xf32>
    %31 = arith.maximumf %29, %30 : vector<4x2000xf32>
    %cst_21 = arith.constant dense<0.000000e+00> : vector<4x2000xf32>
    %32 = tpu.matmul %2, %31, %cst_21 {dimension_numbers = #tpu.dot_dimension_numbers<[1], [0], [0], [1], [0, 0, 1, 1], [], []>} : vector<4x4xf32>, vector<4x2000xf32>, vector<4x2000xf32> -> vector<4x2000xf32>
    %33 = vector.broadcast %3 : vector<4x1xf32> to vector<4x2000xf32>
    %34 = arith.addf %32, %33 : vector<4x2000xf32>
    %35 = arith.maximumf %24, %34 : vector<4x2000xf32>
    %c3 = arith.constant 3 : index
    %c0_22 = arith.constant 0 : index
    %c0_23 = arith.constant 0 : index
    %36 = vector.load %arg1[%c3, %c0_22, %c0_23] : memref<8x8x2000xf32, #tpu.memory_space<vmem>>, vector<1x8x2000xf32>
    %37 = vector.shape_cast %36 : vector<1x8x2000xf32> to vector<8x2000xf32>
    %cst_24 = arith.constant dense<0.000000e+00> : vector<4x2000xf32>
    %38 = tpu.matmul %0, %37, %cst_24 {dimension_numbers = #tpu.dot_dimension_numbers<[1], [0], [0], [1], [0, 0, 1, 1], [], []>} : vector<4x8xf32>, vector<8x2000xf32>, vector<4x2000xf32> -> vector<4x2000xf32>
    %39 = vector.broadcast %1 : vector<4x1xf32> to vector<4x2000xf32>
    %40 = arith.addf %38, %39 : vector<4x2000xf32>
    %cst_25 = arith.constant 0.000000e+00 : f32
    %41 = vector.broadcast %cst_25 : f32 to vector<4x2000xf32>
    %42 = arith.maximumf %40, %41 : vector<4x2000xf32>
    %cst_26 = arith.constant dense<0.000000e+00> : vector<4x2000xf32>
    %43 = tpu.matmul %2, %42, %cst_26 {dimension_numbers = #tpu.dot_dimension_numbers<[1], [0], [0], [1], [0, 0, 1, 1], [], []>} : vector<4x4xf32>, vector<4x2000xf32>, vector<4x2000xf32> -> vector<4x2000xf32>
    %44 = vector.broadcast %3 : vector<4x1xf32> to vector<4x2000xf32>
    %45 = arith.addf %43, %44 : vector<4x2000xf32>
    %46 = arith.maximumf %35, %45 : vector<4x2000xf32>
    %c4 = arith.constant 4 : index
    %c0_27 = arith.constant 0 : index
    %c0_28 = arith.constant 0 : index
    %47 = vector.load %arg1[%c4, %c0_27, %c0_28] : memref<8x8x2000xf32, #tpu.memory_space<vmem>>, vector<1x8x2000xf32>
    %48 = vector.shape_cast %47 : vector<1x8x2000xf32> to vector<8x2000xf32>
    %cst_29 = arith.constant dense<0.000000e+00> : vector<4x2000xf32>
    %49 = tpu.matmul %0, %48, %cst_29 {dimension_numbers = #tpu.dot_dimension_numbers<[1], [0], [0], [1], [0, 0, 1, 1], [], []>} : vector<4x8xf32>, vector<8x2000xf32>, vector<4x2000xf32> -> vector<4x2000xf32>
    %50 = vector.broadcast %1 : vector<4x1xf32> to vector<4x2000xf32>
    %51 = arith.addf %49, %50 : vector<4x2000xf32>
    %cst_30 = arith.constant 0.000000e+00 : f32
    %52 = vector.broadcast %cst_30 : f32 to vector<4x2000xf32>
    %53 = arith.maximumf %51, %52 : vector<4x2000xf32>
    %cst_31 = arith.constant dense<0.000000e+00> : vector<4x2000xf32>
    %54 = tpu.matmul %2, %53, %cst_31 {dimension_numbers = #tpu.dot_dimension_numbers<[1], [0], [0], [1], [0, 0, 1, 1], [], []>} : vector<4x4xf32>, vector<4x2000xf32>, vector<4x2000xf32> -> vector<4x2000xf32>
    %55 = vector.broadcast %3 : vector<4x1xf32> to vector<4x2000xf32>
    %56 = arith.addf %54, %55 : vector<4x2000xf32>
    %57 = arith.maximumf %46, %56 : vector<4x2000xf32>
    %c5 = arith.constant 5 : index
    %c0_32 = arith.constant 0 : index
    %c0_33 = arith.constant 0 : index
    %58 = vector.load %arg1[%c5, %c0_32, %c0_33] : memref<8x8x2000xf32, #tpu.memory_space<vmem>>, vector<1x8x2000xf32>
    %59 = vector.shape_cast %58 : vector<1x8x2000xf32> to vector<8x2000xf32>
    %cst_34 = arith.constant dense<0.000000e+00> : vector<4x2000xf32>
    %60 = tpu.matmul %0, %59, %cst_34 {dimension_numbers = #tpu.dot_dimension_numbers<[1], [0], [0], [1], [0, 0, 1, 1], [], []>} : vector<4x8xf32>, vector<8x2000xf32>, vector<4x2000xf32> -> vector<4x2000xf32>
    %61 = vector.broadcast %1 : vector<4x1xf32> to vector<4x2000xf32>
    %62 = arith.addf %60, %61 : vector<4x2000xf32>
    %cst_35 = arith.constant 0.000000e+00 : f32
    %63 = vector.broadcast %cst_35 : f32 to vector<4x2000xf32>
    %64 = arith.maximumf %62, %63 : vector<4x2000xf32>
    %cst_36 = arith.constant dense<0.000000e+00> : vector<4x2000xf32>
    %65 = tpu.matmul %2, %64, %cst_36 {dimension_numbers = #tpu.dot_dimension_numbers<[1], [0], [0], [1], [0, 0, 1, 1], [], []>} : vector<4x4xf32>, vector<4x2000xf32>, vector<4x2000xf32> -> vector<4x2000xf32>
    %66 = vector.broadcast %3 : vector<4x1xf32> to vector<4x2000xf32>
    %67 = arith.addf %65, %66 : vector<4x2000xf32>
    %68 = arith.maximumf %57, %67 : vector<4x2000xf32>
    %c6 = arith.constant 6 : index
    %c0_37 = arith.constant 0 : index
    %c0_38 = arith.constant 0 : index
    %69 = vector.load %arg1[%c6, %c0_37, %c0_38] : memref<8x8x2000xf32, #tpu.memory_space<vmem>>, vector<1x8x2000xf32>
    %70 = vector.shape_cast %69 : vector<1x8x2000xf32> to vector<8x2000xf32>
    %cst_39 = arith.constant dense<0.000000e+00> : vector<4x2000xf32>
    %71 = tpu.matmul %0, %70, %cst_39 {dimension_numbers = #tpu.dot_dimension_numbers<[1], [0], [0], [1], [0, 0, 1, 1], [], []>} : vector<4x8xf32>, vector<8x2000xf32>, vector<4x2000xf32> -> vector<4x2000xf32>
    %72 = vector.broadcast %1 : vector<4x1xf32> to vector<4x2000xf32>
    %73 = arith.addf %71, %72 : vector<4x2000xf32>
    %cst_40 = arith.constant 0.000000e+00 : f32
    %74 = vector.broadcast %cst_40 : f32 to vector<4x2000xf32>
    %75 = arith.maximumf %73, %74 : vector<4x2000xf32>
    %cst_41 = arith.constant dense<0.000000e+00> : vector<4x2000xf32>
    %76 = tpu.matmul %2, %75, %cst_41 {dimension_numbers = #tpu.dot_dimension_numbers<[1], [0], [0], [1], [0, 0, 1, 1], [], []>} : vector<4x4xf32>, vector<4x2000xf32>, vector<4x2000xf32> -> vector<4x2000xf32>
    %77 = vector.broadcast %3 : vector<4x1xf32> to vector<4x2000xf32>
    %78 = arith.addf %76, %77 : vector<4x2000xf32>
    %79 = arith.maximumf %68, %78 : vector<4x2000xf32>
    %c7 = arith.constant 7 : index
    %c0_42 = arith.constant 0 : index
    %c0_43 = arith.constant 0 : index
    %80 = vector.load %arg1[%c7, %c0_42, %c0_43] : memref<8x8x2000xf32, #tpu.memory_space<vmem>>, vector<1x8x2000xf32>
    %81 = vector.shape_cast %80 : vector<1x8x2000xf32> to vector<8x2000xf32>
    %cst_44 = arith.constant dense<0.000000e+00> : vector<4x2000xf32>
    %82 = tpu.matmul %0, %81, %cst_44 {dimension_numbers = #tpu.dot_dimension_numbers<[1], [0], [0], [1], [0, 0, 1, 1], [], []>} : vector<4x8xf32>, vector<8x2000xf32>, vector<4x2000xf32> -> vector<4x2000xf32>
    %83 = vector.broadcast %1 : vector<4x1xf32> to vector<4x2000xf32>
    %84 = arith.addf %82, %83 : vector<4x2000xf32>
    %cst_45 = arith.constant 0.000000e+00 : f32
    %85 = vector.broadcast %cst_45 : f32 to vector<4x2000xf32>
    %86 = arith.maximumf %84, %85 : vector<4x2000xf32>
    %cst_46 = arith.constant dense<0.000000e+00> : vector<4x2000xf32>
    %87 = tpu.matmul %2, %86, %cst_46 {dimension_numbers = #tpu.dot_dimension_numbers<[1], [0], [0], [1], [0, 0, 1, 1], [], []>} : vector<4x4xf32>, vector<4x2000xf32>, vector<4x2000xf32> -> vector<4x2000xf32>
    %88 = vector.broadcast %3 : vector<4x1xf32> to vector<4x2000xf32>
    %89 = arith.addf %87, %88 : vector<4x2000xf32>
    %90 = arith.maximumf %79, %89 : vector<4x2000xf32>
    %cst_47 = arith.constant 0.000000e+00 : f32
    %91 = vector.broadcast %cst_47 : f32 to vector<4x2000xf32>
    %92 = arith.maximumf %90, %91 : vector<4x2000xf32>
    %c0_48 = arith.constant 0 : index
    %c0_49 = arith.constant 0 : index
    %93 = vector.load %arg6[%c0_48, %c0_49] : memref<4x2000xf32, #tpu.memory_space<vmem>>, vector<4x2000xf32>
    tpu.vector_store %arg6[%c0_48, %c0_49], %92 {strides = array<i32>} : memref<4x2000xf32, #tpu.memory_space<vmem>>, vector<4x2000xf32>,
    return
  }
  func.func @transform_0(%arg0: i32) -> (i32, i32, i32) {
    %c0_i32 = arith.constant 0 : i32
    %c0_i32_0 = arith.constant 0 : i32
    %c0_i32_1 = arith.constant 0 : i32
    %c0_i32_2 = arith.constant 0 : i32
    return %c0_i32, %c0_i32_0, %c0_i32_1 : i32, i32, i32
  }
  func.func @transform_1(%arg0: i32) -> (i32, i32) {
    %c0_i32 = arith.constant 0 : i32
    %c0_i32_0 = arith.constant 0 : i32
    %c0_i32_1 = arith.constant 0 : i32
    return %c0_i32, %c0_i32_0 : i32, i32
  }
  func.func @transform_2(%arg0: i32) -> (i32, i32) {
    %c0_i32 = arith.constant 0 : i32
    %c0_i32_0 = arith.constant 0 : i32
    %c0_i32_1 = arith.constant 0 : i32
    return %c0_i32, %c0_i32_0 : i32, i32
  }
  func.func @transform_3(%arg0: i32) -> (i32, i32) {
    %c0_i32 = arith.constant 0 : i32
    %c0_i32_0 = arith.constant 0 : i32
    %c0_i32_1 = arith.constant 0 : i32
    return %c0_i32, %c0_i32_0 : i32, i32
  }
  func.func @transform_4(%arg0: i32) -> (i32, i32) {
    %c0_i32 = arith.constant 0 : i32
    %c0_i32_0 = arith.constant 0 : i32
    %c0_i32_1 = arith.constant 0 : i32
    return %c0_i32, %c0_i32_0 : i32, i32
  }
  func.func @transform_5(%arg0: i32) -> (i32, i32) {
    %c0_i32 = arith.constant 0 : i32
    %c0_i32_0 = arith.constant 0 : i32
    %c0_i32_1 = arith.constant 0 : i32
    return %c0_i32, %c0_i32_0 : i32, i32
  }
}

module attributes {stable_mosaic.version = 11 : i64} {
  func.func @_convk3_pool_kernel(%arg0: i32, %arg1: memref<8x108x128xf32, #tpu.memory_space<vmem>>, %arg2: memref<4x108xf32, #tpu.memory_space<vmem>>, %arg3: memref<4x1xf32, #tpu.memory_space<vmem>>, %arg4: memref<4x128xf32, #tpu.memory_space<vmem>>) attributes {dimension_semantics = [#tpu.dimension_semantics<arbitrary>], iteration_bounds = array<i64: 1>, scalar_prefetch = 0 : i64, scratch_operands = 0 : i64, tpu.core_type = #tpu.core_type<tc>, window_params = [{pipeline_mode = #tpu.pipeline_mode<synchronous>, transform_indices = @transform_0, window_bounds = array<i64: 8, 108, 128>}, {pipeline_mode = #tpu.pipeline_mode<synchronous>, transform_indices = @transform_1, window_bounds = array<i64: 4, 108>}, {pipeline_mode = #tpu.pipeline_mode<synchronous>, transform_indices = @transform_2, window_bounds = array<i64: 4, 1>}, {pipeline_mode = #tpu.pipeline_mode<synchronous>, transform_indices = @transform_3, window_bounds = array<i64: 4, 128>}]} {
    %c0 = arith.constant 0 : index
    %c0_0 = arith.constant 0 : index
    %0 = vector.load %arg2[%c0, %c0_0] : memref<4x108xf32, #tpu.memory_space<vmem>>, vector<4x108xf32>
    %c0_1 = arith.constant 0 : index
    %c0_2 = arith.constant 0 : index
    %1 = vector.load %arg3[%c0_1, %c0_2] : memref<4x1xf32, #tpu.memory_space<vmem>>, vector<4x1xf32>
    %c0_3 = arith.constant 0 : index
    %c0_4 = arith.constant 0 : index
    %c0_5 = arith.constant 0 : index
    %2 = vector.load %arg1[%c0_3, %c0_4, %c0_5] : memref<8x108x128xf32, #tpu.memory_space<vmem>>, vector<1x108x128xf32>
    %3 = vector.shape_cast %2 : vector<1x108x128xf32> to vector<108x128xf32>
    %cst = arith.constant dense<0.000000e+00> : vector<4x128xf32>
    %4 = tpu.matmul %0, %3, %cst {dimension_numbers = #tpu.dot_dimension_numbers<[1], [0], [0], [1], [0, 0, 1, 1], [], []>} : vector<4x108xf32>, vector<108x128xf32>, vector<4x128xf32> -> vector<4x128xf32>
    %5 = vector.broadcast %1 : vector<4x1xf32> to vector<4x128xf32>
    %6 = arith.addf %4, %5 : vector<4x128xf32>
    %c1 = arith.constant 1 : index
    %c0_6 = arith.constant 0 : index
    %c0_7 = arith.constant 0 : index
    %7 = vector.load %arg1[%c1, %c0_6, %c0_7] : memref<8x108x128xf32, #tpu.memory_space<vmem>>, vector<1x108x128xf32>
    %8 = vector.shape_cast %7 : vector<1x108x128xf32> to vector<108x128xf32>
    %cst_8 = arith.constant dense<0.000000e+00> : vector<4x128xf32>
    %9 = tpu.matmul %0, %8, %cst_8 {dimension_numbers = #tpu.dot_dimension_numbers<[1], [0], [0], [1], [0, 0, 1, 1], [], []>} : vector<4x108xf32>, vector<108x128xf32>, vector<4x128xf32> -> vector<4x128xf32>
    %10 = vector.broadcast %1 : vector<4x1xf32> to vector<4x128xf32>
    %11 = arith.addf %9, %10 : vector<4x128xf32>
    %12 = arith.maximumf %6, %11 : vector<4x128xf32>
    %c2 = arith.constant 2 : index
    %c0_9 = arith.constant 0 : index
    %c0_10 = arith.constant 0 : index
    %13 = vector.load %arg1[%c2, %c0_9, %c0_10] : memref<8x108x128xf32, #tpu.memory_space<vmem>>, vector<1x108x128xf32>
    %14 = vector.shape_cast %13 : vector<1x108x128xf32> to vector<108x128xf32>
    %cst_11 = arith.constant dense<0.000000e+00> : vector<4x128xf32>
    %15 = tpu.matmul %0, %14, %cst_11 {dimension_numbers = #tpu.dot_dimension_numbers<[1], [0], [0], [1], [0, 0, 1, 1], [], []>} : vector<4x108xf32>, vector<108x128xf32>, vector<4x128xf32> -> vector<4x128xf32>
    %16 = vector.broadcast %1 : vector<4x1xf32> to vector<4x128xf32>
    %17 = arith.addf %15, %16 : vector<4x128xf32>
    %18 = arith.maximumf %12, %17 : vector<4x128xf32>
    %c3 = arith.constant 3 : index
    %c0_12 = arith.constant 0 : index
    %c0_13 = arith.constant 0 : index
    %19 = vector.load %arg1[%c3, %c0_12, %c0_13] : memref<8x108x128xf32, #tpu.memory_space<vmem>>, vector<1x108x128xf32>
    %20 = vector.shape_cast %19 : vector<1x108x128xf32> to vector<108x128xf32>
    %cst_14 = arith.constant dense<0.000000e+00> : vector<4x128xf32>
    %21 = tpu.matmul %0, %20, %cst_14 {dimension_numbers = #tpu.dot_dimension_numbers<[1], [0], [0], [1], [0, 0, 1, 1], [], []>} : vector<4x108xf32>, vector<108x128xf32>, vector<4x128xf32> -> vector<4x128xf32>
    %22 = vector.broadcast %1 : vector<4x1xf32> to vector<4x128xf32>
    %23 = arith.addf %21, %22 : vector<4x128xf32>
    %24 = arith.maximumf %18, %23 : vector<4x128xf32>
    %c4 = arith.constant 4 : index
    %c0_15 = arith.constant 0 : index
    %c0_16 = arith.constant 0 : index
    %25 = vector.load %arg1[%c4, %c0_15, %c0_16] : memref<8x108x128xf32, #tpu.memory_space<vmem>>, vector<1x108x128xf32>
    %26 = vector.shape_cast %25 : vector<1x108x128xf32> to vector<108x128xf32>
    %cst_17 = arith.constant dense<0.000000e+00> : vector<4x128xf32>
    %27 = tpu.matmul %0, %26, %cst_17 {dimension_numbers = #tpu.dot_dimension_numbers<[1], [0], [0], [1], [0, 0, 1, 1], [], []>} : vector<4x108xf32>, vector<108x128xf32>, vector<4x128xf32> -> vector<4x128xf32>
    %28 = vector.broadcast %1 : vector<4x1xf32> to vector<4x128xf32>
    %29 = arith.addf %27, %28 : vector<4x128xf32>
    %30 = arith.maximumf %24, %29 : vector<4x128xf32>
    %c5 = arith.constant 5 : index
    %c0_18 = arith.constant 0 : index
    %c0_19 = arith.constant 0 : index
    %31 = vector.load %arg1[%c5, %c0_18, %c0_19] : memref<8x108x128xf32, #tpu.memory_space<vmem>>, vector<1x108x128xf32>
    %32 = vector.shape_cast %31 : vector<1x108x128xf32> to vector<108x128xf32>
    %cst_20 = arith.constant dense<0.000000e+00> : vector<4x128xf32>
    %33 = tpu.matmul %0, %32, %cst_20 {dimension_numbers = #tpu.dot_dimension_numbers<[1], [0], [0], [1], [0, 0, 1, 1], [], []>} : vector<4x108xf32>, vector<108x128xf32>, vector<4x128xf32> -> vector<4x128xf32>
    %34 = vector.broadcast %1 : vector<4x1xf32> to vector<4x128xf32>
    %35 = arith.addf %33, %34 : vector<4x128xf32>
    %36 = arith.maximumf %30, %35 : vector<4x128xf32>
    %c6 = arith.constant 6 : index
    %c0_21 = arith.constant 0 : index
    %c0_22 = arith.constant 0 : index
    %37 = vector.load %arg1[%c6, %c0_21, %c0_22] : memref<8x108x128xf32, #tpu.memory_space<vmem>>, vector<1x108x128xf32>
    %38 = vector.shape_cast %37 : vector<1x108x128xf32> to vector<108x128xf32>
    %cst_23 = arith.constant dense<0.000000e+00> : vector<4x128xf32>
    %39 = tpu.matmul %0, %38, %cst_23 {dimension_numbers = #tpu.dot_dimension_numbers<[1], [0], [0], [1], [0, 0, 1, 1], [], []>} : vector<4x108xf32>, vector<108x128xf32>, vector<4x128xf32> -> vector<4x128xf32>
    %40 = vector.broadcast %1 : vector<4x1xf32> to vector<4x128xf32>
    %41 = arith.addf %39, %40 : vector<4x128xf32>
    %42 = arith.maximumf %36, %41 : vector<4x128xf32>
    %c7 = arith.constant 7 : index
    %c0_24 = arith.constant 0 : index
    %c0_25 = arith.constant 0 : index
    %43 = vector.load %arg1[%c7, %c0_24, %c0_25] : memref<8x108x128xf32, #tpu.memory_space<vmem>>, vector<1x108x128xf32>
    %44 = vector.shape_cast %43 : vector<1x108x128xf32> to vector<108x128xf32>
    %cst_26 = arith.constant dense<0.000000e+00> : vector<4x128xf32>
    %45 = tpu.matmul %0, %44, %cst_26 {dimension_numbers = #tpu.dot_dimension_numbers<[1], [0], [0], [1], [0, 0, 1, 1], [], []>} : vector<4x108xf32>, vector<108x128xf32>, vector<4x128xf32> -> vector<4x128xf32>
    %46 = vector.broadcast %1 : vector<4x1xf32> to vector<4x128xf32>
    %47 = arith.addf %45, %46 : vector<4x128xf32>
    %48 = arith.maximumf %42, %47 : vector<4x128xf32>
    %cst_27 = arith.constant 0.000000e+00 : f32
    %49 = vector.broadcast %cst_27 : f32 to vector<4x128xf32>
    %50 = arith.maximumf %48, %49 : vector<4x128xf32>
    %c0_28 = arith.constant 0 : index
    %c0_29 = arith.constant 0 : index
    %51 = vector.load %arg4[%c0_28, %c0_29] : memref<4x128xf32, #tpu.memory_space<vmem>>, vector<4x128xf32>
    tpu.vector_store %arg4[%c0_28, %c0_29], %50 {strides = array<i32>} : memref<4x128xf32, #tpu.memory_space<vmem>>, vector<4x128xf32>,
    return
  }
  func.func @transform_0(%arg0: i32) -> (i32, i32, i32) {
    %c0_i32 = arith.constant 0 : i32
    %c0_i32_0 = arith.constant 0 : i32
    %c0_i32_1 = arith.constant 0 : i32
    %c0_i32_2 = arith.constant 0 : i32
    return %c0_i32, %c0_i32_0, %c0_i32_1 : i32, i32, i32
  }
  func.func @transform_1(%arg0: i32) -> (i32, i32) {
    %c0_i32 = arith.constant 0 : i32
    %c0_i32_0 = arith.constant 0 : i32
    %c0_i32_1 = arith.constant 0 : i32
    return %c0_i32, %c0_i32_0 : i32, i32
  }
  func.func @transform_2(%arg0: i32) -> (i32, i32) {
    %c0_i32 = arith.constant 0 : i32
    %c0_i32_0 = arith.constant 0 : i32
    %c0_i32_1 = arith.constant 0 : i32
    return %c0_i32, %c0_i32_0 : i32, i32
  }
  func.func @transform_3(%arg0: i32) -> (i32, i32) {
    %c0_i32 = arith.constant 0 : i32
    %c0_i32_0 = arith.constant 0 : i32
    %c0_i32_1 = arith.constant 0 : i32
    return %c0_i32, %c0_i32_0 : i32, i32
  }
}

module attributes {stable_mosaic.version = 11 : i64} {
  func.func @_conv4_fc_kernel(%arg0: i32, %arg1: memref<8x108x2xf32, #tpu.memory_space<vmem>>, %arg2: memref<4x108xf32, #tpu.memory_space<vmem>>, %arg3: memref<4x1xf32, #tpu.memory_space<vmem>>, %arg4: memref<128x4xf32, #tpu.memory_space<vmem>>, %arg5: memref<128x1xf32, #tpu.memory_space<vmem>>, %arg6: memref<128x128xf32, #tpu.memory_space<vmem>>, %arg7: memref<128x1xf32, #tpu.memory_space<vmem>>, %arg8: memref<1x128xf32, #tpu.memory_space<vmem>>, %arg9: memref<1x1xf32, #tpu.memory_space<vmem>>, %arg10: memref<1x2xf32, #tpu.memory_space<vmem>>) attributes {dimension_semantics = [#tpu.dimension_semantics<arbitrary>], iteration_bounds = array<i64: 1>, scalar_prefetch = 0 : i64, scratch_operands = 0 : i64, tpu.core_type = #tpu.core_type<tc>, window_params = [{pipeline_mode = #tpu.pipeline_mode<synchronous>, transform_indices = @transform_0, window_bounds = array<i64: 8, 108, 2>}, {pipeline_mode = #tpu.pipeline_mode<synchronous>, transform_indices = @transform_1, window_bounds = array<i64: 4, 108>}, {pipeline_mode = #tpu.pipeline_mode<synchronous>, transform_indices = @transform_2, window_bounds = array<i64: 4, 1>}, {pipeline_mode = #tpu.pipeline_mode<synchronous>, transform_indices = @transform_3, window_bounds = array<i64: 128, 4>}, {pipeline_mode = #tpu.pipeline_mode<synchronous>, transform_indices = @transform_4, window_bounds = array<i64: 128, 1>}, {pipeline_mode = #tpu.pipeline_mode<synchronous>, transform_indices = @transform_5, window_bounds = array<i64: 128, 128>}, {pipeline_mode = #tpu.pipeline_mode<synchronous>, transform_indices = @transform_6, window_bounds = array<i64: 128, 1>}, {pipeline_mode = #tpu.pipeline_mode<synchronous>, transform_indices = @transform_7, window_bounds = array<i64: 1, 128>}, {pipeline_mode = #tpu.pipeline_mode<synchronous>, transform_indices = @transform_8, window_bounds = array<i64: 1, 1>}, {pipeline_mode = #tpu.pipeline_mode<synchronous>, transform_indices = @transform_9, window_bounds = array<i64: 1, 2>}]} {
    %c0 = arith.constant 0 : index
    %c0_0 = arith.constant 0 : index
    %0 = vector.load %arg2[%c0, %c0_0] : memref<4x108xf32, #tpu.memory_space<vmem>>, vector<4x108xf32>
    %c0_1 = arith.constant 0 : index
    %c0_2 = arith.constant 0 : index
    %1 = vector.load %arg3[%c0_1, %c0_2] : memref<4x1xf32, #tpu.memory_space<vmem>>, vector<4x1xf32>
    %c0_3 = arith.constant 0 : index
    %c0_4 = arith.constant 0 : index
    %c0_5 = arith.constant 0 : index
    %2 = vector.load %arg1[%c0_3, %c0_4, %c0_5] : memref<8x108x2xf32, #tpu.memory_space<vmem>>, vector<1x108x2xf32>
    %3 = vector.shape_cast %2 : vector<1x108x2xf32> to vector<108x2xf32>
    %cst = arith.constant dense<0.000000e+00> : vector<4x2xf32>
    %4 = tpu.matmul %0, %3, %cst {dimension_numbers = #tpu.dot_dimension_numbers<[1], [0], [0], [1], [0, 0, 1, 1], [], []>} : vector<4x108xf32>, vector<108x2xf32>, vector<4x2xf32> -> vector<4x2xf32>
    %5 = vector.broadcast %1 : vector<4x1xf32> to vector<4x2xf32>
    %6 = arith.addf %4, %5 : vector<4x2xf32>
    %c1 = arith.constant 1 : index
    %c0_6 = arith.constant 0 : index
    %c0_7 = arith.constant 0 : index
    %7 = vector.load %arg1[%c1, %c0_6, %c0_7] : memref<8x108x2xf32, #tpu.memory_space<vmem>>, vector<1x108x2xf32>
    %8 = vector.shape_cast %7 : vector<1x108x2xf32> to vector<108x2xf32>
    %cst_8 = arith.constant dense<0.000000e+00> : vector<4x2xf32>
    %9 = tpu.matmul %0, %8, %cst_8 {dimension_numbers = #tpu.dot_dimension_numbers<[1], [0], [0], [1], [0, 0, 1, 1], [], []>} : vector<4x108xf32>, vector<108x2xf32>, vector<4x2xf32> -> vector<4x2xf32>
    %10 = vector.broadcast %1 : vector<4x1xf32> to vector<4x2xf32>
    %11 = arith.addf %9, %10 : vector<4x2xf32>
    %12 = arith.maximumf %6, %11 : vector<4x2xf32>
    %c2 = arith.constant 2 : index
    %c0_9 = arith.constant 0 : index
    %c0_10 = arith.constant 0 : index
    %13 = vector.load %arg1[%c2, %c0_9, %c0_10] : memref<8x108x2xf32, #tpu.memory_space<vmem>>, vector<1x108x2xf32>
    %14 = vector.shape_cast %13 : vector<1x108x2xf32> to vector<108x2xf32>
    %cst_11 = arith.constant dense<0.000000e+00> : vector<4x2xf32>
    %15 = tpu.matmul %0, %14, %cst_11 {dimension_numbers = #tpu.dot_dimension_numbers<[1], [0], [0], [1], [0, 0, 1, 1], [], []>} : vector<4x108xf32>, vector<108x2xf32>, vector<4x2xf32> -> vector<4x2xf32>
    %16 = vector.broadcast %1 : vector<4x1xf32> to vector<4x2xf32>
    %17 = arith.addf %15, %16 : vector<4x2xf32>
    %18 = arith.maximumf %12, %17 : vector<4x2xf32>
    %c3 = arith.constant 3 : index
    %c0_12 = arith.constant 0 : index
    %c0_13 = arith.constant 0 : index
    %19 = vector.load %arg1[%c3, %c0_12, %c0_13] : memref<8x108x2xf32, #tpu.memory_space<vmem>>, vector<1x108x2xf32>
    %20 = vector.shape_cast %19 : vector<1x108x2xf32> to vector<108x2xf32>
    %cst_14 = arith.constant dense<0.000000e+00> : vector<4x2xf32>
    %21 = tpu.matmul %0, %20, %cst_14 {dimension_numbers = #tpu.dot_dimension_numbers<[1], [0], [0], [1], [0, 0, 1, 1], [], []>} : vector<4x108xf32>, vector<108x2xf32>, vector<4x2xf32> -> vector<4x2xf32>
    %22 = vector.broadcast %1 : vector<4x1xf32> to vector<4x2xf32>
    %23 = arith.addf %21, %22 : vector<4x2xf32>
    %24 = arith.maximumf %18, %23 : vector<4x2xf32>
    %c4 = arith.constant 4 : index
    %c0_15 = arith.constant 0 : index
    %c0_16 = arith.constant 0 : index
    %25 = vector.load %arg1[%c4, %c0_15, %c0_16] : memref<8x108x2xf32, #tpu.memory_space<vmem>>, vector<1x108x2xf32>
    %26 = vector.shape_cast %25 : vector<1x108x2xf32> to vector<108x2xf32>
    %cst_17 = arith.constant dense<0.000000e+00> : vector<4x2xf32>
    %27 = tpu.matmul %0, %26, %cst_17 {dimension_numbers = #tpu.dot_dimension_numbers<[1], [0], [0], [1], [0, 0, 1, 1], [], []>} : vector<4x108xf32>, vector<108x2xf32>, vector<4x2xf32> -> vector<4x2xf32>
    %28 = vector.broadcast %1 : vector<4x1xf32> to vector<4x2xf32>
    %29 = arith.addf %27, %28 : vector<4x2xf32>
    %30 = arith.maximumf %24, %29 : vector<4x2xf32>
    %c5 = arith.constant 5 : index
    %c0_18 = arith.constant 0 : index
    %c0_19 = arith.constant 0 : index
    %31 = vector.load %arg1[%c5, %c0_18, %c0_19] : memref<8x108x2xf32, #tpu.memory_space<vmem>>, vector<1x108x2xf32>
    %32 = vector.shape_cast %31 : vector<1x108x2xf32> to vector<108x2xf32>
    %cst_20 = arith.constant dense<0.000000e+00> : vector<4x2xf32>
    %33 = tpu.matmul %0, %32, %cst_20 {dimension_numbers = #tpu.dot_dimension_numbers<[1], [0], [0], [1], [0, 0, 1, 1], [], []>} : vector<4x108xf32>, vector<108x2xf32>, vector<4x2xf32> -> vector<4x2xf32>
    %34 = vector.broadcast %1 : vector<4x1xf32> to vector<4x2xf32>
    %35 = arith.addf %33, %34 : vector<4x2xf32>
    %36 = arith.maximumf %30, %35 : vector<4x2xf32>
    %c6 = arith.constant 6 : index
    %c0_21 = arith.constant 0 : index
    %c0_22 = arith.constant 0 : index
    %37 = vector.load %arg1[%c6, %c0_21, %c0_22] : memref<8x108x2xf32, #tpu.memory_space<vmem>>, vector<1x108x2xf32>
    %38 = vector.shape_cast %37 : vector<1x108x2xf32> to vector<108x2xf32>
    %cst_23 = arith.constant dense<0.000000e+00> : vector<4x2xf32>
    %39 = tpu.matmul %0, %38, %cst_23 {dimension_numbers = #tpu.dot_dimension_numbers<[1], [0], [0], [1], [0, 0, 1, 1], [], []>} : vector<4x108xf32>, vector<108x2xf32>, vector<4x2xf32> -> vector<4x2xf32>
    %40 = vector.broadcast %1 : vector<4x1xf32> to vector<4x2xf32>
    %41 = arith.addf %39, %40 : vector<4x2xf32>
    %42 = arith.maximumf %36, %41 : vector<4x2xf32>
    %c7 = arith.constant 7 : index
    %c0_24 = arith.constant 0 : index
    %c0_25 = arith.constant 0 : index
    %43 = vector.load %arg1[%c7, %c0_24, %c0_25] : memref<8x108x2xf32, #tpu.memory_space<vmem>>, vector<1x108x2xf32>
    %44 = vector.shape_cast %43 : vector<1x108x2xf32> to vector<108x2xf32>
    %cst_26 = arith.constant dense<0.000000e+00> : vector<4x2xf32>
    %45 = tpu.matmul %0, %44, %cst_26 {dimension_numbers = #tpu.dot_dimension_numbers<[1], [0], [0], [1], [0, 0, 1, 1], [], []>} : vector<4x108xf32>, vector<108x2xf32>, vector<4x2xf32> -> vector<4x2xf32>
    %46 = vector.broadcast %1 : vector<4x1xf32> to vector<4x2xf32>
    %47 = arith.addf %45, %46 : vector<4x2xf32>
    %48 = arith.maximumf %42, %47 : vector<4x2xf32>
    %cst_27 = arith.constant 0.000000e+00 : f32
    %49 = vector.broadcast %cst_27 : f32 to vector<4x2xf32>
    %50 = arith.maximumf %48, %49 : vector<4x2xf32>
    %c0_28 = arith.constant 0 : index
    %c0_29 = arith.constant 0 : index
    %51 = vector.load %arg4[%c0_28, %c0_29] : memref<128x4xf32, #tpu.memory_space<vmem>>, vector<128x4xf32>
    %cst_30 = arith.constant dense<0.000000e+00> : vector<128x2xf32>
    %52 = tpu.matmul %51, %50, %cst_30 {dimension_numbers = #tpu.dot_dimension_numbers<[1], [0], [0], [1], [0, 0, 1, 1], [], []>} : vector<128x4xf32>, vector<4x2xf32>, vector<128x2xf32> -> vector<128x2xf32>
    %c0_31 = arith.constant 0 : index
    %c0_32 = arith.constant 0 : index
    %53 = vector.load %arg5[%c0_31, %c0_32] : memref<128x1xf32, #tpu.memory_space<vmem>>, vector<128x1xf32>
    %54 = vector.broadcast %53 : vector<128x1xf32> to vector<128x2xf32>
    %55 = arith.addf %52, %54 : vector<128x2xf32>
    %cst_33 = arith.constant 0.000000e+00 : f32
    %56 = vector.broadcast %cst_33 : f32 to vector<128x2xf32>
    %57 = arith.maximumf %55, %56 : vector<128x2xf32>
    %c0_34 = arith.constant 0 : index
    %c0_35 = arith.constant 0 : index
    %58 = vector.load %arg6[%c0_34, %c0_35] : memref<128x128xf32, #tpu.memory_space<vmem>>, vector<128x128xf32>
    %cst_36 = arith.constant dense<0.000000e+00> : vector<128x2xf32>
    %59 = tpu.matmul %58, %57, %cst_36 {dimension_numbers = #tpu.dot_dimension_numbers<[1], [0], [0], [1], [0, 0, 1, 1], [], []>} : vector<128x128xf32>, vector<128x2xf32>, vector<128x2xf32> -> vector<128x2xf32>
    %c0_37 = arith.constant 0 : index
    %c0_38 = arith.constant 0 : index
    %60 = vector.load %arg7[%c0_37, %c0_38] : memref<128x1xf32, #tpu.memory_space<vmem>>, vector<128x1xf32>
    %61 = vector.broadcast %60 : vector<128x1xf32> to vector<128x2xf32>
    %62 = arith.addf %59, %61 : vector<128x2xf32>
    %cst_39 = arith.constant 0.000000e+00 : f32
    %63 = vector.broadcast %cst_39 : f32 to vector<128x2xf32>
    %64 = arith.maximumf %62, %63 : vector<128x2xf32>
    %c0_40 = arith.constant 0 : index
    %c0_41 = arith.constant 0 : index
    %65 = vector.load %arg8[%c0_40, %c0_41] : memref<1x128xf32, #tpu.memory_space<vmem>>, vector<1x128xf32>
    %cst_42 = arith.constant dense<0.000000e+00> : vector<1x2xf32>
    %66 = tpu.matmul %65, %64, %cst_42 {dimension_numbers = #tpu.dot_dimension_numbers<[1], [0], [0], [1], [0, 0, 1, 1], [], []>} : vector<1x128xf32>, vector<128x2xf32>, vector<1x2xf32> -> vector<1x2xf32>
    %c0_43 = arith.constant 0 : index
    %c0_44 = arith.constant 0 : index
    %67 = vector.load %arg9[%c0_43, %c0_44] : memref<1x1xf32, #tpu.memory_space<vmem>>, vector<1x1xf32>
    %68 = vector.broadcast %67 : vector<1x1xf32> to vector<1x2xf32>
    %69 = arith.addf %66, %68 : vector<1x2xf32>
    %70 = arith.negf %69 : vector<1x2xf32>
    %71 = math.exp %70 : vector<1x2xf32>
    %cst_45 = arith.constant 1.000000e+00 : f32
    %72 = vector.broadcast %cst_45 : f32 to vector<1x2xf32>
    %73 = arith.addf %72, %71 : vector<1x2xf32>
    %74 = arith.divf %72, %73 : vector<1x2xf32>
    %c0_46 = arith.constant 0 : index
    %c0_47 = arith.constant 0 : index
    %75 = vector.load %arg10[%c0_46, %c0_47] : memref<1x2xf32, #tpu.memory_space<vmem>>, vector<1x2xf32>
    tpu.vector_store %arg10[%c0_46, %c0_47], %74 {strides = array<i32>} : memref<1x2xf32, #tpu.memory_space<vmem>>, vector<1x2xf32>,
    return
  }
  func.func @transform_0(%arg0: i32) -> (i32, i32, i32) {
    %c0_i32 = arith.constant 0 : i32
    %c0_i32_0 = arith.constant 0 : i32
    %c0_i32_1 = arith.constant 0 : i32
    %c0_i32_2 = arith.constant 0 : i32
    return %c0_i32, %c0_i32_0, %c0_i32_1 : i32, i32, i32
  }
  func.func @transform_1(%arg0: i32) -> (i32, i32) {
    %c0_i32 = arith.constant 0 : i32
    %c0_i32_0 = arith.constant 0 : i32
    %c0_i32_1 = arith.constant 0 : i32
    return %c0_i32, %c0_i32_0 : i32, i32
  }
  func.func @transform_2(%arg0: i32) -> (i32, i32) {
    %c0_i32 = arith.constant 0 : i32
    %c0_i32_0 = arith.constant 0 : i32
    %c0_i32_1 = arith.constant 0 : i32
    return %c0_i32, %c0_i32_0 : i32, i32
  }
  func.func @transform_3(%arg0: i32) -> (i32, i32) {
    %c0_i32 = arith.constant 0 : i32
    %c0_i32_0 = arith.constant 0 : i32
    %c0_i32_1 = arith.constant 0 : i32
    return %c0_i32, %c0_i32_0 : i32, i32
  }
  func.func @transform_4(%arg0: i32) -> (i32, i32) {
    %c0_i32 = arith.constant 0 : i32
    %c0_i32_0 = arith.constant 0 : i32
    %c0_i32_1 = arith.constant 0 : i32
    return %c0_i32, %c0_i32_0 : i32, i32
  }
  func.func @transform_5(%arg0: i32) -> (i32, i32) {
    %c0_i32 = arith.constant 0 : i32
    %c0_i32_0 = arith.constant 0 : i32
    %c0_i32_1 = arith.constant 0 : i32
    return %c0_i32, %c0_i32_0 : i32, i32
  }
  func.func @transform_6(%arg0: i32) -> (i32, i32) {
    %c0_i32 = arith.constant 0 : i32
    %c0_i32_0 = arith.constant 0 : i32
    %c0_i32_1 = arith.constant 0 : i32
    return %c0_i32, %c0_i32_0 : i32, i32
  }
  func.func @transform_7(%arg0: i32) -> (i32, i32) {
    %c0_i32 = arith.constant 0 : i32
    %c0_i32_0 = arith.constant 0 : i32
    %c0_i32_1 = arith.constant 0 : i32
    return %c0_i32, %c0_i32_0 : i32, i32
  }
  func.func @transform_8(%arg0: i32) -> (i32, i32) {
    %c0_i32 = arith.constant 0 : i32
    %c0_i32_0 = arith.constant 0 : i32
    %c0_i32_1 = arith.constant 0 : i32
    return %c0_i32, %c0_i32_0 : i32, i32
  }
  func.func @transform_9(%arg0: i32) -> (i32, i32) {
    %c0_i32 = arith.constant 0 : i32
    %c0_i32_0 = arith.constant 0 : i32
    %c0_i32_1 = arith.constant 0 : i32
    return %c0_i32, %c0_i32_0 : i32, i32
  }
}

</mosaic_0001>

<bundles_post_ra>
// kernel: forward.3
= control target key start
LH: loop header
LB: loop body
LE: loop exit
PB: predicated region body
PF: predicated region fallthrough
CT: control target
= control target key end

     0   :  { %v10327_v3 = vmov 0.0   ;;  %vm45_vm0 = vcmask 64512   ;;  %v10328_v19 = vmov 0   ;;  %vm642_vm1 = vcmask 1043456   ;;  %s12104_s0 = inlined_call_operand.vmem [shape: f32[8,8,2000], index: 0, kind: input, shape index: {}]   ;;  %s12105_s1 = inlined_call_operand.vmem [shape: f32[4,8], index: 1, kind: input, shape index: {}]   ;;  %s12106_s2 = inlined_call_operand.vmem [shape: f32[4,1], index: 2, kind: input, shape index: {}]   ;;  %s12107_s4 = inlined_call_operand.vmem [shape: f32[4,1], index: 4, kind: input, shape index: {}]   ;;  %s12108_s3 = inlined_call_operand.vmem [shape: f32[4,4], index: 3, kind: input, shape index: {}]   ;;  %s12109_s5 = inlined_call_operand.vmem [shape: f32[4,2000], index: 5, kind: output, shape index: {}]  }
   0x1   :  { %v25_v0 = vld [vmem:[%s12104_s0 + $0x8] sm:$0xff]  ;;  %v27_v1 = vld [vmem:[%s12104_s0 + $0x18] sm:$0xff]  ;;  %v24_v2 = vld [vmem:[%s12104_s0] sm:$0xff]  ;;  %113 = vmatprep.mubr.f32.mxu0 %v10327_v3  ;;  %184 = vmatprep.mubr.f32.mxu1 %v10327_v3  ;;  %vm638_vm2 = vcmask 31744   ;;  %vm9945_vm3 = vcmask 654340  }
   0x2   :  { %49 = vmatprep.subr.mxu0 %v25_v0  ;;  %120 = vmatprep.subr.mxu1 %v27_v1  ;;  %v26_v4 = vld [vmem:[%s12104_s0 + $0x10] sm:$0xff]  ;;  %v10376_v5 = vld [vmem:[%s12105_s1] sm:$0xf]  ;;  %v29_v6 = vld [vmem:[%s12104_s0 + $0x28] sm:$0xff] }
   0x3   :  { %50 = vmatpush1.msra.mxu0 %v24_v2  ;;  %121 = vmatpush1.msra.mxu1 %v26_v4  ;;  %v31_v7 = vld [vmem:[%s12104_s0 + $0x38] sm:$0xff]  ;;  %v28_v8 = vld [vmem:[%s12104_s0 + $0x20] sm:$0xff]  ;;  %v30_v9 = vld [vmem:[%s12104_s0 + $0x30] sm:$0xff] }
   0x4   :  { %9952 = vmatmul.mubr.msk.f32.vlgmr.msra.gmra.mrb[0].mxu0 %vm45_vm0, %v10376_v5  ;;  %9953 = vmatmul.mubr.msk.f32.vlgmr.msra.gmra.mrb[0].mxu1 %vm45_vm0, %v10376_v5  ;;  %v33_v10 = vld [vmem:[%s12104_s0 + $0x48] sm:$0xff]  ;;  %v35_v11 = vld [vmem:[%s12104_s0 + $0x58] sm:$0xff]  ;;  %v32_v12 = vld [vmem:[%s12104_s0 + $0x40] sm:$0xff] }
   0x5   :  { %191 = vmatprep.subr.mxu0 %v29_v6  ;;  %262 = vmatprep.subr.mxu1 %v31_v7  ;;  %v34_v13 = vld [vmem:[%s12104_s0 + $0x50] sm:$0xff]  ;;  %v37_v14 = vld [vmem:[%s12104_s0 + $0x68] sm:$0xff]  ;;  %v39_v15 = vld [vmem:[%s12104_s0 + $0x78] sm:$0xff] }
   0x6   :  { %192 = vmatpush1.msra.mxu0 %v28_v8  ;;  %255 = vmatprep.mubr.f32.mxu0 %v10327_v3  ;;  %v36_v16 = vld [vmem:[%s12104_s0 + $0x60] sm:$0xff]  ;;  %v38_v17 = vld [vmem:[%s12104_s0 + $0x70] sm:$0xff]  ;;  %vm9946_vm4 = vmor %vm9945_vm3, %vm642_vm1 }
   0x7   :  { %263 = vmatpush1.msra.mxu1 %v30_v9  ;;  %326 = vmatprep.mubr.f32.mxu1 %v10327_v3  ;;  %v21_v18 = vld [vmem:[%s12106_s2] sm:$0xf]  ;;  %v9985_v9 = vld [vmem:[%s12104_s0 + $0x88] sm:$0xff] }
   0x8   :  { %9954 = vmatmul.mubr.msk.f32.vlgmr.msra.gmra.mrb[2].mxu0 %vm45_vm0, %v10376_v5  ;;  %9955 = vmatmul.mubr.msk.f32.vlgmr.msra.gmra.mrb[2].mxu1 %vm45_vm0, %v10376_v5  ;;  %v23_v20 = vld [vmem:[%s12107_s4] sm:$0xf] }
   0x9   :  { %333 = vmatprep.subr.mxu0 %v33_v10  ;;  %404 = vmatprep.subr.mxu1 %v35_v11  ;;  %v10455_v40 = vld [vmem:[%s12108_s3] sm:$0xf]  ;;  %v9987_v10 = vld [vmem:[%s12104_s0 + $0x98] sm:$0xff] }
   0xa   :  { %334 = vmatpush1.msra.mxu0 %v32_v12  ;;  %397 = vmatprep.mubr.f32.mxu0 %v10327_v3  ;;  %v9984_v11 = vld [vmem:[%s12104_s0 + $0x80] sm:$0xff]  ;;  %v9986_v12 = vld [vmem:[%s12104_s0 + $0x90] sm:$0xff] }
   0xb   :  { %405 = vmatpush1.msra.mxu1 %v34_v13  ;;  %468 = vmatprep.mubr.f32.mxu1 %v10327_v3  ;;  %v9989_v13 = vld [vmem:[%s12104_s0 + $0xa8] sm:$0xff] }
   0xc   :  { %9956 = vmatmul.mubr.msk.f32.vlgmr.msra.gmra.mrb[4].mxu0 %vm45_vm0, %v10376_v5  ;;  %9957 = vmatmul.mubr.msk.f32.vlgmr.msra.gmra.mrb[4].mxu1 %vm45_vm0, %v10376_v5 }
   0xd   :  { %475 = vmatprep.subr.mxu0 %v37_v14  ;;  %546 = vmatprep.subr.mxu1 %v39_v15  ;;  %v9991_v14 = vld [vmem:[%s12104_s0 + $0xb8] sm:$0xff]  ;;  %v9988_v15 = vld [vmem:[%s12104_s0 + $0xa0] sm:$0xff] }
   0xe   :  { %476 = vmatpush1.msra.mxu0 %v36_v16  ;;  %539 = vmatprep.mubr.f32.mxu0 %v10327_v3  ;;  %v9990_v16 = vld [vmem:[%s12104_s0 + $0xb0] sm:$0xff] }
   0xf   :  { %547 = vmatpush1.msra.mxu1 %v38_v17  ;;  %610 = vmatprep.mubr.f32.mxu1 %v10327_v3  ;;  %v9993_v17 = vld [vmem:[%s12104_s0 + $0xc8] sm:$0xff] }
  0x10   :  { %9958 = vmatmul.mubr.msk.f32.vlgmr.msra.gmra.mrb[6].mxu0 %vm45_vm0, %v10376_v5  ;;  %9959 = vmatmul.mubr.msk.f32.vlgmr.msra.gmra.mrb[6].mxu1 %vm45_vm0, %v10376_v5 }
  0x11   :  { %10322 = vset.pattern.permute.xlu0 %v10328_v19  ;;  %755 = vmatprep.mubr.f32.mxu0 %v10327_v3  ;;  %v9992_v19 = vld [vmem:[%s12104_s0 + $0xc0] sm:$0xff] }
  0x12   :  { %42 = vperm.xlu0 %10322, %v21_v18   ;;  %826 = vmatprep.mubr.f32.mxu1 %v10327_v3  ;;  %v9995_v18 = vld [vmem:[%s12104_s0 + $0xd8] sm:$0xff] }
  0x16   :  { %635 = vperm.xlu0 %10322, %v23_v20   ;;  %v9994_v20 = vld [vmem:[%s12104_s0 + $0xd0] sm:$0xff] }
  0x91   :  { %v10444_v21 = vpop.permute.xlu0 %42 }
  0xd7   :  { %v115_v22 = vpop.f32.mrb[0].mxu0  ;;  %v186_v23 = vpop.f32.mrb[0].mxu1 }
  0xd8   :  { %v116_v24 = vadd.f32 %v115_v22, %v10444_v21  ;;  %v187_v25 = vadd.f32 %v186_v23, %v10444_v21  ;;  %v117_v26 = vpop.f32.mrb[1].mxu0  ;;  %v188_v27 = vpop.f32.mrb[1].mxu1  ;;  %v9997_v22 = vld [vmem:[%s12104_s0 + $0xe8] sm:$0xff]  ;;  %v9999_v23 = vld [vmem:[%s12104_s0 + $0xf8] sm:$0xff] }
  0xd9   :  { %v118_v28 = vadd.f32 %v117_v26, %v10444_v21  ;;  %v189_v29 = vadd.f32 %v188_v27, %v10444_v21 }
  0xda   :  { %v617_v34 = vmax.f32 %v116_v24, 0.0  ;;  %v619_v35 = vmax.f32 %v187_v25, 0.0  ;;  %v9996_v24 = vld [vmem:[%s12104_s0 + $0xe0] sm:$0xff]  ;;  %v9998_v25 = vld [vmem:[%s12104_s0 + $0xf0] sm:$0xff] }
  0xdb   :  { %v618_v30 = vmax.f32 %v118_v28, 0.0  ;;  %v620_v31 = vmax.f32 %v189_v29, 0.0  ;;  %v257_v32 = vpop.f32.mrb[2].mxu0  ;;  %v328_v33 = vpop.f32.mrb[2].mxu1 }
  0xdc   :  { %v258_v36 = vadd.f32 %v257_v32, %v10444_v21  ;;  %v329_v37 = vadd.f32 %v328_v33, %v10444_v21  ;;  %v259_v38 = vpop.f32.mrb[3].mxu0  ;;  %v330_v39 = vpop.f32.mrb[3].mxu1 }
  0xdd   :  { %v260_v41 = vadd.f32 %v259_v38, %v10444_v21  ;;  %v331_v42 = vadd.f32 %v330_v39, %v10444_v21  ;;  %9960 = vmatprep.subr.msk.mxu0 %vm642_vm1, %v618_v30  ;;  %9963 = vmatprep.subr.msk.mxu1 %vm642_vm1, %v620_v31 }
  0xde   :  { %9961 = vmatpush1.msk.msra.mxu0 %vm642_vm1, %v617_v34  ;;  %9964 = vmatpush1.msk.msra.mxu1 %vm642_vm1, %v619_v35  ;;  %v621_v47 = vmax.f32 %v258_v36, 0.0  ;;  %v623_v48 = vmax.f32 %v329_v37, 0.0 }
  0xdf   :  { %v622_v43 = vmax.f32 %v260_v41, 0.0  ;;  %v624_v44 = vmax.f32 %v331_v42, 0.0  ;;  %v399_v45 = vpop.f32.mrb[4].mxu0  ;;  %v470_v46 = vpop.f32.mrb[4].mxu1  ;;  %9962 = vmatmul.mubr.msk.f32.vlgmr.msra.gmra.mrb[8].mxu0 %vm638_vm2, %v10455_v40  ;;  %9965 = vmatmul.mubr.msk.f32.vlgmr.msra.gmra.mrb[8].mxu1 %vm638_vm2, %v10455_v40 }
  0xe0   :  { %v400_v49 = vadd.f32 %v399_v45, %v10444_v21  ;;  %v471_v50 = vadd.f32 %v470_v46, %v10444_v21  ;;  %v401_v51 = vpop.f32.mrb[5].mxu0  ;;  %v472_v52 = vpop.f32.mrb[5].mxu1  ;;  %897 = vmatprep.mubr.f32.mxu0 %v10327_v3  ;;  %968 = vmatprep.mubr.f32.mxu1 %v10327_v3 }
  0xe1   :  { %v402_v53 = vadd.f32 %v401_v51, %v10444_v21  ;;  %v473_v54 = vadd.f32 %v472_v52, %v10444_v21  ;;  %9966 = vmatprep.subr.msk.mxu0 %vm642_vm1, %v622_v43  ;;  %9969 = vmatprep.subr.msk.mxu1 %vm642_vm1, %v624_v44 }
  0xe2   :  { %9967 = vmatpush1.msk.msra.mxu0 %vm642_vm1, %v621_v47  ;;  %9970 = vmatpush1.msk.msra.mxu1 %vm642_vm1, %v623_v48  ;;  %v625_v59 = vmax.f32 %v400_v49, 0.0  ;;  %v627_v60 = vmax.f32 %v471_v50, 0.0 }
  0xe3   :  { %v626_v55 = vmax.f32 %v402_v53, 0.0  ;;  %v628_v56 = vmax.f32 %v473_v54, 0.0  ;;  %v541_v57 = vpop.f32.mrb[6].mxu0  ;;  %v612_v58 = vpop.f32.mrb[6].mxu1  ;;  %9968 = vmatmul.mubr.msk.f32.vlgmr.msra.gmra.mrb[10].mxu0 %vm638_vm2, %v10455_v40  ;;  %9971 = vmatmul.mubr.msk.f32.vlgmr.msra.gmra.mrb[10].mxu1 %vm638_vm2, %v10455_v40 }
  0xe4   :  { %v542_v61 = vadd.f32 %v541_v57, %v10444_v21  ;;  %v613_v62 = vadd.f32 %v612_v58, %v10444_v21  ;;  %v543_v63 = vpop.f32.mrb[7].mxu0  ;;  %v614_v0 = vpop.f32.mrb[7].mxu1  ;;  %1039 = vmatprep.mubr.f32.mxu0 %v10327_v3  ;;  %1110 = vmatprep.mubr.f32.mxu1 %v10327_v3 }
  0xe5   :  { %v544_v1 = vadd.f32 %v543_v63, %v10444_v21  ;;  %v615_v2 = vadd.f32 %v614_v0, %v10444_v21  ;;  %9972 = vmatprep.subr.msk.mxu0 %vm642_vm1, %v626_v55  ;;  %9975 = vmatprep.subr.msk.mxu1 %vm642_vm1, %v628_v56 }
  0xe6   :  { %9973 = vmatpush1.msk.msra.mxu0 %vm642_vm1, %v625_v59  ;;  %9976 = vmatpush1.msk.msra.mxu1 %vm642_vm1, %v627_v60  ;;  %v629_v7 = vmax.f32 %v542_v61, 0.0  ;;  %v631_v8 = vmax.f32 %v613_v62, 0.0 }
  0xe7   :  { %v630_v4 = vmax.f32 %v544_v1, 0.0  ;;  %v632_v6 = vmax.f32 %v615_v2, 0.0  ;;  %9974 = vmatmul.mubr.msk.f32.vlgmr.msra.gmra.mrb[12].mxu0 %vm638_vm2, %v10455_v40  ;;  %9977 = vmatmul.mubr.msk.f32.vlgmr.msra.gmra.mrb[12].mxu1 %vm638_vm2, %v10455_v40 }
  0xe8   :  { %1181 = vmatprep.mubr.f32.mxu0 %v10327_v3  ;;  %1252 = vmatprep.mubr.f32.mxu1 %v10327_v3 }
  0xe9   :  { %9978 = vmatprep.subr.msk.mxu0 %vm642_vm1, %v630_v4  ;;  %9981 = vmatprep.subr.msk.mxu1 %vm642_vm1, %v632_v6 }
  0xea   :  { %9979 = vmatpush1.msk.msra.mxu0 %vm642_vm1, %v629_v7  ;;  %9982 = vmatpush1.msk.msra.mxu1 %vm642_vm1, %v631_v8 }
  0xeb   :  { %9980 = vmatmul.mubr.msk.f32.vlgmr.msra.gmra.mrb[14].mxu0 %vm638_vm2, %v10455_v40  ;;  %9983 = vmatmul.mubr.msk.f32.vlgmr.msra.gmra.mrb[14].mxu1 %vm638_vm2, %v10455_v40 }
  0xec   :  { %1276 = vmatprep.subr.mxu0 %v9985_v9  ;;  %1347 = vmatprep.subr.mxu1 %v9987_v10 }
  0xed   :  { %1277 = vmatpush1.msra.mxu0 %v9984_v11  ;;  %1340 = vmatprep.mubr.f32.mxu0 %v10327_v3 }
  0xee   :  { %1348 = vmatpush1.msra.mxu1 %v9986_v12  ;;  %1411 = vmatprep.mubr.f32.mxu1 %v10327_v3 }
  0xef   :  { %10000 = vmatmul.mubr.msk.f32.vlgmr.msra.gmra.mrb[16].mxu0 %vm45_vm0, %v10376_v5  ;;  %10001 = vmatmul.mubr.msk.f32.vlgmr.msra.gmra.mrb[16].mxu1 %vm45_vm0, %v10376_v5 }
  0xf0   :  { %1418 = vmatprep.subr.mxu0 %v9989_v13  ;;  %1489 = vmatprep.subr.mxu1 %v9991_v14 }
  0xf1   :  { %1419 = vmatpush1.msra.mxu0 %v9988_v15  ;;  %1482 = vmatprep.mubr.f32.mxu0 %v10327_v3 }
  0xf2   :  { %1490 = vmatpush1.msra.mxu1 %v9990_v16  ;;  %1553 = vmatprep.mubr.f32.mxu1 %v10327_v3 }
  0xf3   :  { %10002 = vmatmul.mubr.msk.f32.vlgmr.msra.gmra.mrb[18].mxu0 %vm45_vm0, %v10376_v5  ;;  %10003 = vmatmul.mubr.msk.f32.vlgmr.msra.gmra.mrb[18].mxu1 %vm45_vm0, %v10376_v5 }
  0xf4   :  { %1560 = vmatprep.subr.mxu0 %v9993_v17  ;;  %1631 = vmatprep.subr.mxu1 %v9995_v18 }
  0xf5   :  { %1561 = vmatpush1.msra.mxu0 %v9992_v19  ;;  %1624 = vmatprep.mubr.f32.mxu0 %v10327_v3 }
  0xf6   :  { %1632 = vmatpush1.msra.mxu1 %v9994_v20  ;;  %1695 = vmatprep.mubr.f32.mxu1 %v10327_v3 }
  0xf7   :  { %10004 = vmatmul.mubr.msk.f32.vlgmr.msra.gmra.mrb[20].mxu0 %vm45_vm0, %v10376_v5  ;;  %10005 = vmatmul.mubr.msk.f32.vlgmr.msra.gmra.mrb[20].mxu1 %vm45_vm0, %v10376_v5 }
  0xf8   :  { %1702 = vmatprep.subr.mxu0 %v9997_v22  ;;  %1773 = vmatprep.subr.mxu1 %v9999_v23 }
  0xf9   :  { %1703 = vmatpush1.msra.mxu0 %v9996_v24  ;;  %1766 = vmatprep.mubr.f32.mxu0 %v10327_v3 }
  0xfa   :  { %1774 = vmatpush1.msra.mxu1 %v9998_v25  ;;  %1837 = vmatprep.mubr.f32.mxu1 %v10327_v3 }
  0xfb   :  { %10006 = vmatmul.mubr.msk.f32.vlgmr.msra.gmra.mrb[22].mxu0 %vm45_vm0, %v10376_v5  ;;  %10007 = vmatmul.mubr.msk.f32.vlgmr.msra.gmra.mrb[22].mxu1 %vm45_vm0, %v10376_v5 }
  0xfc   :  { %1972 = vmatprep.mubr.f32.mxu0 %v10327_v3  ;;  %2043 = vmatprep.mubr.f32.mxu1 %v10327_v3 }
 0x1b2   :  { %v10579_v26 = vpop.f32.mrb[8].mxu0  ;;  %v10581_v27 = vpop.f32.mrb[8].mxu1 }
 0x1b3   :  { %v10583_v28 = vpop.f32.mrb[9].mxu0  ;;  %v10585_v29 = vpop.f32.mrb[9].mxu1 }
 0x1b6   :  { %v10587_v30 = vpop.f32.mrb[10].mxu0  ;;  %v10589_v31 = vpop.f32.mrb[10].mxu1 }
 0x1b7   :  { %v10591_v32 = vpop.f32.mrb[11].mxu0  ;;  %v10593_v33 = vpop.f32.mrb[11].mxu1 }
 0x1ba   :  { %v10595_v34 = vpop.f32.mrb[12].mxu0  ;;  %v10597_v35 = vpop.f32.mrb[12].mxu1 }
 0x1bb   :  { %v10599_v36 = vpop.f32.mrb[13].mxu0  ;;  %v10601_v37 = vpop.f32.mrb[13].mxu1 }
 0x1be   :  { %v10603_v38 = vpop.f32.mrb[14].mxu0  ;;  %v10605_v39 = vpop.f32.mrb[14].mxu1 }
 0x1bf   :  { %v10607_v41 = vpop.f32.mrb[15].mxu0  ;;  %v10609_v42 = vpop.f32.mrb[15].mxu1 }
 0x1c2   :  { %v1342_v43 = vpop.f32.mrb[16].mxu0  ;;  %v1413_v44 = vpop.f32.mrb[16].mxu1 }
 0x1c3   :  { %v1343_v45 = vadd.f32 %v1342_v43, %v10444_v21  ;;  %v1414_v46 = vadd.f32 %v1413_v44, %v10444_v21  ;;  %v1344_v47 = vpop.f32.mrb[17].mxu0  ;;  %v1415_v48 = vpop.f32.mrb[17].mxu1 }
 0x1c4   :  { %v1345_v49 = vadd.f32 %v1344_v47, %v10444_v21  ;;  %v1416_v50 = vadd.f32 %v1415_v48, %v10444_v21  ;;  %v10033_v47 = vld [vmem:[%s12104_s0 + $0x108] sm:$0xff]  ;;  %v10035_v48 = vld [vmem:[%s12104_s0 + $0x118] sm:$0xff] }
 0x1c5   :  { %v1844_v55 = vmax.f32 %v1343_v45, 0.0  ;;  %v1846_v56 = vmax.f32 %v1414_v46, 0.0 }
 0x1c6   :  { %v1845_v51 = vmax.f32 %v1345_v49, 0.0  ;;  %v1847_v52 = vmax.f32 %v1416_v50, 0.0  ;;  %v1484_v53 = vpop.f32.mrb[18].mxu0  ;;  %v1555_v54 = vpop.f32.mrb[18].mxu1  ;;  %v10032_v49 = vld [vmem:[%s12104_s0 + $0x100] sm:$0xff]  ;;  %v10034_v50 = vld [vmem:[%s12104_s0 + $0x110] sm:$0xff] }
 0x1c7   :  { %v1485_v57 = vadd.f32 %v1484_v53, %v10444_v21  ;;  %v1556_v58 = vadd.f32 %v1555_v54, %v10444_v21  ;;  %v1486_v59 = vpop.f32.mrb[19].mxu0  ;;  %v1557_v60 = vpop.f32.mrb[19].mxu1  ;;  %v10036_v53 = vld [vmem:[%s12104_s0 + $0x120] sm:$0xff]  ;;  %v10038_v54 = vld [vmem:[%s12104_s0 + $0x130] sm:$0xff] }
 0x1c8   :  { %v1487_v61 = vadd.f32 %v1486_v59, %v10444_v21  ;;  %v1558_v62 = vadd.f32 %v1557_v60, %v10444_v21  ;;  %10008 = vmatprep.subr.msk.mxu0 %vm642_vm1, %v1845_v51  ;;  %10011 = vmatprep.subr.msk.mxu1 %vm642_vm1, %v1847_v52  ;;  %v10037_v51 = vld [vmem:[%s12104_s0 + $0x128] sm:$0xff]  ;;  %v10039_v52 = vld [vmem:[%s12104_s0 + $0x138] sm:$0xff] }
 0x1c9   :  { %10009 = vmatpush1.msk.msra.mxu0 %vm642_vm1, %v1844_v55  ;;  %10012 = vmatpush1.msk.msra.mxu1 %vm642_vm1, %v1846_v56  ;;  %v1848_v4 = vmax.f32 %v1485_v57, 0.0  ;;  %v1850_v6 = vmax.f32 %v1556_v58, 0.0  ;;  %v10041_v55 = vld [vmem:[%s12104_s0 + $0x148] sm:$0xff]  ;;  %v10043_v56 = vld [vmem:[%s12104_s0 + $0x158] sm:$0xff]  ;;  %v10040_v57 = vld [vmem:[%s12104_s0 + $0x140] sm:$0xff] }
 0x1ca   :  { %v1849_v63 = vmax.f32 %v1487_v61, 0.0  ;;  %v1851_v0 = vmax.f32 %v1558_v62, 0.0  ;;  %v1626_v1 = vpop.f32.mrb[20].mxu0  ;;  %v1697_v2 = vpop.f32.mrb[20].mxu1  ;;  %10010 = vmatmul.mubr.msk.f32.vlgmr.msra.gmra.mrb[24].mxu0 %vm638_vm2, %v10455_v40  ;;  %10013 = vmatmul.mubr.msk.f32.vlgmr.msra.gmra.mrb[24].mxu1 %vm638_vm2, %v10455_v40  ;;  %v10042_v58 = vld [vmem:[%s12104_s0 + $0x150] sm:$0xff]  ;;  %v10045_v59 = vld [vmem:[%s12104_s0 + $0x168] sm:$0xff] }
 0x1cb   :  { %v1627_v7 = vadd.f32 %v1626_v1, %v10444_v21  ;;  %v1698_v8 = vadd.f32 %v1697_v2, %v10444_v21  ;;  %v1628_v9 = vpop.f32.mrb[21].mxu0  ;;  %v1699_v10 = vpop.f32.mrb[21].mxu1  ;;  %2114 = vmatprep.mubr.f32.mxu0 %v10327_v3  ;;  %2185 = vmatprep.mubr.f32.mxu1 %v10327_v3  ;;  %v10047_v60 = vld [vmem:[%s12104_s0 + $0x178] sm:$0xff]  ;;  %v10044_v61 = vld [vmem:[%s12104_s0 + $0x160] sm:$0xff]  ;;  %v10046_v62 = vld [vmem:[%s12104_s0 + $0x170] sm:$0xff] }
 0x1cc   :  { %v1629_v11 = vadd.f32 %v1628_v9, %v10444_v21  ;;  %v1700_v12 = vadd.f32 %v1699_v10, %v10444_v21  ;;  %10014 = vmatprep.subr.msk.mxu0 %vm642_vm1, %v1849_v63  ;;  %10017 = vmatprep.subr.msk.mxu1 %vm642_vm1, %v1851_v0  ;;  %v10739_v63 = vpop.permute.xlu0 %635 }
 0x1cd   :  { %10015 = vmatpush1.msk.msra.mxu0 %vm642_vm1, %v1848_v4  ;;  %10018 = vmatpush1.msk.msra.mxu1 %vm642_vm1, %v1850_v6  ;;  %v1852_v17 = vmax.f32 %v1627_v7, 0.0  ;;  %v1854_v18 = vmax.f32 %v1698_v8, 0.0  ;;  %v10743_v2 = vadd.f32 %v10579_v26, %v10739_v63  ;;  %v10747_v4 = vadd.f32 %v10581_v27, %v10739_v63 }
 0x1ce   :  { %v1853_v13 = vmax.f32 %v1629_v11, 0.0  ;;  %v1855_v14 = vmax.f32 %v1700_v12, 0.0  ;;  %v1768_v15 = vpop.f32.mrb[22].mxu0  ;;  %v1839_v16 = vpop.f32.mrb[22].mxu1  ;;  %10016 = vmatmul.mubr.msk.f32.vlgmr.msra.gmra.mrb[26].mxu0 %vm638_vm2, %v10455_v40  ;;  %10019 = vmatmul.mubr.msk.f32.vlgmr.msra.gmra.mrb[26].mxu1 %vm638_vm2, %v10455_v40  ;;  %v10757_v10 = vadd.f32 %v10583_v28, %v10739_v63  ;;  %v10761_v26 = vadd.f32 %v10585_v29, %v10739_v63 }
 0x1cf   :  { %v1769_v19 = vadd.f32 %v1768_v15, %v10444_v21  ;;  %v1840_v20 = vadd.f32 %v1839_v16, %v10444_v21  ;;  %v1770_v22 = vpop.f32.mrb[23].mxu0  ;;  %v1841_v23 = vpop.f32.mrb[23].mxu1  ;;  %2256 = vmatprep.mubr.f32.mxu0 %v10327_v3  ;;  %2327 = vmatprep.mubr.f32.mxu1 %v10327_v3  ;;  %v10779_v16 = vadd.f32 %v10587_v30, %v10739_v63 }
 0x1d0   :  { %v1771_v24 = vadd.f32 %v1770_v22, %v10444_v21  ;;  %v1842_v25 = vadd.f32 %v1841_v23, %v10444_v21  ;;  %10020 = vmatprep.subr.msk.mxu0 %vm642_vm1, %v1853_v13  ;;  %10023 = vmatprep.subr.msk.mxu1 %vm642_vm1, %v1855_v14  ;;  %v10793_v23 = vadd.f32 %v10591_v32, %v10739_v63 }
 0x1d1   :  { %10021 = vmatpush1.msk.msra.mxu0 %vm642_vm1, %v1852_v17  ;;  %10024 = vmatpush1.msk.msra.mxu1 %vm642_vm1, %v1854_v18  ;;  %v1856_v45 = vmax.f32 %v1769_v19, 0.0  ;;  %v1858_v46 = vmax.f32 %v1840_v20, 0.0  ;;  %v10783_v17 = vadd.f32 %v10589_v31, %v10739_v63  ;;  %v10797_v30 = vadd.f32 %v10593_v33, %v10739_v63 }
 0x1d2   :  { %v1857_v43 = vmax.f32 %v1771_v24, 0.0  ;;  %v1859_v44 = vmax.f32 %v1842_v25, 0.0  ;;  %10022 = vmatmul.mubr.msk.f32.vlgmr.msra.gmra.mrb[28].mxu0 %vm638_vm2, %v10455_v40  ;;  %10025 = vmatmul.mubr.msk.f32.vlgmr.msra.gmra.mrb[28].mxu1 %vm638_vm2, %v10455_v40 }
 0x1d3   :  { %2398 = vmatprep.mubr.f32.mxu0 %v10327_v3  ;;  %2469 = vmatprep.mubr.f32.mxu1 %v10327_v3 }
 0x1d4   :  { %10026 = vmatprep.subr.msk.mxu0 %vm642_vm1, %v1857_v43  ;;  %10029 = vmatprep.subr.msk.mxu1 %vm642_vm1, %v1859_v44 }
 0x1d5   :  { %10027 = vmatpush1.msk.msra.mxu0 %vm642_vm1, %v1856_v45  ;;  %10030 = vmatpush1.msk.msra.mxu1 %vm642_vm1, %v1858_v46  ;;  %v10815_v46 = vadd.f32 %v10595_v34, %v10739_v63  ;;  %v10833_v34 = vadd.f32 %v10601_v37, %v10739_v63 }
 0x1d6   :  { %10028 = vmatmul.mubr.msk.f32.vlgmr.msra.gmra.mrb[30].mxu0 %vm638_vm2, %v10455_v40  ;;  %10031 = vmatmul.mubr.msk.f32.vlgmr.msra.gmra.mrb[30].mxu1 %vm638_vm2, %v10455_v40 }
 0x1d7   :  { %2509 = vmatprep.subr.mxu0 %v10033_v47  ;;  %2580 = vmatprep.subr.mxu1 %v10035_v48  ;;  %v10819_v47 = vadd.f32 %v10597_v35, %v10739_v63 }
 0x1d8   :  { %2510 = vmatpush1.msra.mxu0 %v10032_v49  ;;  %2573 = vmatprep.mubr.f32.mxu0 %v10327_v3 }
 0x1d9   :  { %2581 = vmatpush1.msra.mxu1 %v10034_v50  ;;  %2644 = vmatprep.mubr.f32.mxu1 %v10327_v3 }
 0x1da   :  { %10048 = vmatmul.mubr.msk.f32.vlgmr.msra.gmra.mrb[32].mxu0 %vm45_vm0, %v10376_v5  ;;  %10049 = vmatmul.mubr.msk.f32.vlgmr.msra.gmra.mrb[32].mxu1 %vm45_vm0, %v10376_v5 }
 0x1db   :  { %2651 = vmatprep.subr.mxu0 %v10037_v51  ;;  %2722 = vmatprep.subr.mxu1 %v10039_v52  ;;  %v10829_v52 = vadd.f32 %v10599_v36, %v10739_v63 }
 0x1dc   :  { %2652 = vmatpush1.msra.mxu0 %v10036_v53  ;;  %2715 = vmatprep.mubr.f32.mxu0 %v10327_v3 }
 0x1dd   :  { %2723 = vmatpush1.msra.mxu1 %v10038_v54  ;;  %2786 = vmatprep.mubr.f32.mxu1 %v10327_v3 }
 0x1de   :  { %10050 = vmatmul.mubr.msk.f32.vlgmr.msra.gmra.mrb[34].mxu0 %vm45_vm0, %v10376_v5  ;;  %10051 = vmatmul.mubr.msk.f32.vlgmr.msra.gmra.mrb[34].mxu1 %vm45_vm0, %v10376_v5 }
 0x1df   :  { %2793 = vmatprep.subr.mxu0 %v10041_v55  ;;  %2864 = vmatprep.subr.mxu1 %v10043_v56 }
 0x1e0   :  { %2794 = vmatpush1.msra.mxu0 %v10040_v57  ;;  %2857 = vmatprep.mubr.f32.mxu0 %v10327_v3 }
 0x1e1   :  { %2865 = vmatpush1.msra.mxu1 %v10042_v58  ;;  %2928 = vmatprep.mubr.f32.mxu1 %v10327_v3  ;;  %v10851_v58 = vadd.f32 %v10603_v38, %v10739_v63  ;;  %v10869_v38 = vadd.f32 %v10609_v42, %v10739_v63 }
 0x1e2   :  { %10052 = vmatmul.mubr.msk.f32.vlgmr.msra.gmra.mrb[36].mxu0 %vm45_vm0, %v10376_v5  ;;  %10053 = vmatmul.mubr.msk.f32.vlgmr.msra.gmra.mrb[36].mxu1 %vm45_vm0, %v10376_v5 }
 0x1e3   :  { %2935 = vmatprep.subr.mxu0 %v10045_v59  ;;  %3006 = vmatprep.subr.mxu1 %v10047_v60  ;;  %v10855_v59 = vadd.f32 %v10605_v39, %v10739_v63 }
 0x1e4   :  { %2936 = vmatpush1.msra.mxu0 %v10044_v61  ;;  %2999 = vmatprep.mubr.f32.mxu0 %v10327_v3 }
 0x1e5   :  { %3007 = vmatpush1.msra.mxu1 %v10046_v62  ;;  %3070 = vmatprep.mubr.f32.mxu1 %v10327_v3 }
 0x1e6   :  { %10054 = vmatmul.mubr.msk.f32.vlgmr.msra.gmra.mrb[38].mxu0 %vm45_vm0, %v10376_v5  ;;  %10055 = vmatmul.mubr.msk.f32.vlgmr.msra.gmra.mrb[38].mxu1 %vm45_vm0, %v10376_v5 }
 0x1e7   :  { %3205 = vmatprep.mubr.f32.mxu0 %v10327_v3  ;;  %3276 = vmatprep.mubr.f32.mxu1 %v10327_v3 }
 0x29d   :  { %v1974_v0 = vpop.f32.mrb[24].mxu0  ;;  %v2045_v1 = vpop.f32.mrb[24].mxu1 }
 0x29e   :  { %v10750_v6 = vadd.f32 %v1974_v0, %v10739_v63  ;;  %v10753_v7 = vadd.f32 %v2045_v1, %v10739_v63  ;;  %v1976_v8 = vpop.f32.mrb[25].mxu0  ;;  %v2047_v9 = vpop.f32.mrb[25].mxu1  ;;  %v10865_v1 = vadd.f32 %v10607_v41, %v10739_v63 }
 0x29f   :  { %v10764_v11 = vadd.f32 %v1976_v8, %v10739_v63  ;;  %v10767_v27 = vadd.f32 %v2047_v9, %v10739_v63 }
 0x2a0   :  { %v2476_v12 = vmax.f32 %v10743_v2, %v10750_v6  ;;  %v2478_v13 = vmax.f32 %v10747_v4, %v10753_v7 }
 0x2a1   :  { %v2477_v28 = vmax.f32 %v10757_v10, %v10764_v11  ;;  %v2479_v14 = vmax.f32 %v10761_v26, %v10767_v27  ;;  %v2116_v29 = vpop.f32.mrb[26].mxu0  ;;  %v2187_v15 = vpop.f32.mrb[26].mxu1 }
 0x2a2   :  { %v10786_v18 = vadd.f32 %v2116_v29, %v10739_v63  ;;  %v10789_v19 = vadd.f32 %v2187_v15, %v10739_v63  ;;  %v2118_v20 = vpop.f32.mrb[27].mxu0  ;;  %v2189_v22 = vpop.f32.mrb[27].mxu1 }
 0x2a3   :  { %v10800_v24 = vadd.f32 %v2118_v20, %v10739_v63  ;;  %v10803_v31 = vadd.f32 %v2189_v22, %v10739_v63 }
 0x2a4   :  { %v2480_v25 = vmax.f32 %v10779_v16, %v10786_v18  ;;  %v2482_v43 = vmax.f32 %v10783_v17, %v10789_v19 }
 0x2a5   :  { %v2481_v32 = vmax.f32 %v10793_v23, %v10800_v24  ;;  %v2483_v44 = vmax.f32 %v10797_v30, %v10803_v31  ;;  %v2258_v33 = vpop.f32.mrb[28].mxu0  ;;  %v2329_v45 = vpop.f32.mrb[28].mxu1 }
 0x2a6   :  { %v10822_v48 = vadd.f32 %v2258_v33, %v10739_v63  ;;  %v10825_v49 = vadd.f32 %v2329_v45, %v10739_v63  ;;  %v2260_v50 = vpop.f32.mrb[29].mxu0  ;;  %v2331_v51 = vpop.f32.mrb[29].mxu1 }
 0x2a7   :  { %v10836_v53 = vadd.f32 %v2260_v50, %v10739_v63  ;;  %v10839_v35 = vadd.f32 %v2331_v51, %v10739_v63 }
 0x2a8   :  { %v2484_v54 = vmax.f32 %v10815_v46, %v10822_v48  ;;  %v12110_v30 = vmax.f32 %v10819_v47, %v10825_v49 }
 0x2a9   :  { %v2400_v37 = vpop.f32.mrb[30].mxu0  ;;  %v2471_v57 = vpop.f32.mrb[30].mxu1  ;;  %v12111_v31 = vmax.f32 %v10829_v52, %v10836_v53 }
 0x2aa   :  { %v10858_v60 = vadd.f32 %v2400_v37, %v10739_v63  ;;  %v10861_v61 = vadd.f32 %v2471_v57, %v10739_v63  ;;  %v2402_v62 = vpop.f32.mrb[31].mxu0  ;;  %v2473_v0 = vpop.f32.mrb[31].mxu1 }
 0x2ab   :  { %v10872_v8 = vadd.f32 %v2402_v62, %v10739_v63  ;;  %v10875_v39 = vadd.f32 %v2473_v0, %v10739_v63 }
 0x2ac   :  { %v12113_v52 = vmax.f32 %v10851_v58, %v10858_v60 }
 0x2ad   :  { %v2575_v42 = vpop.f32.mrb[32].mxu0  ;;  %v2646_v20 = vpop.f32.mrb[32].mxu1 }
 0x2ae   :  { %v2576_v22 = vadd.f32 %v2575_v42, %v10444_v21  ;;  %v2647_v33 = vadd.f32 %v2646_v20, %v10444_v21  ;;  %v2577_v45 = vpop.f32.mrb[33].mxu0  ;;  %v2648_v50 = vpop.f32.mrb[33].mxu1 }
 0x2af   :  { %v2578_v51 = vadd.f32 %v2577_v45, %v10444_v21  ;;  %v2649_v37 = vadd.f32 %v2648_v50, %v10444_v21 }
 0x2b0   :  { %v3077_v41 = vmax.f32 %v2576_v22, 0.0  ;;  %v3079_v9 = vmax.f32 %v2647_v33, 0.0 }
 0x2b1   :  { %v3078_v57 = vmax.f32 %v2578_v51, 0.0  ;;  %v3080_v62 = vmax.f32 %v2649_v37, 0.0  ;;  %v2717_v0 = vpop.f32.mrb[34].mxu0  ;;  %v2788_v29 = vpop.f32.mrb[34].mxu1 }
 0x2b2   :  { %v2718_v15 = vadd.f32 %v2717_v0, %v10444_v21  ;;  %v2789_v56 = vadd.f32 %v2788_v29, %v10444_v21  ;;  %v2719_v36 = vpop.f32.mrb[35].mxu0  ;;  %v2790_v42 = vpop.f32.mrb[35].mxu1 }
 0x2b3   :  { %v2720_v20 = vadd.f32 %v2719_v36, %v10444_v21  ;;  %v2791_v55 = vadd.f32 %v2790_v42, %v10444_v21  ;;  %10056 = vmatprep.subr.msk.mxu0 %vm642_vm1, %v3078_v57  ;;  %10059 = vmatprep.subr.msk.mxu1 %vm642_vm1, %v3080_v62 }
 0x2b4   :  { %10057 = vmatpush1.msk.msra.mxu0 %vm642_vm1, %v3077_v41  ;;  %10060 = vmatpush1.msk.msra.mxu1 %vm642_vm1, %v3079_v9  ;;  %v3081_v36 = vmax.f32 %v2718_v15, 0.0  ;;  %v3083_v29 = vmax.f32 %v2789_v56, 0.0 }
 0x2b5   :  { %v3082_v22 = vmax.f32 %v2720_v20, 0.0  ;;  %v3084_v33 = vmax.f32 %v2791_v55, 0.0  ;;  %v2859_v45 = vpop.f32.mrb[36].mxu0  ;;  %v2930_v50 = vpop.f32.mrb[36].mxu1  ;;  %10058 = vmatmul.mubr.msk.f32.vlgmr.msra.gmra.mrb[40].mxu0 %vm638_vm2, %v10455_v40  ;;  %10061 = vmatmul.mubr.msk.f32.vlgmr.msra.gmra.mrb[40].mxu1 %vm638_vm2, %v10455_v40 }
 0x2b6   :  { %v2860_v51 = vadd.f32 %v2859_v45, %v10444_v21  ;;  %v2931_v37 = vadd.f32 %v2930_v50, %v10444_v21  ;;  %v2861_v57 = vpop.f32.mrb[37].mxu0  ;;  %v2932_v41 = vpop.f32.mrb[37].mxu1  ;;  %3347 = vmatprep.mubr.f32.mxu0 %v10327_v3  ;;  %3418 = vmatprep.mubr.f32.mxu1 %v10327_v3 }
 0x2b7   :  { %v2862_v55 = vadd.f32 %v2861_v57, %v10444_v21  ;;  %v2933_v9 = vadd.f32 %v2932_v41, %v10444_v21  ;;  %10062 = vmatprep.subr.msk.mxu0 %vm642_vm1, %v3082_v22  ;;  %10065 = vmatprep.subr.msk.mxu1 %vm642_vm1, %v3084_v33 }
 0x2b8   :  { %10063 = vmatpush1.msk.msra.mxu0 %vm642_vm1, %v3081_v36  ;;  %10066 = vmatpush1.msk.msra.mxu1 %vm642_vm1, %v3083_v29  ;;  %v3085_v42 = vmax.f32 %v2860_v51, 0.0  ;;  %v3087_v20 = vmax.f32 %v2931_v37, 0.0 }
 0x2b9   :  { %v3086_v56 = vmax.f32 %v2862_v55, 0.0  ;;  %v3088_v15 = vmax.f32 %v2933_v9, 0.0  ;;  %v3001_v62 = vpop.f32.mrb[38].mxu0  ;;  %v3072_v0 = vpop.f32.mrb[38].mxu1  ;;  %10064 = vmatmul.mubr.msk.f32.vlgmr.msra.gmra.mrb[42].mxu0 %vm638_vm2, %v10455_v40  ;;  %10067 = vmatmul.mubr.msk.f32.vlgmr.msra.gmra.mrb[42].mxu1 %vm638_vm2, %v10455_v40  ;;  %v10081_v55 = vld [vmem:[%s12104_s0 + $0x188] sm:$0xff]  ;;  %v10083_v9 = vld [vmem:[%s12104_s0 + $0x198] sm:$0xff] }
 0x2ba   :  { %v3002_v22 = vadd.f32 %v3001_v62, %v10444_v21  ;;  %v3073_v33 = vadd.f32 %v3072_v0, %v10444_v21  ;;  %v3003_v45 = vpop.f32.mrb[39].mxu0  ;;  %v3074_v50 = vpop.f32.mrb[39].mxu1  ;;  %3489 = vmatprep.mubr.f32.mxu0 %v10327_v3  ;;  %3560 = vmatprep.mubr.f32.mxu1 %v10327_v3  ;;  %v10085_v62 = vld [vmem:[%s12104_s0 + $0x1a8] sm:$0xff]  ;;  %v10087_v0 = vld [vmem:[%s12104_s0 + $0x1b8] sm:$0xff] }
 0x2bb   :  { %v3004_v36 = vadd.f32 %v3003_v45, %v10444_v21  ;;  %v3075_v29 = vadd.f32 %v3074_v50, %v10444_v21  ;;  %10068 = vmatprep.subr.msk.mxu0 %vm642_vm1, %v3086_v56  ;;  %10071 = vmatprep.subr.msk.mxu1 %vm642_vm1, %v3088_v15  ;;  %v10080_v56 = vld [vmem:[%s12104_s0 + $0x180] sm:$0xff]  ;;  %v10082_v15 = vld [vmem:[%s12104_s0 + $0x190] sm:$0xff]  ;;  %v10093_v50 = vld [vmem:[%s12104_s0 + $0x1e8] sm:$0xff] }
 0x2bc   :  { %10069 = vmatpush1.msk.msra.mxu0 %vm642_vm1, %v3085_v42  ;;  %10072 = vmatpush1.msk.msra.mxu1 %vm642_vm1, %v3087_v20  ;;  %v3089_v57 = vmax.f32 %v3002_v22, 0.0  ;;  %v3091_v41 = vmax.f32 %v3073_v33, 0.0  ;;  %v10086_v42 = vld [vmem:[%s12104_s0 + $0x1b0] sm:$0xff]  ;;  %v10089_v20 = vld [vmem:[%s12104_s0 + $0x1c8] sm:$0xff]  ;;  %v10091_v22 = vld [vmem:[%s12104_s0 + $0x1d8] sm:$0xff] }
 0x2bd   :  { %v3090_v51 = vmax.f32 %v3004_v36, 0.0  ;;  %v3092_v37 = vmax.f32 %v3075_v29, 0.0  ;;  %10070 = vmatmul.mubr.msk.f32.vlgmr.msra.gmra.mrb[44].mxu0 %vm638_vm2, %v10455_v40  ;;  %10073 = vmatmul.mubr.msk.f32.vlgmr.msra.gmra.mrb[44].mxu1 %vm638_vm2, %v10455_v40  ;;  %v10088_v33 = vld [vmem:[%s12104_s0 + $0x1c0] sm:$0xff]  ;;  %v10090_v45 = vld [vmem:[%s12104_s0 + $0x1d0] sm:$0xff]  ;;  %v10095_v36 = vld [vmem:[%s12104_s0 + $0x1f8] sm:$0xff] }
 0x2be   :  { %3631 = vmatprep.mubr.f32.mxu0 %v10327_v3  ;;  %3702 = vmatprep.mubr.f32.mxu1 %v10327_v3  ;;  %v10092_v29 = vld [vmem:[%s12104_s0 + $0x1e0] sm:$0xff] }
 0x2bf   :  { %10074 = vmatprep.subr.msk.mxu0 %vm642_vm1, %v3090_v51  ;;  %10077 = vmatprep.subr.msk.mxu1 %vm642_vm1, %v3092_v37  ;;  %v10094_v51 = vld [vmem:[%s12104_s0 + $0x1f0] sm:$0xff]  ;;  %v11010_v37 = vld [vmem:[%s12105_s1] sm:$0xf] }
 0x2c0   :  { %10075 = vmatpush1.msk.msra.mxu0 %vm642_vm1, %v3089_v57  ;;  %10078 = vmatpush1.msk.msra.mxu1 %vm642_vm1, %v3091_v41 }
 0x2c1   :  { %10076 = vmatmul.mubr.msk.f32.vlgmr.msra.gmra.mrb[46].mxu0 %vm638_vm2, %v10455_v40  ;;  %10079 = vmatmul.mubr.msk.f32.vlgmr.msra.gmra.mrb[46].mxu1 %vm638_vm2, %v10455_v40  ;;  %v10084_v40 = vld [vmem:[%s12104_s0 + $0x1a0] sm:$0xff] }
 0x2c2   :  { %3742 = vmatprep.subr.mxu0 %v10081_v55  ;;  %3813 = vmatprep.subr.mxu1 %v10083_v9 }
 0x2c3   :  { %3743 = vmatpush1.msra.mxu0 %v10080_v56  ;;  %3806 = vmatprep.mubr.f32.mxu0 %v10327_v3 }
 0x2c4   :  { %3814 = vmatpush1.msra.mxu1 %v10082_v15  ;;  %3877 = vmatprep.mubr.f32.mxu1 %v10327_v3 }
 0x2c5   :  { %10096 = vmatmul.mubr.msk.f32.vlgmr.msra.gmra.mrb[48].mxu0 %vm45_vm0, %v10376_v5  ;;  %10097 = vmatmul.mubr.msk.f32.vlgmr.msra.gmra.mrb[48].mxu1 %vm45_vm0, %v10376_v5 }
 0x2c6   :  { %3884 = vmatprep.subr.mxu0 %v10085_v62  ;;  %3955 = vmatprep.subr.mxu1 %v10087_v0 }
 0x2c7   :  { %3885 = vmatpush1.msra.mxu0 %v10084_v40  ;;  %3948 = vmatprep.mubr.f32.mxu0 %v10327_v3 }
 0x2c8   :  { %3956 = vmatpush1.msra.mxu1 %v10086_v42  ;;  %4019 = vmatprep.mubr.f32.mxu1 %v10327_v3 }
 0x2c9   :  { %10098 = vmatmul.mubr.msk.f32.vlgmr.msra.gmra.mrb[50].mxu0 %vm45_vm0, %v10376_v5  ;;  %10099 = vmatmul.mubr.msk.f32.vlgmr.msra.gmra.mrb[50].mxu1 %vm45_vm0, %v10376_v5 }
 0x2ca   :  { %4026 = vmatprep.subr.mxu0 %v10089_v20  ;;  %4097 = vmatprep.subr.mxu1 %v10091_v22 }
 0x2cb   :  { %4027 = vmatpush1.msra.mxu0 %v10088_v33  ;;  %4090 = vmatprep.mubr.f32.mxu0 %v10327_v3 }
 0x2cc   :  { %4098 = vmatpush1.msra.mxu1 %v10090_v45  ;;  %4161 = vmatprep.mubr.f32.mxu1 %v10327_v3 }
 0x2cd   :  { %10100 = vmatmul.mubr.msk.f32.vlgmr.msra.gmra.mrb[52].mxu0 %vm45_vm0, %v10376_v5  ;;  %10101 = vmatmul.mubr.msk.f32.vlgmr.msra.gmra.mrb[52].mxu1 %vm45_vm0, %v10376_v5 }
 0x2ce   :  { %4168 = vmatprep.subr.mxu0 %v10093_v50  ;;  %4239 = vmatprep.subr.mxu1 %v10095_v36 }
 0x2cf   :  { %4169 = vmatpush1.msra.mxu0 %v10092_v29  ;;  %4232 = vmatprep.mubr.f32.mxu0 %v10327_v3 }
 0x2d0   :  { %4240 = vmatpush1.msra.mxu1 %v10094_v51  ;;  %4303 = vmatprep.mubr.f32.mxu1 %v10327_v3  ;;  %v12115_v51 = vmax.f32 %v10865_v1, %v10872_v8 }
 0x2d1   :  { %10102 = vmatmul.mubr.msk.f32.vlgmr.msra.gmra.mrb[54].mxu0 %vm45_vm0, %v11010_v37  ;;  %10103 = vmatmul.mubr.msk.f32.vlgmr.msra.gmra.mrb[54].mxu1 %vm45_vm0, %v11010_v37 }
 0x2d2   :  { %4438 = vmatprep.mubr.f32.mxu0 %v10327_v3  ;;  %4509 = vmatprep.mubr.f32.mxu1 %v10327_v3 }
 0x388   :  { %v3207_v5 = vpop.f32.mrb[40].mxu0  ;;  %v3278_v57 = vpop.f32.mrb[40].mxu1 }
 0x389   :  { %v3208_v41 = vadd.f32 %v3207_v5, %v10739_v63  ;;  %v3279_v55 = vadd.f32 %v3278_v57, %v10739_v63  ;;  %v3209_v9 = vpop.f32.mrb[41].mxu0  ;;  %v3280_v56 = vpop.f32.mrb[41].mxu1  ;;  %v12116_v57 = vmax.f32 %v10869_v38, %v10875_v39 }
 0x38a   :  { %v3210_v15 = vadd.f32 %v3209_v9, %v10739_v63  ;;  %v3281_v62 = vadd.f32 %v3280_v56, %v10739_v63 }
 0x38b   :  { %v11025_v0 = vmax.f32 %v2476_v12, %v3208_v41  ;;  %v11030_v40 = vmax.f32 %v2478_v13, %v3279_v55 }
 0x38c   :  { %v11035_v42 = vmax.f32 %v2477_v28, %v3210_v15  ;;  %v11040_v20 = vmax.f32 %v2479_v14, %v3281_v62  ;;  %v3349_v22 = vpop.f32.mrb[42].mxu0  ;;  %v3420_v33 = vpop.f32.mrb[42].mxu1 }
 0x38d   :  { %v3350_v2 = vadd.f32 %v3349_v22, %v10739_v63  ;;  %v3421_v6 = vadd.f32 %v3420_v33, %v10739_v63  ;;  %v3351_v12 = vpop.f32.mrb[43].mxu0  ;;  %v3422_v4 = vpop.f32.mrb[43].mxu1 }
 0x38e   :  { %v3352_v7 = vadd.f32 %v3351_v12, %v10739_v63  ;;  %v3423_v13 = vadd.f32 %v3422_v4, %v10739_v63 }
 0x38f   :  { %v11049_v10 = vmax.f32 %v2480_v25, %v3350_v2  ;;  %v11054_v26 = vmax.f32 %v2482_v43, %v3421_v6 }
 0x390   :  { %v11059_v11 = vmax.f32 %v2481_v32, %v3352_v7  ;;  %v11064_v27 = vmax.f32 %v2483_v44, %v3423_v13  ;;  %v3491_v28 = vpop.f32.mrb[44].mxu0  ;;  %v3562_v14 = vpop.f32.mrb[44].mxu1  ;;  %v12112_v44 = vmax.f32 %v10833_v34, %v10839_v35  ;;  %v12114_v34 = vmax.f32 %v10855_v59, %v10861_v61 }
 0x391   :  { %v3492_v16 = vadd.f32 %v3491_v28, %v10739_v63  ;;  %v3563_v18 = vadd.f32 %v3562_v14, %v10739_v63  ;;  %v3493_v25 = vpop.f32.mrb[45].mxu0  ;;  %v3564_v17 = vpop.f32.mrb[45].mxu1 }
 0x392   :  { %v3494_v19 = vadd.f32 %v3493_v25, %v10739_v63  ;;  %v3565_v43 = vadd.f32 %v3564_v17, %v10739_v63 }
 0x393   :  { %v11073_v23 = vmax.f32 %v2484_v54, %v3492_v16  ;;  %v11078_v24 = vmax.f32 %v12110_v30, %v3563_v18  ;;  %v11129_v18 = vld [vmem:[%s12108_s3] sm:$0xf] }
 0x394   :  { %v11083_v32 = vmax.f32 %v12111_v31, %v3494_v19  ;;  %v11088_v45 = vmax.f32 %v12112_v44, %v3565_v43  ;;  %v3633_v50 = vpop.f32.mrb[46].mxu0  ;;  %v3704_v36 = vpop.f32.mrb[46].mxu1 }
 0x395   :  { %v3634_v46 = vadd.f32 %v3633_v50, %v10739_v63  ;;  %v3705_v48 = vadd.f32 %v3704_v36, %v10739_v63  ;;  %v3635_v54 = vpop.f32.mrb[47].mxu0  ;;  %v3706_v47 = vpop.f32.mrb[47].mxu1 }
 0x396   :  { %v3636_v49 = vadd.f32 %v3635_v54, %v10739_v63  ;;  %v3707_v29 = vadd.f32 %v3706_v47, %v10739_v63 }
 0x397   :  { %v11097_v53 = vmax.f32 %v12113_v52, %v3634_v46  ;;  %v11102_v35 = vmax.f32 %v12114_v34, %v3705_v48 }
 0x398   :  { %v11107_v5 = vmax.f32 %v12115_v51, %v3636_v49  ;;  %v11112_v41 = vmax.f32 %v12116_v57, %v3707_v29  ;;  %v3808_v55 = vpop.f32.mrb[48].mxu0  ;;  %v3879_v9 = vpop.f32.mrb[48].mxu1 }
 0x399   :  { %v3809_v58 = vadd.f32 %v3808_v55, %v10444_v21  ;;  %v3880_v60 = vadd.f32 %v3879_v9, %v10444_v21  ;;  %v3810_v56 = vpop.f32.mrb[49].mxu0  ;;  %v3881_v59 = vpop.f32.mrb[49].mxu1 }
 0x39a   :  { %v3811_v61 = vadd.f32 %v3810_v56, %v10444_v21  ;;  %v3882_v15 = vadd.f32 %v3881_v59, %v10444_v21  ;;  %v10129_v59 = vld [vmem:[%s12104_s0 + $0x208] sm:$0xff] }
 0x39b   :  { %v4310_v33 = vmax.f32 %v3809_v58, 0.0  ;;  %v4312_v38 = vmax.f32 %v3880_v60, 0.0 }
 0x39c   :  { %v4311_v1 = vmax.f32 %v3811_v61, 0.0  ;;  %v4313_v8 = vmax.f32 %v3882_v15, 0.0  ;;  %v3950_v62 = vpop.f32.mrb[50].mxu0  ;;  %v4021_v22 = vpop.f32.mrb[50].mxu1  ;;  %v10131_v61 = vld [vmem:[%s12104_s0 + $0x218] sm:$0xff]  ;;  %v10128_v15 = vld [vmem:[%s12104_s0 + $0x200] sm:$0xff] }
 0x39d   :  { %v3951_v39 = vadd.f32 %v3950_v62, %v10444_v21  ;;  %v4022_v2 = vadd.f32 %v4021_v22, %v10444_v21  ;;  %v3952_v6 = vpop.f32.mrb[51].mxu0  ;;  %v4023_v12 = vpop.f32.mrb[51].mxu1  ;;  %v10135_v62 = vld [vmem:[%s12104_s0 + $0x238] sm:$0xff]  ;;  %v10132_v22 = vld [vmem:[%s12104_s0 + $0x220] sm:$0xff] }
 0x39e   :  { %v3953_v4 = vadd.f32 %v3952_v6, %v10444_v21  ;;  %v4024_v7 = vadd.f32 %v4023_v12, %v10444_v21  ;;  %10104 = vmatprep.subr.msk.mxu0 %vm642_vm1, %v4311_v1  ;;  %10107 = vmatprep.subr.msk.mxu1 %vm642_vm1, %v4313_v8  ;;  %v10130_v1 = vld [vmem:[%s12104_s0 + $0x210] sm:$0xff]  ;;  %v10133_v8 = vld [vmem:[%s12104_s0 + $0x228] sm:$0xff] }
 0x39f   :  { %10105 = vmatpush1.msk.msra.mxu0 %vm642_vm1, %v4310_v33  ;;  %10108 = vmatpush1.msk.msra.mxu1 %vm642_vm1, %v4312_v38  ;;  %v4314_v25 = vmax.f32 %v3951_v39, 0.0  ;;  %v4316_v17 = vmax.f32 %v4022_v2, 0.0  ;;  %v10134_v33 = vld [vmem:[%s12104_s0 + $0x230] sm:$0xff]  ;;  %v10137_v38 = vld [vmem:[%s12104_s0 + $0x248] sm:$0xff]  ;;  %v10139_v39 = vld [vmem:[%s12104_s0 + $0x258] sm:$0xff] }
 0x3a0   :  { %v4315_v13 = vmax.f32 %v3953_v4, 0.0  ;;  %v4317_v28 = vmax.f32 %v4024_v7, 0.0  ;;  %v4092_v14 = vpop.f32.mrb[52].mxu0  ;;  %v4163_v16 = vpop.f32.mrb[52].mxu1  ;;  %10106 = vmatmul.mubr.msk.f32.vlgmr.msra.gmra.mrb[56].mxu0 %vm638_vm2, %v11129_v18  ;;  %10109 = vmatmul.mubr.msk.f32.vlgmr.msra.gmra.mrb[56].mxu1 %vm638_vm2, %v11129_v18  ;;  %v10136_v2 = vld [vmem:[%s12104_s0 + $0x240] sm:$0xff]  ;;  %v10138_v6 = vld [vmem:[%s12104_s0 + $0x250] sm:$0xff] }
 0x3a1   :  { %v4093_v19 = vadd.f32 %v4092_v14, %v10444_v21  ;;  %v4164_v43 = vadd.f32 %v4163_v16, %v10444_v21  ;;  %v4094_v30 = vpop.f32.mrb[53].mxu0  ;;  %v4165_v31 = vpop.f32.mrb[53].mxu1  ;;  %4580 = vmatprep.mubr.f32.mxu0 %v10327_v3  ;;  %4651 = vmatprep.mubr.f32.mxu1 %v10327_v3  ;;  %v10141_v12 = vld [vmem:[%s12104_s0 + $0x268] sm:$0xff]  ;;  %v10143_v4 = vld [vmem:[%s12104_s0 + $0x278] sm:$0xff]  ;;  %v10140_v7 = vld [vmem:[%s12104_s0 + $0x260] sm:$0xff] }
 0x3a2   :  { %v4095_v44 = vadd.f32 %v4094_v30, %v10444_v21  ;;  %v4166_v50 = vadd.f32 %v4165_v31, %v10444_v21  ;;  %10110 = vmatprep.subr.msk.mxu0 %vm642_vm1, %v4315_v13  ;;  %10113 = vmatprep.subr.msk.mxu1 %vm642_vm1, %v4317_v28  ;;  %v10142_v13 = vld [vmem:[%s12104_s0 + $0x270] sm:$0xff] }
 0x3a3   :  { %10111 = vmatpush1.msk.msra.mxu0 %vm642_vm1, %v4314_v25  ;;  %10114 = vmatpush1.msk.msra.mxu1 %vm642_vm1, %v4316_v17  ;;  %v4318_v47 = vmax.f32 %v4093_v19, 0.0  ;;  %v4320_v49 = vmax.f32 %v4164_v43, 0.0 }
 0x3a4   :  { %v4319_v36 = vmax.f32 %v4095_v44, 0.0  ;;  %v4321_v46 = vmax.f32 %v4166_v50, 0.0  ;;  %v4234_v48 = vpop.f32.mrb[54].mxu0  ;;  %v4305_v54 = vpop.f32.mrb[54].mxu1  ;;  %10112 = vmatmul.mubr.msk.f32.vlgmr.msra.gmra.mrb[58].mxu0 %vm638_vm2, %v11129_v18  ;;  %10115 = vmatmul.mubr.msk.f32.vlgmr.msra.gmra.mrb[58].mxu1 %vm638_vm2, %v11129_v18 }
 0x3a5   :  { %v4235_v29 = vadd.f32 %v4234_v48, %v10444_v21  ;;  %v4306_v52 = vadd.f32 %v4305_v54, %v10444_v21  ;;  %v4236_v34 = vpop.f32.mrb[55].mxu0  ;;  %v4307_v51 = vpop.f32.mrb[55].mxu1  ;;  %4722 = vmatprep.mubr.f32.mxu0 %v10327_v3  ;;  %4793 = vmatprep.mubr.f32.mxu1 %v10327_v3 }
 0x3a6   :  { %v4237_v57 = vadd.f32 %v4236_v34, %v10444_v21  ;;  %v4308_v55 = vadd.f32 %v4307_v51, %v10444_v21  ;;  %10116 = vmatprep.subr.msk.mxu0 %vm642_vm1, %v4319_v36  ;;  %10119 = vmatprep.subr.msk.mxu1 %vm642_vm1, %v4321_v46 }
 0x3a7   :  { %10117 = vmatpush1.msk.msra.mxu0 %vm642_vm1, %v4318_v47  ;;  %10120 = vmatpush1.msk.msra.mxu1 %vm642_vm1, %v4320_v49  ;;  %v4322_v60 = vmax.f32 %v4235_v29, 0.0  ;;  %v4324_v56 = vmax.f32 %v4306_v52, 0.0 }
 0x3a8   :  { %v4323_v9 = vmax.f32 %v4237_v57, 0.0  ;;  %v4325_v58 = vmax.f32 %v4308_v55, 0.0  ;;  %10118 = vmatmul.mubr.msk.f32.vlgmr.msra.gmra.mrb[60].mxu0 %vm638_vm2, %v11129_v18  ;;  %10121 = vmatmul.mubr.msk.f32.vlgmr.msra.gmra.mrb[60].mxu1 %vm638_vm2, %v11129_v18 }
 0x3a9   :  { %4864 = vmatprep.mubr.f32.mxu0 %v10327_v3  ;;  %4935 = vmatprep.mubr.f32.mxu1 %v10327_v3 }
 0x3aa   :  { %10122 = vmatprep.subr.msk.mxu0 %vm642_vm1, %v4323_v9  ;;  %10125 = vmatprep.subr.msk.mxu1 %vm642_vm1, %v4325_v58 }
 0x3ab   :  { %10123 = vmatpush1.msk.msra.mxu0 %vm642_vm1, %v4322_v60  ;;  %10126 = vmatpush1.msk.msra.mxu1 %vm642_vm1, %v4324_v56 }
 0x3ac   :  { %10124 = vmatmul.mubr.msk.f32.vlgmr.msra.gmra.mrb[62].mxu0 %vm638_vm2, %v11129_v18  ;;  %10127 = vmatmul.mubr.msk.f32.vlgmr.msra.gmra.mrb[62].mxu1 %vm638_vm2, %v11129_v18 }
 0x3ad   :  { %4975 = vmatprep.subr.mxu0 %v10129_v59  ;;  %5046 = vmatprep.subr.mxu1 %v10131_v61 }
 0x3ae   :  { %4976 = vmatpush1.msra.mxu0 %v10128_v15  ;;  %5039 = vmatprep.mubr.f32.mxu0 %v10327_v3 }
 0x3af   :  { %5047 = vmatpush1.msra.mxu1 %v10130_v1  ;;  %5110 = vmatprep.mubr.f32.mxu1 %v10327_v3 }
 0x3b0   :  { %10144 = vmatmul.mubr.msk.f32.vlgmr.msra.gmra.mrb[64].mxu0 %vm45_vm0, %v11010_v37  ;;  %10145 = vmatmul.mubr.msk.f32.vlgmr.msra.gmra.mrb[64].mxu1 %vm45_vm0, %v11010_v37 }
 0x3b1   :  { %5117 = vmatprep.subr.mxu0 %v10133_v8  ;;  %5188 = vmatprep.subr.mxu1 %v10135_v62 }
 0x3b2   :  { %5118 = vmatpush1.msra.mxu0 %v10132_v22  ;;  %5181 = vmatprep.mubr.f32.mxu0 %v10327_v3 }
 0x3b3   :  { %5189 = vmatpush1.msra.mxu1 %v10134_v33  ;;  %5252 = vmatprep.mubr.f32.mxu1 %v10327_v3 }
 0x3b4   :  { %10146 = vmatmul.mubr.msk.f32.vlgmr.msra.gmra.mrb[66].mxu0 %vm45_vm0, %v11010_v37  ;;  %10147 = vmatmul.mubr.msk.f32.vlgmr.msra.gmra.mrb[66].mxu1 %vm45_vm0, %v11010_v37 }
 0x3b5   :  { %5259 = vmatprep.subr.mxu0 %v10137_v38  ;;  %5330 = vmatprep.subr.mxu1 %v10139_v39 }
 0x3b6   :  { %5260 = vmatpush1.msra.mxu0 %v10136_v2  ;;  %5323 = vmatprep.mubr.f32.mxu0 %v10327_v3 }
 0x3b7   :  { %5331 = vmatpush1.msra.mxu1 %v10138_v6  ;;  %5394 = vmatprep.mubr.f32.mxu1 %v10327_v3 }
 0x3b8   :  { %10148 = vmatmul.mubr.msk.f32.vlgmr.msra.gmra.mrb[68].mxu0 %vm45_vm0, %v11010_v37  ;;  %10149 = vmatmul.mubr.msk.f32.vlgmr.msra.gmra.mrb[68].mxu1 %vm45_vm0, %v11010_v37 }
 0x3b9   :  { %5401 = vmatprep.subr.mxu0 %v10141_v12  ;;  %5472 = vmatprep.subr.mxu1 %v10143_v4 }
 0x3ba   :  { %5402 = vmatpush1.msra.mxu0 %v10140_v7  ;;  %5465 = vmatprep.mubr.f32.mxu0 %v10327_v3 }
 0x3bb   :  { %5473 = vmatpush1.msra.mxu1 %v10142_v13  ;;  %5536 = vmatprep.mubr.f32.mxu1 %v10327_v3 }
 0x3bc   :  { %10150 = vmatmul.mubr.msk.f32.vlgmr.msra.gmra.mrb[70].mxu0 %vm45_vm0, %v11010_v37  ;;  %10151 = vmatmul.mubr.msk.f32.vlgmr.msra.gmra.mrb[70].mxu1 %vm45_vm0, %v11010_v37 }
 0x3bd   :  { %5671 = vmatprep.mubr.f32.mxu0 %v10327_v3  ;;  %5742 = vmatprep.mubr.f32.mxu1 %v10327_v3 }
 0x473   :  { %v4440_v28 = vpop.f32.mrb[56].mxu0  ;;  %v4511_v14 = vpop.f32.mrb[56].mxu1 }
 0x474   :  { %v11248_v16 = vadd.f32 %v4440_v28, %v10739_v63  ;;  %v11251_v25 = vadd.f32 %v4511_v14, %v10739_v63  ;;  %v4442_v17 = vpop.f32.mrb[57].mxu0  ;;  %v4513_v19 = vpop.f32.mrb[57].mxu1 }
 0x475   :  { %v11254_v43 = vadd.f32 %v4442_v17, %v10739_v63  ;;  %v11257_v30 = vadd.f32 %v4513_v19, %v10739_v63 }
 0x476   :  { %v4942_v31 = vmax.f32 %v11025_v0, %v11248_v16  ;;  %v4944_v44 = vmax.f32 %v11030_v40, %v11251_v25 }
 0x477   :  { %v4943_v50 = vmax.f32 %v11035_v42, %v11254_v43  ;;  %v4945_v36 = vmax.f32 %v11040_v20, %v11257_v30  ;;  %v4582_v46 = vpop.f32.mrb[58].mxu0  ;;  %v4653_v48 = vpop.f32.mrb[58].mxu1 }
 0x478   :  { %v11268_v54 = vadd.f32 %v4582_v46, %v10739_v63  ;;  %v11271_v47 = vadd.f32 %v4653_v48, %v10739_v63  ;;  %v4584_v49 = vpop.f32.mrb[59].mxu0  ;;  %v4655_v29 = vpop.f32.mrb[59].mxu1 }
 0x479   :  { %v11274_v52 = vadd.f32 %v4584_v49, %v10739_v63  ;;  %v11277_v34 = vadd.f32 %v4655_v29, %v10739_v63 }
 0x47a   :  { %v4946_v51 = vmax.f32 %v11049_v10, %v11268_v54  ;;  %v4948_v57 = vmax.f32 %v11054_v26, %v11271_v47 }
 0x47b   :  { %v4947_v55 = vmax.f32 %v11059_v11, %v11274_v52  ;;  %v4949_v9 = vmax.f32 %v11064_v27, %v11277_v34  ;;  %v4724_v58 = vpop.f32.mrb[60].mxu0  ;;  %v4795_v60 = vpop.f32.mrb[60].mxu1 }
 0x47c   :  { %v11288_v56 = vadd.f32 %v4724_v58, %v10739_v63  ;;  %v11291_v59 = vadd.f32 %v4795_v60, %v10739_v63  ;;  %v4726_v61 = vpop.f32.mrb[61].mxu0  ;;  %v4797_v15 = vpop.f32.mrb[61].mxu1 }
 0x47d   :  { %v11294_v1 = vadd.f32 %v4726_v61, %v10739_v63  ;;  %v11297_v8 = vadd.f32 %v4797_v15, %v10739_v63 }
 0x47e   :  { %v4950_v62 = vmax.f32 %v11073_v23, %v11288_v56  ;;  %v12117_v27 = vmax.f32 %v11078_v24, %v11291_v59 }
 0x47f   :  { %v4866_v39 = vpop.f32.mrb[62].mxu0  ;;  %v4937_v2 = vpop.f32.mrb[62].mxu1  ;;  %v12118_v34 = vmax.f32 %v11083_v32, %v11294_v1 }
 0x480   :  { %v11308_v6 = vadd.f32 %v4866_v39, %v10739_v63  ;;  %v11311_v12 = vadd.f32 %v4937_v2, %v10739_v63  ;;  %v4868_v4 = vpop.f32.mrb[63].mxu0  ;;  %v4939_v7 = vpop.f32.mrb[63].mxu1 }
 0x481   :  { %v11314_v13 = vadd.f32 %v4868_v4, %v10739_v63  ;;  %v11317_v28 = vadd.f32 %v4939_v7, %v10739_v63 }
 0x482   :  { %v12120_v32 = vmax.f32 %v11097_v53, %v11308_v6 }
 0x483   :  { %v5041_v48 = vpop.f32.mrb[64].mxu0  ;;  %v5112_v49 = vpop.f32.mrb[64].mxu1 }
 0x484   :  { %v5042_v29 = vadd.f32 %v5041_v48, %v10444_v21  ;;  %v5113_v58 = vadd.f32 %v5112_v49, %v10444_v21  ;;  %v5043_v60 = vpop.f32.mrb[65].mxu0  ;;  %v5114_v61 = vpop.f32.mrb[65].mxu1 }
 0x485   :  { %v5044_v15 = vadd.f32 %v5043_v60, %v10444_v21  ;;  %v5115_v39 = vadd.f32 %v5114_v61, %v10444_v21 }
 0x486   :  { %v5543_v19 = vmax.f32 %v5042_v29, 0.0  ;;  %v5545_v14 = vmax.f32 %v5113_v58, 0.0 }
 0x487   :  { %v5544_v2 = vmax.f32 %v5044_v15, 0.0  ;;  %v5546_v4 = vmax.f32 %v5115_v39, 0.0  ;;  %v5183_v7 = vpop.f32.mrb[66].mxu0  ;;  %v5254_v17 = vpop.f32.mrb[66].mxu1 }
 0x488   :  { %v5184_v46 = vadd.f32 %v5183_v7, %v10444_v21  ;;  %v5255_v38 = vadd.f32 %v5254_v17, %v10444_v21  ;;  %v5185_v33 = vpop.f32.mrb[67].mxu0  ;;  %v5256_v48 = vpop.f32.mrb[67].mxu1 }
 0x489   :  { %v5186_v49 = vadd.f32 %v5185_v33, %v10444_v21  ;;  %v5257_v22 = vadd.f32 %v5256_v48, %v10444_v21  ;;  %10152 = vmatprep.subr.msk.mxu0 %vm642_vm1, %v5544_v2  ;;  %10155 = vmatprep.subr.msk.mxu1 %vm642_vm1, %v5546_v4 }
 0x48a   :  { %10153 = vmatpush1.msk.msra.mxu0 %vm642_vm1, %v5543_v19  ;;  %10156 = vmatpush1.msk.msra.mxu1 %vm642_vm1, %v5545_v14  ;;  %v5547_v33 = vmax.f32 %v5184_v46, 0.0  ;;  %v5549_v17 = vmax.f32 %v5255_v38, 0.0 }
 0x48b   :  { %v5548_v29 = vmax.f32 %v5186_v49, 0.0  ;;  %v5550_v58 = vmax.f32 %v5257_v22, 0.0  ;;  %v5325_v60 = vpop.f32.mrb[68].mxu0  ;;  %v5396_v61 = vpop.f32.mrb[68].mxu1  ;;  %10154 = vmatmul.mubr.msk.f32.vlgmr.msra.gmra.mrb[72].mxu0 %vm638_vm2, %v11129_v18  ;;  %10157 = vmatmul.mubr.msk.f32.vlgmr.msra.gmra.mrb[72].mxu1 %vm638_vm2, %v11129_v18 }
 0x48c   :  { %v5326_v15 = vadd.f32 %v5325_v60, %v10444_v21  ;;  %v5397_v39 = vadd.f32 %v5396_v61, %v10444_v21  ;;  %v5327_v2 = vpop.f32.mrb[69].mxu0  ;;  %v5398_v19 = vpop.f32.mrb[69].mxu1  ;;  %5813 = vmatprep.mubr.f32.mxu0 %v10327_v3  ;;  %5884 = vmatprep.mubr.f32.mxu1 %v10327_v3 }
 0x48d   :  { %v5328_v22 = vadd.f32 %v5327_v2, %v10444_v21  ;;  %v5399_v14 = vadd.f32 %v5398_v19, %v10444_v21  ;;  %10158 = vmatprep.subr.msk.mxu0 %vm642_vm1, %v5548_v29  ;;  %10161 = vmatprep.subr.msk.mxu1 %vm642_vm1, %v5550_v58 }
 0x48e   :  { %10159 = vmatpush1.msk.msra.mxu0 %vm642_vm1, %v5547_v33  ;;  %10162 = vmatpush1.msk.msra.mxu1 %vm642_vm1, %v5549_v17  ;;  %v5551_v48 = vmax.f32 %v5326_v15, 0.0  ;;  %v5553_v49 = vmax.f32 %v5397_v39, 0.0 }
 0x48f   :  { %v5552_v38 = vmax.f32 %v5328_v22, 0.0  ;;  %v5554_v46 = vmax.f32 %v5399_v14, 0.0  ;;  %v5467_v4 = vpop.f32.mrb[70].mxu0  ;;  %v5538_v7 = vpop.f32.mrb[70].mxu1  ;;  %10160 = vmatmul.mubr.msk.f32.vlgmr.msra.gmra.mrb[74].mxu0 %vm638_vm2, %v11129_v18  ;;  %10163 = vmatmul.mubr.msk.f32.vlgmr.msra.gmra.mrb[74].mxu1 %vm638_vm2, %v11129_v18  ;;  %v10177_v22 = vld [vmem:[%s12104_s0 + $0x288] sm:$0xff]  ;;  %v10179_v14 = vld [vmem:[%s12104_s0 + $0x298] sm:$0xff] }
 0x490   :  { %v5468_v29 = vadd.f32 %v5467_v4, %v10444_v21  ;;  %v5539_v58 = vadd.f32 %v5538_v7, %v10444_v21  ;;  %v5469_v60 = vpop.f32.mrb[71].mxu0  ;;  %v5540_v61 = vpop.f32.mrb[71].mxu1  ;;  %5955 = vmatprep.mubr.f32.mxu0 %v10327_v3  ;;  %6026 = vmatprep.mubr.f32.mxu1 %v10327_v3  ;;  %v10181_v4 = vld [vmem:[%s12104_s0 + $0x2a8] sm:$0xff]  ;;  %v10183_v7 = vld [vmem:[%s12104_s0 + $0x2b8] sm:$0xff] }
 0x491   :  { %v5470_v33 = vadd.f32 %v5469_v60, %v10444_v21  ;;  %v5541_v17 = vadd.f32 %v5540_v61, %v10444_v21  ;;  %10164 = vmatprep.subr.msk.mxu0 %vm642_vm1, %v5552_v38  ;;  %10167 = vmatprep.subr.msk.mxu1 %vm642_vm1, %v5554_v46  ;;  %v10176_v38 = vld [vmem:[%s12104_s0 + $0x280] sm:$0xff]  ;;  %v10178_v46 = vld [vmem:[%s12104_s0 + $0x290] sm:$0xff] }
 0x492   :  { %10165 = vmatpush1.msk.msra.mxu0 %vm642_vm1, %v5551_v48  ;;  %10168 = vmatpush1.msk.msra.mxu1 %vm642_vm1, %v5553_v49  ;;  %v5555_v2 = vmax.f32 %v5468_v29, 0.0  ;;  %v5557_v19 = vmax.f32 %v5539_v58, 0.0  ;;  %v10180_v48 = vld [vmem:[%s12104_s0 + $0x2a0] sm:$0xff]  ;;  %v10182_v49 = vld [vmem:[%s12104_s0 + $0x2b0] sm:$0xff]  ;;  %v10185_v29 = vld [vmem:[%s12104_s0 + $0x2c8] sm:$0xff] }
 0x493   :  { %v5556_v15 = vmax.f32 %v5470_v33, 0.0  ;;  %v5558_v39 = vmax.f32 %v5541_v17, 0.0  ;;  %10166 = vmatmul.mubr.msk.f32.vlgmr.msra.gmra.mrb[76].mxu0 %vm638_vm2, %v11129_v18  ;;  %10169 = vmatmul.mubr.msk.f32.vlgmr.msra.gmra.mrb[76].mxu1 %vm638_vm2, %v11129_v18  ;;  %v10187_v58 = vld [vmem:[%s12104_s0 + $0x2d8] sm:$0xff]  ;;  %v10184_v60 = vld [vmem:[%s12104_s0 + $0x2c0] sm:$0xff]  ;;  %v10186_v61 = vld [vmem:[%s12104_s0 + $0x2d0] sm:$0xff] }
 0x494   :  { %6097 = vmatprep.mubr.f32.mxu0 %v10327_v3  ;;  %6168 = vmatprep.mubr.f32.mxu1 %v10327_v3  ;;  %v10189_v33 = vld [vmem:[%s12104_s0 + $0x2e8] sm:$0xff]  ;;  %v10191_v17 = vld [vmem:[%s12104_s0 + $0x2f8] sm:$0xff] }
 0x495   :  { %10170 = vmatprep.subr.msk.mxu0 %vm642_vm1, %v5556_v15  ;;  %10173 = vmatprep.subr.msk.mxu1 %vm642_vm1, %v5558_v39  ;;  %v10188_v15 = vld [vmem:[%s12104_s0 + $0x2e0] sm:$0xff]  ;;  %v10190_v39 = vld [vmem:[%s12104_s0 + $0x2f0] sm:$0xff] }
 0x496   :  { %10171 = vmatpush1.msk.msra.mxu0 %vm642_vm1, %v5555_v2  ;;  %10174 = vmatpush1.msk.msra.mxu1 %vm642_vm1, %v5557_v19 }
 0x497   :  { %10172 = vmatmul.mubr.msk.f32.vlgmr.msra.gmra.mrb[78].mxu0 %vm638_vm2, %v11129_v18  ;;  %10175 = vmatmul.mubr.msk.f32.vlgmr.msra.gmra.mrb[78].mxu1 %vm638_vm2, %v11129_v18 }
 0x498   :  { %6208 = vmatprep.subr.mxu0 %v10177_v22  ;;  %6279 = vmatprep.subr.mxu1 %v10179_v14 }
 0x499   :  { %6209 = vmatpush1.msra.mxu0 %v10176_v38  ;;  %6272 = vmatprep.mubr.f32.mxu0 %v10327_v3 }
 0x49a   :  { %6280 = vmatpush1.msra.mxu1 %v10178_v46  ;;  %6343 = vmatprep.mubr.f32.mxu1 %v10327_v3 }
 0x49b   :  { %10192 = vmatmul.mubr.msk.f32.vlgmr.msra.gmra.mrb[80].mxu0 %vm45_vm0, %v11010_v37  ;;  %10193 = vmatmul.mubr.msk.f32.vlgmr.msra.gmra.mrb[80].mxu1 %vm45_vm0, %v11010_v37 }
 0x49c   :  { %6350 = vmatprep.subr.mxu0 %v10181_v4  ;;  %6421 = vmatprep.subr.mxu1 %v10183_v7 }
 0x49d   :  { %6351 = vmatpush1.msra.mxu0 %v10180_v48  ;;  %6414 = vmatprep.mubr.f32.mxu0 %v10327_v3 }
 0x49e   :  { %6422 = vmatpush1.msra.mxu1 %v10182_v49  ;;  %6485 = vmatprep.mubr.f32.mxu1 %v10327_v3 }
 0x49f   :  { %10194 = vmatmul.mubr.msk.f32.vlgmr.msra.gmra.mrb[82].mxu0 %vm45_vm0, %v11010_v37  ;;  %10195 = vmatmul.mubr.msk.f32.vlgmr.msra.gmra.mrb[82].mxu1 %vm45_vm0, %v11010_v37 }
 0x4a0   :  { %6492 = vmatprep.subr.mxu0 %v10185_v29  ;;  %6563 = vmatprep.subr.mxu1 %v10187_v58 }
 0x4a1   :  { %6493 = vmatpush1.msra.mxu0 %v10184_v60  ;;  %6556 = vmatprep.mubr.f32.mxu0 %v10327_v3 }
 0x4a2   :  { %6564 = vmatpush1.msra.mxu1 %v10186_v61  ;;  %6627 = vmatprep.mubr.f32.mxu1 %v10327_v3 }
 0x4a3   :  { %10196 = vmatmul.mubr.msk.f32.vlgmr.msra.gmra.mrb[84].mxu0 %vm45_vm0, %v11010_v37  ;;  %10197 = vmatmul.mubr.msk.f32.vlgmr.msra.gmra.mrb[84].mxu1 %vm45_vm0, %v11010_v37 }
 0x4a4   :  { %6634 = vmatprep.subr.mxu0 %v10189_v33  ;;  %6705 = vmatprep.subr.mxu1 %v10191_v17 }
 0x4a5   :  { %6635 = vmatpush1.msra.mxu0 %v10188_v15  ;;  %6698 = vmatprep.mubr.f32.mxu0 %v10327_v3 }
 0x4a6   :  { %6706 = vmatpush1.msra.mxu1 %v10190_v39  ;;  %6769 = vmatprep.mubr.f32.mxu1 %v10327_v3 }
 0x4a7   :  { %10198 = vmatmul.mubr.msk.f32.vlgmr.msra.gmra.mrb[86].mxu0 %vm45_vm0, %v11010_v37  ;;  %10199 = vmatmul.mubr.msk.f32.vlgmr.msra.gmra.mrb[86].mxu1 %vm45_vm0, %v11010_v37 }
 0x4a8   :  { %6904 = vmatprep.mubr.f32.mxu0 %v10327_v3  ;;  %6975 = vmatprep.mubr.f32.mxu1 %v10327_v3 }
 0x55e   :  { %v5673_v2 = vpop.f32.mrb[72].mxu0  ;;  %v5744_v19 = vpop.f32.mrb[72].mxu1 }
 0x55f   :  { %v5674_v22 = vadd.f32 %v5673_v2, %v10739_v63  ;;  %v5745_v14 = vadd.f32 %v5744_v19, %v10739_v63  ;;  %v5675_v38 = vpop.f32.mrb[73].mxu0  ;;  %v5746_v46 = vpop.f32.mrb[73].mxu1  ;;  %v12122_v2 = vmax.f32 %v11107_v5, %v11314_v13 }
 0x560   :  { %v5676_v4 = vadd.f32 %v5675_v38, %v10739_v63  ;;  %v5747_v7 = vadd.f32 %v5746_v46, %v10739_v63 }
 0x561   :  { %v11462_v48 = vmax.f32 %v4942_v31, %v5674_v22  ;;  %v11467_v49 = vmax.f32 %v4944_v44, %v5745_v14  ;;  %v12123_v22 = vmax.f32 %v11112_v41, %v11317_v28 }
 0x562   :  { %v11472_v29 = vmax.f32 %v4943_v50, %v5676_v4  ;;  %v11477_v58 = vmax.f32 %v4945_v36, %v5747_v7  ;;  %v5815_v60 = vpop.f32.mrb[74].mxu0  ;;  %v5886_v61 = vpop.f32.mrb[74].mxu1 }
 0x563   :  { %v5816_v0 = vadd.f32 %v5815_v60, %v10739_v63  ;;  %v5887_v16 = vadd.f32 %v5886_v61, %v10739_v63  ;;  %v5817_v31 = vpop.f32.mrb[75].mxu0  ;;  %v5888_v40 = vpop.f32.mrb[75].mxu1 }
 0x564   :  { %v5818_v25 = vadd.f32 %v5817_v31, %v10739_v63  ;;  %v5889_v44 = vadd.f32 %v5888_v40, %v10739_v63 }
 0x565   :  { %v11486_v42 = vmax.f32 %v4946_v51, %v5816_v0  ;;  %v11491_v20 = vmax.f32 %v4948_v57, %v5887_v16 }
 0x566   :  { %v11496_v43 = vmax.f32 %v4947_v55, %v5818_v25  ;;  %v11501_v30 = vmax.f32 %v4949_v9, %v5889_v44  ;;  %v5957_v50 = vpop.f32.mrb[76].mxu0  ;;  %v6028_v36 = vpop.f32.mrb[76].mxu1  ;;  %v12119_v9 = vmax.f32 %v11088_v45, %v11297_v8  ;;  %v12121_v45 = vmax.f32 %v11102_v35, %v11311_v12 }
 0x567   :  { %v5958_v10 = vadd.f32 %v5957_v50, %v10739_v63  ;;  %v6029_v54 = vadd.f32 %v6028_v36, %v10739_v63  ;;  %v5959_v51 = vpop.f32.mrb[77].mxu0  ;;  %v6030_v26 = vpop.f32.mrb[77].mxu1 }
 0x568   :  { %v5960_v47 = vadd.f32 %v5959_v51, %v10739_v63  ;;  %v6031_v57 = vadd.f32 %v6030_v26, %v10739_v63 }
 0x569   :  { %v11510_v11 = vmax.f32 %v4950_v62, %v5958_v10  ;;  %v11515_v52 = vmax.f32 %v12117_v27, %v6029_v54 }
 0x56a   :  { %v11520_v55 = vmax.f32 %v12118_v34, %v5960_v47  ;;  %v11525_v33 = vmax.f32 %v12119_v9, %v6031_v57  ;;  %v6099_v17 = vpop.f32.mrb[78].mxu0  ;;  %v6170_v15 = vpop.f32.mrb[78].mxu1 }
 0x56b   :  { %v6100_v23 = vadd.f32 %v6099_v17, %v10739_v63  ;;  %v6171_v56 = vadd.f32 %v6170_v15, %v10739_v63  ;;  %v6101_v62 = vpop.f32.mrb[79].mxu0  ;;  %v6172_v24 = vpop.f32.mrb[79].mxu1 }
 0x56c   :  { %v6102_v59 = vadd.f32 %v6101_v62, %v10739_v63  ;;  %v6173_v39 = vadd.f32 %v6172_v24, %v10739_v63 }
 0x56d   :  { %v11534_v1 = vmax.f32 %v12120_v32, %v6100_v23  ;;  %v11539_v8 = vmax.f32 %v12121_v45, %v6171_v56 }
 0x56e   :  { %v11544_v19 = vmax.f32 %v12122_v2, %v6102_v59  ;;  %v11549_v14 = vmax.f32 %v12123_v22, %v6173_v39  ;;  %v6274_v38 = vpop.f32.mrb[80].mxu0  ;;  %v6345_v46 = vpop.f32.mrb[80].mxu1 }
 0x56f   :  { %v6275_v53 = vadd.f32 %v6274_v38, %v10444_v21  ;;  %v6346_v6 = vadd.f32 %v6345_v46, %v10444_v21  ;;  %v6276_v4 = vpop.f32.mrb[81].mxu0  ;;  %v6347_v35 = vpop.f32.mrb[81].mxu1 }
 0x570   :  { %v6277_v12 = vadd.f32 %v6276_v4, %v10444_v21  ;;  %v6348_v7 = vadd.f32 %v6347_v35, %v10444_v21  ;;  %v10225_v35 = vld [vmem:[%s12104_s0 + $0x308] sm:$0xff] }
 0x571   :  { %v6776_v0 = vmax.f32 %v6275_v53, 0.0  ;;  %v6778_v41 = vmax.f32 %v6346_v6, 0.0 }
 0x572   :  { %v6777_v5 = vmax.f32 %v6277_v12, 0.0  ;;  %v6779_v13 = vmax.f32 %v6348_v7, 0.0  ;;  %v6416_v60 = vpop.f32.mrb[82].mxu0  ;;  %v6487_v61 = vpop.f32.mrb[82].mxu1  ;;  %v10227_v12 = vld [vmem:[%s12104_s0 + $0x318] sm:$0xff]  ;;  %v10224_v7 = vld [vmem:[%s12104_s0 + $0x300] sm:$0xff] }
 0x573   :  { %v6417_v28 = vadd.f32 %v6416_v60, %v10444_v21  ;;  %v6488_v16 = vadd.f32 %v6487_v61, %v10444_v21  ;;  %v6418_v31 = vpop.f32.mrb[83].mxu0  ;;  %v6489_v40 = vpop.f32.mrb[83].mxu1  ;;  %v10231_v60 = vld [vmem:[%s12104_s0 + $0x338] sm:$0xff]  ;;  %v10230_v61 = vld [vmem:[%s12104_s0 + $0x330] sm:$0xff] }
 0x574   :  { %v6419_v25 = vadd.f32 %v6418_v31, %v10444_v21  ;;  %v6490_v44 = vadd.f32 %v6489_v40, %v10444_v21  ;;  %10200 = vmatprep.subr.msk.mxu0 %vm642_vm1, %v6777_v5  ;;  %10203 = vmatprep.subr.msk.mxu1 %vm642_vm1, %v6779_v13  ;;  %v10226_v5 = vld [vmem:[%s12104_s0 + $0x310] sm:$0xff]  ;;  %v10229_v13 = vld [vmem:[%s12104_s0 + $0x328] sm:$0xff]  ;;  %v10239_v40 = vld [vmem:[%s12104_s0 + $0x378] sm:$0xff] }
 0x575   :  { %10201 = vmatpush1.msk.msra.mxu0 %vm642_vm1, %v6776_v0  ;;  %10204 = vmatpush1.msk.msra.mxu1 %vm642_vm1, %v6778_v41  ;;  %v6780_v51 = vmax.f32 %v6417_v28, 0.0  ;;  %v6782_v26 = vmax.f32 %v6488_v16, 0.0  ;;  %v10233_v0 = vld [vmem:[%s12104_s0 + $0x348] sm:$0xff]  ;;  %v10235_v41 = vld [vmem:[%s12104_s0 + $0x358] sm:$0xff]  ;;  %v10232_v28 = vld [vmem:[%s12104_s0 + $0x340] sm:$0xff] }
 0x576   :  { %v6781_v50 = vmax.f32 %v6419_v25, 0.0  ;;  %v6783_v36 = vmax.f32 %v6490_v44, 0.0  ;;  %v6558_v10 = vpop.f32.mrb[84].mxu0  ;;  %v6629_v54 = vpop.f32.mrb[84].mxu1  ;;  %10202 = vmatmul.mubr.msk.f32.vlgmr.msra.gmra.mrb[88].mxu0 %vm638_vm2, %v11129_v18  ;;  %10205 = vmatmul.mubr.msk.f32.vlgmr.msra.gmra.mrb[88].mxu1 %vm638_vm2, %v11129_v18  ;;  %v10234_v16 = vld [vmem:[%s12104_s0 + $0x350] sm:$0xff]  ;;  %v10237_v31 = vld [vmem:[%s12104_s0 + $0x368] sm:$0xff] }
 0x577   :  { %v6559_v47 = vadd.f32 %v6558_v10, %v10444_v21  ;;  %v6630_v57 = vadd.f32 %v6629_v54, %v10444_v21  ;;  %v6560_v27 = vpop.f32.mrb[85].mxu0  ;;  %v6631_v34 = vpop.f32.mrb[85].mxu1  ;;  %7046 = vmatprep.mubr.f32.mxu0 %v10327_v3  ;;  %7117 = vmatprep.mubr.f32.mxu1 %v10327_v3  ;;  %v11667_v25 = vld [vmem:[%s12105_s1] sm:$0xf]  ;;  %v10238_v44 = vld [vmem:[%s12104_s0 + $0x370] sm:$0xff] }
 0x578   :  { %v6561_v9 = vadd.f32 %v6560_v27, %v10444_v21  ;;  %v6632_v17 = vadd.f32 %v6631_v34, %v10444_v21  ;;  %10206 = vmatprep.subr.msk.mxu0 %vm642_vm1, %v6781_v50  ;;  %10209 = vmatprep.subr.msk.mxu1 %vm642_vm1, %v6783_v36 }
 0x579   :  { %10207 = vmatpush1.msk.msra.mxu0 %vm642_vm1, %v6780_v51  ;;  %10210 = vmatpush1.msk.msra.mxu1 %vm642_vm1, %v6782_v26  ;;  %v6784_v24 = vmax.f32 %v6559_v47, 0.0  ;;  %v6786_v59 = vmax.f32 %v6630_v57, 0.0 }
 0x57a   :  { %v6785_v15 = vmax.f32 %v6561_v9, 0.0  ;;  %v6787_v23 = vmax.f32 %v6632_v17, 0.0  ;;  %v6700_v56 = vpop.f32.mrb[86].mxu0  ;;  %v6771_v62 = vpop.f32.mrb[86].mxu1  ;;  %10208 = vmatmul.mubr.msk.f32.vlgmr.msra.gmra.mrb[90].mxu0 %vm638_vm2, %v11129_v18  ;;  %10211 = vmatmul.mubr.msk.f32.vlgmr.msra.gmra.mrb[90].mxu1 %vm638_vm2, %v11129_v18 }
 0x57b   :  { %v6701_v39 = vadd.f32 %v6700_v56, %v10444_v21  ;;  %v6772_v32 = vadd.f32 %v6771_v62, %v10444_v21  ;;  %v6702_v45 = vpop.f32.mrb[87].mxu0  ;;  %v6773_v2 = vpop.f32.mrb[87].mxu1  ;;  %7188 = vmatprep.mubr.f32.mxu0 %v10327_v3  ;;  %7259 = vmatprep.mubr.f32.mxu1 %v10327_v3 }
 0x57c   :  { %v6703_v22 = vadd.f32 %v6702_v45, %v10444_v21  ;;  %v6774_v38 = vadd.f32 %v6773_v2, %v10444_v21  ;;  %10212 = vmatprep.subr.msk.mxu0 %vm642_vm1, %v6785_v15  ;;  %10215 = vmatprep.subr.msk.mxu1 %vm642_vm1, %v6787_v23 }
 0x57d   :  { %10213 = vmatpush1.msk.msra.mxu0 %vm642_vm1, %v6784_v24  ;;  %10216 = vmatpush1.msk.msra.mxu1 %vm642_vm1, %v6786_v59  ;;  %v6788_v6 = vmax.f32 %v6701_v39, 0.0  ;;  %v6790_v4 = vmax.f32 %v6772_v32, 0.0 }
 0x57e   :  { %v6789_v46 = vmax.f32 %v6703_v22, 0.0  ;;  %v6791_v53 = vmax.f32 %v6774_v38, 0.0  ;;  %10214 = vmatmul.mubr.msk.f32.vlgmr.msra.gmra.mrb[92].mxu0 %vm638_vm2, %v11129_v18  ;;  %10217 = vmatmul.mubr.msk.f32.vlgmr.msra.gmra.mrb[92].mxu1 %vm638_vm2, %v11129_v18 }
 0x57f   :  { %7330 = vmatprep.mubr.f32.mxu0 %v10327_v3  ;;  %7401 = vmatprep.mubr.f32.mxu1 %v10327_v3 }
 0x580   :  { %10218 = vmatprep.subr.msk.mxu0 %vm642_vm1, %v6789_v46  ;;  %10221 = vmatprep.subr.msk.mxu1 %vm642_vm1, %v6791_v53 }
 0x581   :  { %10219 = vmatpush1.msk.msra.mxu0 %vm642_vm1, %v6788_v6  ;;  %10222 = vmatpush1.msk.msra.mxu1 %vm642_vm1, %v6790_v4 }
 0x582   :  { %10220 = vmatmul.mubr.msk.f32.vlgmr.msra.gmra.mrb[94].mxu0 %vm638_vm2, %v11129_v18  ;;  %10223 = vmatmul.mubr.msk.f32.vlgmr.msra.gmra.mrb[94].mxu1 %vm638_vm2, %v11129_v18  ;;  %v10228_v18 = vld [vmem:[%s12104_s0 + $0x320] sm:$0xff] }
 0x583   :  { %7441 = vmatprep.subr.mxu0 %v10225_v35  ;;  %7512 = vmatprep.subr.mxu1 %v10227_v12 }
 0x584   :  { %7442 = vmatpush1.msra.mxu0 %v10224_v7  ;;  %7505 = vmatprep.mubr.f32.mxu0 %v10327_v3 }
 0x585   :  { %7513 = vmatpush1.msra.mxu1 %v10226_v5  ;;  %7576 = vmatprep.mubr.f32.mxu1 %v10327_v3 }
 0x586   :  { %10240 = vmatmul.mubr.msk.f32.vlgmr.msra.gmra.mrb[96].mxu0 %vm45_vm0, %v11010_v37  ;;  %10241 = vmatmul.mubr.msk.f32.vlgmr.msra.gmra.mrb[96].mxu1 %vm45_vm0, %v11010_v37 }
 0x587   :  { %7583 = vmatprep.subr.mxu0 %v10229_v13  ;;  %7654 = vmatprep.subr.mxu1 %v10231_v60 }
 0x588   :  { %7584 = vmatpush1.msra.mxu0 %v10228_v18  ;;  %7647 = vmatprep.mubr.f32.mxu0 %v10327_v3 }
 0x589   :  { %7655 = vmatpush1.msra.mxu1 %v10230_v61  ;;  %7718 = vmatprep.mubr.f32.mxu1 %v10327_v3 }
 0x58a   :  { %10242 = vmatmul.mubr.msk.f32.vlgmr.msra.gmra.mrb[98].mxu0 %vm45_vm0, %v11010_v37  ;;  %10243 = vmatmul.mubr.msk.f32.vlgmr.msra.gmra.mrb[98].mxu1 %vm45_vm0, %v11010_v37  ;;  %v10236_v37 = vld [vmem:[%s12104_s0 + $0x360] sm:$0xff] }
 0x58b   :  { %7725 = vmatprep.subr.mxu0 %v10233_v0  ;;  %7796 = vmatprep.subr.mxu1 %v10235_v41 }
 0x58c   :  { %7726 = vmatpush1.msra.mxu0 %v10232_v28  ;;  %7789 = vmatprep.mubr.f32.mxu0 %v10327_v3 }
 0x58d   :  { %7797 = vmatpush1.msra.mxu1 %v10234_v16  ;;  %7860 = vmatprep.mubr.f32.mxu1 %v10327_v3 }
 0x58e   :  { %10244 = vmatmul.mubr.msk.f32.vlgmr.msra.gmra.mrb[100].mxu0 %vm45_vm0, %v11667_v25  ;;  %10245 = vmatmul.mubr.msk.f32.vlgmr.msra.gmra.mrb[100].mxu1 %vm45_vm0, %v11667_v25 }
 0x58f   :  { %7867 = vmatprep.subr.mxu0 %v10237_v31  ;;  %7938 = vmatprep.subr.mxu1 %v10239_v40 }
 0x590   :  { %7868 = vmatpush1.msra.mxu0 %v10236_v37  ;;  %7931 = vmatprep.mubr.f32.mxu0 %v10327_v3 }
 0x591   :  { %7939 = vmatpush1.msra.mxu1 %v10238_v44  ;;  %8002 = vmatprep.mubr.f32.mxu1 %v10327_v3 }
 0x592   :  { %10246 = vmatmul.mubr.msk.f32.vlgmr.msra.gmra.mrb[102].mxu0 %vm45_vm0, %v11667_v25  ;;  %10247 = vmatmul.mubr.msk.f32.vlgmr.msra.gmra.mrb[102].mxu1 %vm45_vm0, %v11667_v25 }
 0x593   :  { %8137 = vmatprep.mubr.f32.mxu0 %v10327_v3  ;;  %8208 = vmatprep.mubr.f32.mxu1 %v10327_v3 }
 0x649   :  { %v6906_v50 = vpop.f32.mrb[88].mxu0  ;;  %v6977_v36 = vpop.f32.mrb[88].mxu1 }
 0x64a   :  { %v11685_v10 = vadd.f32 %v6906_v50, %v10739_v63  ;;  %v11688_v54 = vadd.f32 %v6977_v36, %v10739_v63  ;;  %v6908_v51 = vpop.f32.mrb[89].mxu0  ;;  %v6979_v26 = vpop.f32.mrb[89].mxu1 }
 0x64b   :  { %v11691_v47 = vadd.f32 %v6908_v51, %v10739_v63  ;;  %v11694_v57 = vadd.f32 %v6979_v26, %v10739_v63 }
 0x64c   :  { %v7408_v27 = vmax.f32 %v11462_v48, %v11685_v10  ;;  %v7410_v34 = vmax.f32 %v11467_v49, %v11688_v54 }
 0x64d   :  { %v7409_v9 = vmax.f32 %v11472_v29, %v11691_v47  ;;  %v7411_v17 = vmax.f32 %v11477_v58, %v11694_v57  ;;  %v7048_v15 = vpop.f32.mrb[90].mxu0  ;;  %v7119_v23 = vpop.f32.mrb[90].mxu1 }
 0x64e   :  { %v11705_v56 = vadd.f32 %v7048_v15, %v10739_v63  ;;  %v11708_v62 = vadd.f32 %v7119_v23, %v10739_v63  ;;  %v7050_v24 = vpop.f32.mrb[91].mxu0  ;;  %v7121_v59 = vpop.f32.mrb[91].mxu1 }
 0x64f   :  { %v11711_v39 = vadd.f32 %v7050_v24, %v10739_v63  ;;  %v11714_v32 = vadd.f32 %v7121_v59, %v10739_v63 }
 0x650   :  { %v7412_v45 = vmax.f32 %v11486_v42, %v11705_v56  ;;  %v7414_v2 = vmax.f32 %v11491_v20, %v11708_v62 }
 0x651   :  { %v7413_v22 = vmax.f32 %v11496_v43, %v11711_v39  ;;  %v7415_v38 = vmax.f32 %v11501_v30, %v11714_v32  ;;  %v7190_v46 = vpop.f32.mrb[92].mxu0  ;;  %v7261_v53 = vpop.f32.mrb[92].mxu1 }
 0x652   :  { %v11725_v6 = vadd.f32 %v7190_v46, %v10739_v63  ;;  %v11728_v4 = vadd.f32 %v7261_v53, %v10739_v63  ;;  %v7192_v35 = vpop.f32.mrb[93].mxu0  ;;  %v7263_v12 = vpop.f32.mrb[93].mxu1 }
 0x653   :  { %v11731_v7 = vadd.f32 %v7192_v35, %v10739_v63  ;;  %v11734_v5 = vadd.f32 %v7263_v12, %v10739_v63 }
 0x654   :  { %v7416_v13 = vmax.f32 %v11510_v11, %v11725_v6  ;;  %v7418_v60 = vmax.f32 %v11515_v52, %v11728_v4 }
 0x655   :  { %v7332_v0 = vpop.f32.mrb[94].mxu0  ;;  %v7403_v41 = vpop.f32.mrb[94].mxu1  ;;  %v12124_v39 = vmax.f32 %v11520_v55, %v11731_v7 }
 0x656   :  { %v11745_v28 = vadd.f32 %v7332_v0, %v10739_v63  ;;  %v11748_v16 = vadd.f32 %v7403_v41, %v10739_v63  ;;  %v7334_v31 = vpop.f32.mrb[95].mxu0  ;;  %v7405_v40 = vpop.f32.mrb[95].mxu1 }
 0x657   :  { %v11751_v37 = vadd.f32 %v7334_v31, %v10739_v63  ;;  %v11754_v44 = vadd.f32 %v7405_v40, %v10739_v63 }
 0x658   :  { %v12126_v55 = vmax.f32 %v11534_v1, %v11745_v28 }
 0x659   :  { %v7507_v15 = vpop.f32.mrb[96].mxu0  ;;  %v7578_v23 = vpop.f32.mrb[96].mxu1 }
 0x65a   :  { %v7508_v24 = vadd.f32 %v7507_v15, %v10444_v21  ;;  %v7579_v59 = vadd.f32 %v7578_v23, %v10444_v21  ;;  %v7509_v46 = vpop.f32.mrb[97].mxu0  ;;  %v7580_v53 = vpop.f32.mrb[97].mxu1 }
 0x65b   :  { %v7510_v35 = vadd.f32 %v7509_v46, %v10444_v21  ;;  %v7581_v12 = vadd.f32 %v7580_v53, %v10444_v21 }
 0x65c   :  { %v8009_v51 = vmax.f32 %v7508_v24, 0.0  ;;  %v8011_v36 = vmax.f32 %v7579_v59, 0.0 }
 0x65d   :  { %v8010_v0 = vmax.f32 %v7510_v35, 0.0  ;;  %v8012_v41 = vmax.f32 %v7581_v12, 0.0  ;;  %v7649_v31 = vpop.f32.mrb[98].mxu0  ;;  %v7720_v40 = vpop.f32.mrb[98].mxu1  ;;  %v11779_v35 = vld [vmem:[%s12108_s3] sm:$0xf] }
 0x65e   :  { %v7650_v26 = vadd.f32 %v7649_v31, %v10444_v21  ;;  %v7721_v50 = vadd.f32 %v7720_v40, %v10444_v21  ;;  %v7651_v61 = vpop.f32.mrb[99].mxu0  ;;  %v7722_v15 = vpop.f32.mrb[99].mxu1 }
 0x65f   :  { %v7652_v23 = vadd.f32 %v7651_v61, %v10444_v21  ;;  %v7723_v18 = vadd.f32 %v7722_v15, %v10444_v21  ;;  %10248 = vmatprep.subr.msk.mxu0 %vm642_vm1, %v8010_v0  ;;  %10251 = vmatprep.subr.msk.mxu1 %vm642_vm1, %v8012_v41 }
 0x660   :  { %10249 = vmatpush1.msk.msra.mxu0 %vm642_vm1, %v8009_v51  ;;  %10252 = vmatpush1.msk.msra.mxu1 %vm642_vm1, %v8011_v36  ;;  %v8013_v61 = vmax.f32 %v7650_v26, 0.0  ;;  %v8015_v12 = vmax.f32 %v7721_v50, 0.0 }
 0x661   :  { %v8014_v24 = vmax.f32 %v7652_v23, 0.0  ;;  %v8016_v59 = vmax.f32 %v7723_v18, 0.0  ;;  %v7791_v46 = vpop.f32.mrb[100].mxu0  ;;  %v7862_v53 = vpop.f32.mrb[100].mxu1  ;;  %10250 = vmatmul.mubr.msk.f32.vlgmr.msra.gmra.mrb[104].mxu0 %vm638_vm2, %v11779_v35  ;;  %10253 = vmatmul.mubr.msk.f32.vlgmr.msra.gmra.mrb[104].mxu1 %vm638_vm2, %v11779_v35 }
 0x662   :  { %v7792_v51 = vadd.f32 %v7791_v46, %v10444_v21  ;;  %v7863_v36 = vadd.f32 %v7862_v53, %v10444_v21  ;;  %v7793_v18 = vpop.f32.mrb[101].mxu0  ;;  %v7864_v0 = vpop.f32.mrb[101].mxu1  ;;  %8279 = vmatprep.mubr.f32.mxu0 %v10327_v3  ;;  %8350 = vmatprep.mubr.f32.mxu1 %v10327_v3 }
 0x663   :  { %v7794_v41 = vadd.f32 %v7793_v18, %v10444_v21  ;;  %v7865_v31 = vadd.f32 %v7864_v0, %v10444_v21  ;;  %10254 = vmatprep.subr.msk.mxu0 %vm642_vm1, %v8014_v24  ;;  %10257 = vmatprep.subr.msk.mxu1 %vm642_vm1, %v8016_v59 }
 0x664   :  { %10255 = vmatpush1.msk.msra.mxu0 %vm642_vm1, %v8013_v61  ;;  %10258 = vmatpush1.msk.msra.mxu1 %vm642_vm1, %v8015_v12  ;;  %v8017_v23 = vmax.f32 %v7792_v51, 0.0  ;;  %v8019_v46 = vmax.f32 %v7863_v36, 0.0 }
 0x665   :  { %v8018_v50 = vmax.f32 %v7794_v41, 0.0  ;;  %v8020_v26 = vmax.f32 %v7865_v31, 0.0  ;;  %v7933_v40 = vpop.f32.mrb[102].mxu0  ;;  %v8004_v15 = vpop.f32.mrb[102].mxu1  ;;  %10256 = vmatmul.mubr.msk.f32.vlgmr.msra.gmra.mrb[106].mxu0 %vm638_vm2, %v11779_v35  ;;  %10259 = vmatmul.mubr.msk.f32.vlgmr.msra.gmra.mrb[106].mxu1 %vm638_vm2, %v11779_v35  ;;  %v10273_v31 = vld [vmem:[%s12104_s0 + $0x388] sm:$0xff] }
 0x666   :  { %v7934_v24 = vadd.f32 %v7933_v40, %v10444_v21  ;;  %v8005_v59 = vadd.f32 %v8004_v15, %v10444_v21  ;;  %v7935_v53 = vpop.f32.mrb[103].mxu0  ;;  %v8006_v61 = vpop.f32.mrb[103].mxu1  ;;  %8421 = vmatprep.mubr.f32.mxu0 %v10327_v3  ;;  %8492 = vmatprep.mubr.f32.mxu1 %v10327_v3  ;;  %v10274_v40 = vld [vmem:[%s12104_s0 + $0x390] sm:$0xff]  ;;  %v10277_v15 = vld [vmem:[%s12104_s0 + $0x3a8] sm:$0xff] }
 0x667   :  { %v7936_v12 = vadd.f32 %v7935_v53, %v10444_v21  ;;  %v8007_v18 = vadd.f32 %v8006_v61, %v10444_v21  ;;  %10260 = vmatprep.subr.msk.mxu0 %vm642_vm1, %v8018_v50  ;;  %10263 = vmatprep.subr.msk.mxu1 %vm642_vm1, %v8020_v26  ;;  %v10275_v50 = vld [vmem:[%s12104_s0 + $0x398] sm:$0xff]  ;;  %v10272_v26 = vld [vmem:[%s12104_s0 + $0x380] sm:$0xff] }
 0x668   :  { %10261 = vmatpush1.msk.msra.mxu0 %vm642_vm1, %v8017_v23  ;;  %10264 = vmatpush1.msk.msra.mxu1 %vm642_vm1, %v8019_v46  ;;  %v8021_v0 = vmax.f32 %v7934_v24, 0.0  ;;  %v8023_v41 = vmax.f32 %v8005_v59, 0.0  ;;  %v10279_v23 = vld [vmem:[%s12104_s0 + $0x3b8] sm:$0xff]  ;;  %v10276_v46 = vld [vmem:[%s12104_s0 + $0x3a0] sm:$0xff]  ;;  %v10278_v24 = vld [vmem:[%s12104_s0 + $0x3b0] sm:$0xff] }
 0x669   :  { %v8022_v51 = vmax.f32 %v7936_v12, 0.0  ;;  %v8024_v36 = vmax.f32 %v8007_v18, 0.0  ;;  %10262 = vmatmul.mubr.msk.f32.vlgmr.msra.gmra.mrb[108].mxu0 %vm638_vm2, %v11779_v35  ;;  %10265 = vmatmul.mubr.msk.f32.vlgmr.msra.gmra.mrb[108].mxu1 %vm638_vm2, %v11779_v35  ;;  %v10281_v59 = vld [vmem:[%s12104_s0 + $0x3c8] sm:$0xff]  ;;  %v10283_v53 = vld [vmem:[%s12104_s0 + $0x3d8] sm:$0xff]  ;;  %v10280_v61 = vld [vmem:[%s12104_s0 + $0x3c0] sm:$0xff] }
 0x66a   :  { %8563 = vmatprep.mubr.f32.mxu0 %v10327_v3  ;;  %8634 = vmatprep.mubr.f32.mxu1 %v10327_v3  ;;  %v10282_v12 = vld [vmem:[%s12104_s0 + $0x3d0] sm:$0xff]  ;;  %v10285_v18 = vld [vmem:[%s12104_s0 + $0x3e8] sm:$0xff] }
 0x66b   :  { %10266 = vmatprep.subr.msk.mxu0 %vm642_vm1, %v8022_v51  ;;  %10269 = vmatprep.subr.msk.mxu1 %vm642_vm1, %v8024_v36  ;;  %v10287_v51 = vld [vmem:[%s12104_s0 + $0x3f8] sm:$0xff]  ;;  %v10284_v36 = vld [vmem:[%s12104_s0 + $0x3e0] sm:$0xff] }
 0x66c   :  { %10267 = vmatpush1.msk.msra.mxu0 %vm642_vm1, %v8021_v0  ;;  %10270 = vmatpush1.msk.msra.mxu1 %vm642_vm1, %v8023_v41  ;;  %v10286_v0 = vld [vmem:[%s12104_s0 + $0x3f0] sm:$0xff] }
 0x66d   :  { %10268 = vmatmul.mubr.msk.f32.vlgmr.msra.gmra.mrb[110].mxu0 %vm638_vm2, %v11779_v35  ;;  %10271 = vmatmul.mubr.msk.f32.vlgmr.msra.gmra.mrb[110].mxu1 %vm638_vm2, %v11779_v35 }
 0x66e   :  { %8674 = vmatprep.subr.mxu0 %v10273_v31  ;;  %8745 = vmatprep.subr.mxu1 %v10275_v50 }
 0x66f   :  { %8675 = vmatpush1.msra.mxu0 %v10272_v26  ;;  %8738 = vmatprep.mubr.f32.mxu0 %v10327_v3 }
 0x670   :  { %8746 = vmatpush1.msra.mxu1 %v10274_v40  ;;  %8809 = vmatprep.mubr.f32.mxu1 %v10327_v3 }
 0x671   :  { %10288 = vmatmul.mubr.msk.f32.vlgmr.msra.gmra.mrb[112].mxu0 %vm45_vm0, %v11667_v25  ;;  %10289 = vmatmul.mubr.msk.f32.vlgmr.msra.gmra.mrb[112].mxu1 %vm45_vm0, %v11667_v25 }
 0x672   :  { %8816 = vmatprep.subr.mxu0 %v10277_v15  ;;  %8887 = vmatprep.subr.mxu1 %v10279_v23 }
 0x673   :  { %8817 = vmatpush1.msra.mxu0 %v10276_v46  ;;  %8880 = vmatprep.mubr.f32.mxu0 %v10327_v3 }
 0x674   :  { %8888 = vmatpush1.msra.mxu1 %v10278_v24  ;;  %8951 = vmatprep.mubr.f32.mxu1 %v10327_v3 }
 0x675   :  { %10290 = vmatmul.mubr.msk.f32.vlgmr.msra.gmra.mrb[114].mxu0 %vm45_vm0, %v11667_v25  ;;  %10291 = vmatmul.mubr.msk.f32.vlgmr.msra.gmra.mrb[114].mxu1 %vm45_vm0, %v11667_v25 }
 0x676   :  { %8958 = vmatprep.subr.mxu0 %v10281_v59  ;;  %9029 = vmatprep.subr.mxu1 %v10283_v53 }
 0x677   :  { %8959 = vmatpush1.msra.mxu0 %v10280_v61  ;;  %9022 = vmatprep.mubr.f32.mxu0 %v10327_v3 }
 0x678   :  { %9030 = vmatpush1.msra.mxu1 %v10282_v12  ;;  %9093 = vmatprep.mubr.f32.mxu1 %v10327_v3 }
 0x679   :  { %10292 = vmatmul.mubr.msk.f32.vlgmr.msra.gmra.mrb[116].mxu0 %vm45_vm0, %v11667_v25  ;;  %10293 = vmatmul.mubr.msk.f32.vlgmr.msra.gmra.mrb[116].mxu1 %vm45_vm0, %v11667_v25 }
 0x67a   :  { %9100 = vmatprep.subr.mxu0 %v10285_v18  ;;  %9171 = vmatprep.subr.mxu1 %v10287_v51 }
 0x67b   :  { %9101 = vmatpush1.msra.mxu0 %v10284_v36  ;;  %9164 = vmatprep.mubr.f32.mxu0 %v10327_v3  ;;  %v12128_v36 = vmax.f32 %v11544_v19, %v11751_v37 }
 0x67c   :  { %9172 = vmatpush1.msra.mxu1 %v10286_v0  ;;  %9235 = vmatprep.mubr.f32.mxu1 %v10327_v3 }
 0x67d   :  { %10294 = vmatmul.mubr.msk.f32.vlgmr.msra.gmra.mrb[118].mxu0 %vm45_vm0, %v11667_v25  ;;  %10295 = vmatmul.mubr.msk.f32.vlgmr.msra.gmra.mrb[118].mxu1 %vm45_vm0, %v11667_v25 }
 0x67e   :  { %9370 = vmatprep.mubr.f32.mxu0 %v10327_v3  ;;  %9441 = vmatprep.mubr.f32.mxu1 %v10327_v3 }
 0x734   :  { %v8139_v41 = vpop.f32.mrb[104].mxu0  ;;  %v8210_v31 = vpop.f32.mrb[104].mxu1 }
 0x735   :  { %v8140_v50 = vadd.f32 %v8139_v41, %v10739_v63  ;;  %v8211_v26 = vadd.f32 %v8210_v31, %v10739_v63  ;;  %v8141_v40 = vpop.f32.mrb[105].mxu0  ;;  %v8212_v15 = vpop.f32.mrb[105].mxu1  ;;  %v12129_v41 = vmax.f32 %v11549_v14, %v11754_v44 }
 0x736   :  { %v8142_v23 = vadd.f32 %v8141_v40, %v10739_v63  ;;  %v8213_v46 = vadd.f32 %v8212_v15, %v10739_v63 }
 0x737   :  { %v11904_v25 = vmax.f32 %v7408_v27, %v8140_v50  ;;  %v11909_v24 = vmax.f32 %v7410_v34, %v8211_v26 }
 0x738   :  { %v11914_v59 = vmax.f32 %v7409_v9, %v8142_v23  ;;  %v11919_v53 = vmax.f32 %v7411_v17, %v8213_v46  ;;  %v8281_v61 = vpop.f32.mrb[106].mxu0  ;;  %v8352_v12 = vpop.f32.mrb[106].mxu1 }
 0x739   :  { %v8282_v48 = vadd.f32 %v8281_v61, %v10739_v63  ;;  %v8353_v10 = vadd.f32 %v8352_v12, %v10739_v63  ;;  %v8283_v27 = vpop.f32.mrb[107].mxu0  ;;  %v8354_v49 = vpop.f32.mrb[107].mxu1 }
 0x73a   :  { %v8284_v54 = vadd.f32 %v8283_v27, %v10739_v63  ;;  %v8355_v34 = vadd.f32 %v8354_v49, %v10739_v63 }
 0x73b   :  { %v11928_v29 = vmax.f32 %v7412_v45, %v8282_v48  ;;  %v11933_v58 = vmax.f32 %v7414_v2, %v8353_v10 }
 0x73c   :  { %v11938_v47 = vmax.f32 %v7413_v22, %v8284_v54  ;;  %v11943_v57 = vmax.f32 %v7415_v38, %v8355_v34  ;;  %v8423_v9 = vpop.f32.mrb[108].mxu0  ;;  %v8494_v17 = vpop.f32.mrb[108].mxu1  ;;  %v12125_v22 = vmax.f32 %v11525_v33, %v11734_v5  ;;  %v12127_v33 = vmax.f32 %v11539_v8, %v11748_v16 }
 0x73d   :  { %v8424_v42 = vadd.f32 %v8423_v9, %v10739_v63  ;;  %v8495_v56 = vadd.f32 %v8494_v17, %v10739_v63  ;;  %v8425_v45 = vpop.f32.mrb[109].mxu0  ;;  %v8496_v20 = vpop.f32.mrb[109].mxu1 }
 0x73e   :  { %v8426_v62 = vadd.f32 %v8425_v45, %v10739_v63  ;;  %v8497_v2 = vadd.f32 %v8496_v20, %v10739_v63 }
 0x73f   :  { %v11952_v43 = vmax.f32 %v7416_v13, %v8424_v42  ;;  %v11957_v30 = vmax.f32 %v7418_v60, %v8495_v56 }
 0x740   :  { %v11962_v32 = vmax.f32 %v12124_v39, %v8426_v62  ;;  %v11967_v38 = vmax.f32 %v12125_v22, %v8497_v2  ;;  %v8565_v18 = vpop.f32.mrb[110].mxu0  ;;  %v8636_v51 = vpop.f32.mrb[110].mxu1 }
 0x741   :  { %v8566_v11 = vadd.f32 %v8565_v18, %v10739_v63  ;;  %v8637_v6 = vadd.f32 %v8636_v51, %v10739_v63  ;;  %v8567_v13 = vpop.f32.mrb[111].mxu0  ;;  %v8638_v52 = vpop.f32.mrb[111].mxu1 }
 0x742   :  { %v8568_v4 = vadd.f32 %v8567_v13, %v10739_v63  ;;  %v8639_v60 = vadd.f32 %v8638_v52, %v10739_v63 }
 0x743   :  { %v11976_v7 = vmax.f32 %v12126_v55, %v8566_v11  ;;  %v11981_v5 = vmax.f32 %v12127_v33, %v8637_v6 }
 0x744   :  { %v11986_v0 = vmax.f32 %v12128_v36, %v8568_v4  ;;  %v11991_v31 = vmax.f32 %v12129_v41, %v8639_v60  ;;  %v8740_v50 = vpop.f32.mrb[112].mxu0  ;;  %v8811_v26 = vpop.f32.mrb[112].mxu1 }
 0x745   :  { %v8741_v1 = vadd.f32 %v8740_v50, %v10444_v21  ;;  %v8812_v28 = vadd.f32 %v8811_v26, %v10444_v21  ;;  %v8742_v40 = vpop.f32.mrb[113].mxu0  ;;  %v8813_v8 = vpop.f32.mrb[113].mxu1 }
 0x746   :  { %v8743_v16 = vadd.f32 %v8742_v40, %v10444_v21  ;;  %v8814_v15 = vadd.f32 %v8813_v8, %v10444_v21 }
 0x747   :  { %v9242_v61 = vmax.f32 %v8741_v1, 0.0  ;;  %v9244_v14 = vmax.f32 %v8812_v28, 0.0 }
 0x748   :  { %v9243_v19 = vmax.f32 %v8743_v16, 0.0  ;;  %v9245_v37 = vmax.f32 %v8814_v15, 0.0  ;;  %v8882_v23 = vpop.f32.mrb[114].mxu0  ;;  %v8953_v46 = vpop.f32.mrb[114].mxu1 }
 0x749   :  { %v8883_v44 = vadd.f32 %v8882_v23, %v10444_v21  ;;  %v8954_v12 = vadd.f32 %v8953_v46, %v10444_v21  ;;  %v8884_v48 = vpop.f32.mrb[115].mxu0  ;;  %v8955_v10 = vpop.f32.mrb[115].mxu1 }
 0x74a   :  { %v8885_v27 = vadd.f32 %v8884_v48, %v10444_v21  ;;  %v8956_v49 = vadd.f32 %v8955_v10, %v10444_v21  ;;  %10296 = vmatprep.subr.msk.mxu0 %vm642_vm1, %v9243_v19  ;;  %10299 = vmatprep.subr.msk.mxu1 %vm642_vm1, %v9245_v37 }
 0x74b   :  { %10297 = vmatpush1.msk.msra.mxu0 %vm642_vm1, %v9242_v61  ;;  %10300 = vmatpush1.msk.msra.mxu1 %vm642_vm1, %v9244_v14  ;;  %v9246_v42 = vmax.f32 %v8883_v44, 0.0  ;;  %v9248_v56 = vmax.f32 %v8954_v12, 0.0 }
 0x74c   :  { %v9247_v54 = vmax.f32 %v8885_v27, 0.0  ;;  %v9249_v34 = vmax.f32 %v8956_v49, 0.0  ;;  %v9024_v9 = vpop.f32.mrb[116].mxu0  ;;  %v9095_v17 = vpop.f32.mrb[116].mxu1  ;;  %10298 = vmatmul.mubr.msk.f32.vlgmr.msra.gmra.mrb[120].mxu0 %vm638_vm2, %v11779_v35  ;;  %10301 = vmatmul.mubr.msk.f32.vlgmr.msra.gmra.mrb[120].mxu1 %vm638_vm2, %v11779_v35 }
 0x74d   :  { %v9025_v45 = vadd.f32 %v9024_v9, %v10444_v21  ;;  %v9096_v20 = vadd.f32 %v9095_v17, %v10444_v21  ;;  %v9026_v62 = vpop.f32.mrb[117].mxu0  ;;  %v9097_v2 = vpop.f32.mrb[117].mxu1  ;;  %9512 = vmatprep.mubr.f32.mxu0 %v10327_v3  ;;  %9583 = vmatprep.mubr.f32.mxu1 %v10327_v3 }
 0x74e   :  { %v9027_v39 = vadd.f32 %v9026_v62, %v10444_v21  ;;  %v9098_v22 = vadd.f32 %v9097_v2, %v10444_v21  ;;  %10302 = vmatprep.subr.msk.mxu0 %vm642_vm1, %v9247_v54  ;;  %10305 = vmatprep.subr.msk.mxu1 %vm642_vm1, %v9249_v34 }
 0x74f   :  { %10303 = vmatpush1.msk.msra.mxu0 %vm642_vm1, %v9246_v42  ;;  %10306 = vmatpush1.msk.msra.mxu1 %vm642_vm1, %v9248_v56  ;;  %v9250_v13 = vmax.f32 %v9025_v45, 0.0  ;;  %v9252_v52 = vmax.f32 %v9096_v20, 0.0 }
 0x750   :  { %v9251_v18 = vmax.f32 %v9027_v39, 0.0  ;;  %v9253_v51 = vmax.f32 %v9098_v22, 0.0  ;;  %v9166_v11 = vpop.f32.mrb[118].mxu0  ;;  %v9237_v6 = vpop.f32.mrb[118].mxu1  ;;  %10304 = vmatmul.mubr.msk.f32.vlgmr.msra.gmra.mrb[122].mxu0 %vm638_vm2, %v11779_v35  ;;  %10307 = vmatmul.mubr.msk.f32.vlgmr.msra.gmra.mrb[122].mxu1 %vm638_vm2, %v11779_v35 }
 0x751   :  { %v9167_v4 = vadd.f32 %v9166_v11, %v10444_v21  ;;  %v9238_v60 = vadd.f32 %v9237_v6, %v10444_v21  ;;  %v9168_v55 = vpop.f32.mrb[119].mxu0  ;;  %v9239_v33 = vpop.f32.mrb[119].mxu1  ;;  %9654 = vmatprep.mubr.f32.mxu0 %v10327_v3  ;;  %9725 = vmatprep.mubr.f32.mxu1 %v10327_v3 }
 0x752   :  { %v9169_v36 = vadd.f32 %v9168_v55, %v10444_v21  ;;  %v9240_v41 = vadd.f32 %v9239_v33, %v10444_v21  ;;  %10308 = vmatprep.subr.msk.mxu0 %vm642_vm1, %v9251_v18  ;;  %10311 = vmatprep.subr.msk.mxu1 %vm642_vm1, %v9253_v51 }
 0x753   :  { %10309 = vmatpush1.msk.msra.mxu0 %vm642_vm1, %v9250_v13  ;;  %10312 = vmatpush1.msk.msra.mxu1 %vm642_vm1, %v9252_v52  ;;  %v9254_v1 = vmax.f32 %v9167_v4, 0.0  ;;  %v9256_v28 = vmax.f32 %v9238_v60, 0.0 }
 0x754   :  { %v9255_v50 = vmax.f32 %v9169_v36, 0.0  ;;  %v9257_v26 = vmax.f32 %v9240_v41, 0.0  ;;  %10310 = vmatmul.mubr.msk.f32.vlgmr.msra.gmra.mrb[124].mxu0 %vm638_vm2, %v11779_v35  ;;  %10313 = vmatmul.mubr.msk.f32.vlgmr.msra.gmra.mrb[124].mxu1 %vm638_vm2, %v11779_v35 }
 0x755   :  { %9796 = vmatprep.mubr.f32.mxu0 %v10327_v3  ;;  %9867 = vmatprep.mubr.f32.mxu1 %v10327_v3 }
 0x756   :  { %10314 = vmatprep.subr.msk.mxu0 %vm642_vm1, %v9255_v50  ;;  %10317 = vmatprep.subr.msk.mxu1 %vm642_vm1, %v9257_v26 }
 0x757   :  { %10315 = vmatpush1.msk.msra.mxu0 %vm642_vm1, %v9254_v1  ;;  %10318 = vmatpush1.msk.msra.mxu1 %vm642_vm1, %v9256_v28 }
 0x758   :  { %10316 = vmatmul.mubr.msk.f32.vlgmr.msra.gmra.mrb[126].mxu0 %vm638_vm2, %v11779_v35  ;;  %10319 = vmatmul.mubr.msk.f32.vlgmr.msra.gmra.mrb[126].mxu1 %vm638_vm2, %v11779_v35 }
 0x81f   :  { %v9372_v21 = vpop.f32.mrb[120].mxu0  ;;  %v9443_v40 = vpop.f32.mrb[120].mxu1 }
 0x820   :  { %v9373_v8 = vadd.f32 %v9372_v21, %v10739_v63  ;;  %v9444_v3 = vadd.f32 %v9443_v40, %v10739_v63  ;;  %v9374_v16 = vpop.f32.mrb[121].mxu0  ;;  %v9445_v15 = vpop.f32.mrb[121].mxu1 }
 0x821   :  { %v9375_v19 = vadd.f32 %v9374_v16, %v10739_v63  ;;  %v9446_v37 = vadd.f32 %v9445_v15, %v10739_v63 }
 0x822   :  { %v9874_v23 = vmax.f32 %v11904_v25, %v9373_v8  ;;  %v9876_v46 = vmax.f32 %v11909_v24, %v9444_v3 }
 0x823   :  { %v9875_v61 = vmax.f32 %v11914_v59, %v9375_v19  ;;  %v9877_v35 = vmax.f32 %v11919_v53, %v9446_v37  ;;  %v9514_v14 = vpop.f32.mrb[122].mxu0  ;;  %v9585_v44 = vpop.f32.mrb[122].mxu1 }
 0x824   :  { %v9890_v12 = vmax.f32 %v9874_v23, 0.0  ;;  %v9892_v48 = vmax.f32 %v9876_v46, 0.0  ;;  %v9515_v10 = vadd.f32 %v9514_v14, %v10739_v63  ;;  %v9586_v27 = vadd.f32 %v9585_v44, %v10739_v63  ;;  %v9516_v49 = vpop.f32.mrb[123].mxu0  ;;  %v9587_v54 = vpop.f32.mrb[123].mxu1 }
 0x825   :  { %v9891_v34 = vmax.f32 %v9875_v61, 0.0  ;;  %v9893_v9 = vmax.f32 %v9877_v35, 0.0  ;;  %v9517_v25 = vadd.f32 %v9516_v49, %v10739_v63  ;;  %v9588_v24 = vadd.f32 %v9587_v54, %v10739_v63 }
 0x826   :  { %v9878_v59 = vmax.f32 %v11928_v29, %v9515_v10  ;;  %v9880_v53 = vmax.f32 %v11933_v58, %v9586_v27 }
 0x827   :  { %v9922_v17 = vcombine.low %v9890_v12, %v9891_v34  ;;  %v9923_v42 = vcombine.low %v9892_v48, %v9893_v9  ;;  %v9879_v56 = vmax.f32 %v11938_v47, %v9517_v25  ;;  %v9881_v45 = vmax.f32 %v11943_v57, %v9588_v24  ;;  %v9656_v20 = vpop.f32.mrb[124].mxu0  ;;  %v9727_v62 = vpop.f32.mrb[124].mxu1 }
 0x828   :  { %v9894_v2 = vmax.f32 %v9878_v59, 0.0  ;;  %v9896_v39 = vmax.f32 %v9880_v53, 0.0  ;;  %v9657_v22 = vadd.f32 %v9656_v20, %v10739_v63  ;;  %v9728_v18 = vadd.f32 %v9727_v62, %v10739_v63  ;;  %v9658_v51 = vpop.f32.mrb[125].mxu0  ;;  %v9729_v11 = vpop.f32.mrb[125].mxu1 }
 0x829   :  { %9938 = vst [vmem:[%s12109_s5] sm:$0xff] %v9922_v17  ;;  %9939 = vst [vmem:[%s12109_s5 + $0x8] sm:$0xff] %v9923_v42  ;;  %v9895_v29 = vmax.f32 %v9879_v56, 0.0  ;;  %v9897_v58 = vmax.f32 %v9881_v45, 0.0  ;;  %v9659_v47 = vadd.f32 %v9658_v51, %v10739_v63  ;;  %v9730_v57 = vadd.f32 %v9729_v11, %v10739_v63 }
 0x82a   :  { %v9882_v6 = vmax.f32 %v11952_v43, %v9657_v22  ;;  %v9884_v13 = vmax.f32 %v11957_v30, %v9728_v18 }
 0x82b   :  { %v9924_v52 = vcombine.low %v9894_v2, %v9895_v29  ;;  %v9925_v4 = vcombine.low %v9896_v39, %v9897_v58  ;;  %v9883_v60 = vmax.f32 %v11962_v32, %v9659_v47  ;;  %v9885_v55 = vmax.f32 %v11967_v38, %v9730_v57  ;;  %v9798_v33 = vpop.f32.mrb[126].mxu0  ;;  %v9869_v36 = vpop.f32.mrb[126].mxu1 }
 0x82c   :  { %v9898_v41 = vmax.f32 %v9882_v6, 0.0  ;;  %v9900_v50 = vmax.f32 %v9884_v13, 0.0  ;;  %v9799_v26 = vadd.f32 %v9798_v33, %v10739_v63  ;;  %v9870_v1 = vadd.f32 %v9869_v36, %v10739_v63  ;;  %v9800_v28 = vpop.f32.mrb[127].mxu0  ;;  %v9871_v21 = vpop.f32.mrb[127].mxu1 }
 0x82d   :  { %9940 = vst [vmem:[%s12109_s5 + $0x10] sm:$0xff] %v9924_v52  ;;  %9941 = vst [vmem:[%s12109_s5 + $0x18] sm:$0xff] %v9925_v4  ;;  %v9899_v43 = vmax.f32 %v9883_v60, 0.0  ;;  %v9901_v30 = vmax.f32 %v9885_v55, 0.0  ;;  %v9801_v32 = vadd.f32 %v9800_v28, %v10739_v63  ;;  %v9872_v38 = vadd.f32 %v9871_v21, %v10739_v63 }
 0x82e   :  { %v9886_v40 = vmax.f32 %v11976_v7, %v9799_v26  ;;  %v9888_v8 = vmax.f32 %v11981_v5, %v9870_v1 }
 0x82f   :  { %v9926_v3 = vcombine.low %v9898_v41, %v9899_v43  ;;  %v9927_v16 = vcombine.low %v9900_v50, %v9901_v30  ;;  %v9887_v15 = vmax.f32 %v11986_v0, %v9801_v32  ;;  %v9889_v19 = vmax.f32 %v11991_v31, %v9872_v38 }
 0x830   :  { %v9902_v37 = vmax.f32 %v9886_v40, 0.0  ;;  %v9904_v23 = vmax.f32 %v9888_v8, 0.0 }
 0x831   :  { %9942 = vst [vmem:[%s12109_s5 + $0x20] sm:$0xff] %v9926_v3  ;;  %9943 = vst [vmem:[%s12109_s5 + $0x28] sm:$0xff] %v9927_v16  ;;  %v9903_v63 = vmax.f32 %v9887_v15, 0.0  ;;  %v9905_v7 = vmax.f32 %v9889_v19, 0.0 }
 0x833   :  { %v9928_v5 = vcombine.low %v9902_v37, %v9903_v63  ;;  %v9929_v46 = vcombine.low %v9904_v23, %v9905_v7 }
 0x835   :  { %9944 = vst [vmem:[%s12109_s5 + $0x30] sm:$0xff] %v9928_v5  ;;  %9947 = vst.msk [vmem:[%s12109_s5 + $0x38] sm:$0xff] %vm9946_vm4, %v9929_v46 }

// kernel: forward.4
= control target key start
LH: loop header
LB: loop body
LE: loop exit
PB: predicated region body
PF: predicated region fallthrough
CT: control target
= control target key end

     0   :  { %v1406_v0 = vmov 0.0|0.0   ;;  %vm1407_vm0 = vmmov 0   ;;  %v1408_v8 = vmov 0.0   ;;  %v1409_v12 = vmov 0   ;;  %s1886_s0 = inlined_call_operand.vmem [shape: f32[8,108,128], index: 0, kind: input, shape index: {}]   ;;  %s1887_s1 = inlined_call_operand.vmem [shape: f32[4,108], index: 1, kind: input, shape index: {}]   ;;  %s1888_s2 = inlined_call_operand.vmem [shape: f32[4,1], index: 2, kind: input, shape index: {}]   ;;  %s1889_s3 = inlined_call_operand.vmem [shape: f32[4,128], index: 3, kind: output, shape index: {}]  }
   0x1   :  { %1224 = vmatprep.subr.bf16.mxu0 %v1406_v0  ;;  %1246 = vmatprep.subr.bf16.mxu1 %v1406_v0  ;;  %v16_v1 = vld [vmem:[%s1886_s0] sm:$0xff]  ;;  %v17_v2 = vld [vmem:[%s1886_s0 + $0x8] sm:$0xff]  ;;  %v744_v3 = vld [vmem:[%s1886_s0 + $0x70] sm:$0xff]  ;;  %vm39_vm1 = vcmask 1043456   ;;  %vm1410_vm2 = vmmov 1   ;;  %vm35_vm4 = vcmask 883712  }
   0x2   :  { %v1225_v4 = vpack.c.bf16 %v17_v2, %v16_v1  ;;  %v745_v5 = vld [vmem:[%s1886_s0 + $0x78] sm:$0xff]  ;;  %v18_v6 = vld [vmem:[%s1886_s0 + $0x10] sm:$0xff]  ;;  %1004 = vmatprep.mubr.msk.f32.mxu0 %vm1407_vm0, %v1408_v8  ;;  %1035 = vmatprep.mubr.msk.f32.mxu1 %vm1407_vm0, %v1408_v8  ;;  %v746_v10 = vld [vmem:[%s1886_s0 + $0x80] sm:$0xff] }
   0x3   :  { %v19_v7 = vld [vmem:[%s1886_s0 + $0x18] sm:$0xff]  ;;  %v1247_v9 = vpack.c.bf16 %v745_v5, %v744_v3  ;;  %v747_v11 = vld [vmem:[%s1886_s0 + $0x88] sm:$0xff]  ;;  %1405 = vset.pattern.permute.xlu0 %v1409_v12  ;;  %v20_v15 = vld [vmem:[%s1886_s0 + $0x20] sm:$0xff] }
   0x4   :  { %1226 = vmatpush3.bf16.msra.mxu0 %v1225_v4  ;;  %v1228_v13 = vpack.c.bf16 %v19_v7, %v18_v6  ;;  %v1250_v14 = vpack.c.bf16 %v747_v11, %v746_v10  ;;  %v21_v16 = vld [vmem:[%s1886_s0 + $0x28] sm:$0xff]  ;;  %v748_v17 = vld [vmem:[%s1886_s0 + $0x90] sm:$0xff]  ;;  %v749_v18 = vld [vmem:[%s1886_s0 + $0x98] sm:$0xff] }
   0x5   :  { %1248 = vmatpush3.bf16.msra.mxu1 %v1247_v9  ;;  %1227 = vmatprep.subr.bf16.mxu0 %v1406_v0  ;;  %v1231_v19 = vpack.c.bf16 %v21_v16, %v20_v15  ;;  %v1253_v20 = vpack.c.bf16 %v749_v18, %v748_v17  ;;  %v22_v21 = vld [vmem:[%s1886_s0 + $0x30] sm:$0xff]  ;;  %v23_v22 = vld [vmem:[%s1886_s0 + $0x38] sm:$0xff]  ;;  %v750_v23 = vld [vmem:[%s1886_s0 + $0xa0] sm:$0xff] }
   0x6   :  { %1249 = vmatprep.subr.bf16.mxu1 %v1406_v0  ;;  %v751_v24 = vld [vmem:[%s1886_s0 + $0xa8] sm:$0xff]  ;;  %v1234_v25 = vpack.c.bf16 %v23_v22, %v22_v21  ;;  %v24_v27 = vld [vmem:[%s1886_s0 + $0x40] sm:$0xff]  ;;  %v752_v29 = vld [vmem:[%s1886_s0 + $0xb0] sm:$0xff] }
   0x7   :  { %v1256_v26 = vpack.c.bf16 %v751_v24, %v750_v23  ;;  %v25_v28 = vld [vmem:[%s1886_s0 + $0x48] sm:$0xff]  ;;  %v753_v30 = vld [vmem:[%s1886_s0 + $0xb8] sm:$0xff]  ;;  %v26_v33 = vld [vmem:[%s1886_s0 + $0x50] sm:$0xff] }
   0x8   :  { %1229 = vmatpush3.bf16.msra.mxu0 %v1228_v13  ;;  %v1237_v31 = vpack.c.bf16 %v25_v28, %v24_v27  ;;  %v1259_v32 = vpack.c.bf16 %v753_v30, %v752_v29  ;;  %v27_v34 = vld [vmem:[%s1886_s0 + $0x58] sm:$0xff]  ;;  %v754_v35 = vld [vmem:[%s1886_s0 + $0xc0] sm:$0xff]  ;;  %v755_v36 = vld [vmem:[%s1886_s0 + $0xc8] sm:$0xff] }
   0x9   :  { %1251 = vmatpush3.bf16.msra.mxu1 %v1250_v14  ;;  %1230 = vmatprep.subr.bf16.mxu0 %v1406_v0  ;;  %v1240_v37 = vpack.c.bf16 %v27_v34, %v26_v33  ;;  %v1262_v38 = vpack.c.bf16 %v755_v36, %v754_v35  ;;  %v28_v39 = vld [vmem:[%s1886_s0 + $0x60] sm:$0xff]  ;;  %v29_v40 = vld [vmem:[%s1886_s0 + $0x68] sm:$0xf]  ;;  %v756_v41 = vld [vmem:[%s1886_s0 + $0xd0] sm:$0xff] }
   0xa   :  { %1252 = vmatprep.subr.bf16.mxu1 %v1406_v0  ;;  %v757_v42 = vld [vmem:[%s1886_s0 + $0xd8] sm:$0xf]  ;;  %v1243_v43 = vpack.c.bf16 %v29_v40, %v28_v39  ;;  %vm1532_vm3 = vmpackc.low %vm39_vm1, %vm1410_vm2  ;;  %v760_v46 = vld [vmem:[%s1886_s0 + $0xe0] sm:$0xff] }
   0xb   :  { %v1265_v45 = vpack.c.bf16 %v757_v42, %v756_v41  ;;  %v761_v47 = vld [vmem:[%s1886_s0 + $0xe8] sm:$0xff]  ;;  %v776_v48 = vld [vmem:[%s1886_s0 + $0x150] sm:$0xff]  ;;  %v777_v49 = vld [vmem:[%s1886_s0 + $0x158] sm:$0xff] }
   0xc   :  { %1232 = vmatpush3.bf16.msra.mxu0 %v1231_v19  ;;  %v1554_v50 = vld [vmem:[%s1887_s1] sm:$0xf]  ;;  %v1269_v51 = vpack.c.bf16 %v761_v47, %v760_v46  ;;  %v1291_v52 = vpack.c.bf16 %v777_v49, %v776_v48  ;;  %v762_v53 = vld [vmem:[%s1886_s0 + $0xf0] sm:$0xff]  ;;  %v763_v54 = vld [vmem:[%s1886_s0 + $0xf8] sm:$0xff] }
   0xd   :  { %1254 = vmatpush3.bf16.msra.mxu1 %v1253_v20  ;;  %1233 = vmatprep.subr.bf16.mxu0 %v1406_v0  ;;  %v778_v55 = vld [vmem:[%s1886_s0 + $0x160] sm:$0xff]  ;;  %v779_v56 = vld [vmem:[%s1886_s0 + $0x168] sm:$0xff]  ;;  %v1272_v57 = vpack.c.bf16 %v763_v54, %v762_v53  ;;  %v780_v61 = vld [vmem:[%s1886_s0 + $0x170] sm:$0xff] }
   0xe   :  { %1255 = vmatprep.subr.bf16.mxu1 %v1406_v0  ;;  %v1294_v58 = vpack.c.bf16 %v779_v56, %v778_v55  ;;  %v764_v59 = vld [vmem:[%s1886_s0 + $0x100] sm:$0xff]  ;;  %v765_v60 = vld [vmem:[%s1886_s0 + $0x108] sm:$0xff]  ;;  %v781_v62 = vld [vmem:[%s1886_s0 + $0x178] sm:$0xff] }
   0xf   :  { %v1275_v63 = vpack.c.bf16 %v765_v60, %v764_v59  ;;  %v1297_v1 = vpack.c.bf16 %v781_v62, %v780_v61  ;;  %v766_v2 = vld [vmem:[%s1886_s0 + $0x110] sm:$0xff]  ;;  %v767_v3 = vld [vmem:[%s1886_s0 + $0x118] sm:$0xff]  ;;  %v782_v4 = vld [vmem:[%s1886_s0 + $0x180] sm:$0xff] }
  0x10   :  { %1235 = vmatpush3.bf16.msra.mxu0 %v1234_v25  ;;  %v783_v5 = vld [vmem:[%s1886_s0 + $0x188] sm:$0xff]  ;;  %v15_v6 = vld [vmem:[%s1888_s2] sm:$0xf]  ;;  %v1278_v7 = vpack.c.bf16 %v767_v3, %v766_v2  ;;  %v784_v12 = vld [vmem:[%s1886_s0 + $0x190] sm:$0xff] }
  0x11   :  { %1257 = vmatpush3.bf16.msra.mxu1 %v1256_v26  ;;  %1236 = vmatprep.subr.bf16.mxu0 %v1406_v0  ;;  %v1300_v9 = vpack.c.bf16 %v783_v5, %v782_v4  ;;  %v768_v10 = vld [vmem:[%s1886_s0 + $0x120] sm:$0xff]  ;;  %v769_v11 = vld [vmem:[%s1886_s0 + $0x128] sm:$0xff]  ;;  %v785_v13 = vld [vmem:[%s1886_s0 + $0x198] sm:$0xff] }
  0x12   :  { %1258 = vmatprep.subr.bf16.mxu1 %v1406_v0  ;;  %32 = vperm.xlu0 %1405, %v15_v6   ;;  %v1281_v14 = vpack.c.bf16 %v769_v11, %v768_v10  ;;  %v1303_v15 = vpack.c.bf16 %v785_v13, %v784_v12  ;;  %v770_v16 = vld [vmem:[%s1886_s0 + $0x130] sm:$0xff]  ;;  %v771_v17 = vld [vmem:[%s1886_s0 + $0x138] sm:$0xff]  ;;  %v786_v18 = vld [vmem:[%s1886_s0 + $0x1a0] sm:$0xff] }
  0x13   :  { %v787_v19 = vld [vmem:[%s1886_s0 + $0x1a8] sm:$0xff]  ;;  %v1284_v20 = vpack.c.bf16 %v771_v17, %v770_v16  ;;  %v772_v22 = vld [vmem:[%s1886_s0 + $0x140] sm:$0xff]  ;;  %v788_v24 = vld [vmem:[%s1886_s0 + $0x1b0] sm:$0xff] }
  0x14   :  { %1238 = vmatpush3.bf16.msra.mxu0 %v1237_v31  ;;  %v1306_v21 = vpack.c.bf16 %v787_v19, %v786_v18  ;;  %v773_v23 = vld [vmem:[%s1886_s0 + $0x148] sm:$0xf]  ;;  %v789_v25 = vld [vmem:[%s1886_s0 + $0x1b8] sm:$0xf]  ;;  %v792_v28 = vld [vmem:[%s1886_s0 + $0x1c0] sm:$0xff] }
  0x15   :  { %1260 = vmatpush3.bf16.msra.mxu1 %v1259_v32  ;;  %1239 = vmatprep.subr.bf16.mxu0 %v1406_v0  ;;  %v1287_v26 = vpack.c.bf16 %v773_v23, %v772_v22  ;;  %v1309_v27 = vpack.c.bf16 %v789_v25, %v788_v24  ;;  %v793_v29 = vld [vmem:[%s1886_s0 + $0x1c8] sm:$0xff]  ;;  %v808_v30 = vld [vmem:[%s1886_s0 + $0x230] sm:$0xff]  ;;  %v809_v31 = vld [vmem:[%s1886_s0 + $0x238] sm:$0xff] }
  0x16   :  { %1261 = vmatprep.subr.bf16.mxu1 %v1406_v0  ;;  %v1313_v32 = vpack.c.bf16 %v793_v29, %v792_v28  ;;  %v1335_v33 = vpack.c.bf16 %v809_v31, %v808_v30  ;;  %v794_v34 = vld [vmem:[%s1886_s0 + $0x1d0] sm:$0xff]  ;;  %v795_v35 = vld [vmem:[%s1886_s0 + $0x1d8] sm:$0xff]  ;;  %v810_v36 = vld [vmem:[%s1886_s0 + $0x240] sm:$0xff] }
  0x17   :  { %v796_v40 = vld [vmem:[%s1886_s0 + $0x1e0] sm:$0xff]  ;;  %v797_v41 = vld [vmem:[%s1886_s0 + $0x1e8] sm:$0xff]  ;;  %v812_v42 = vld [vmem:[%s1886_s0 + $0x250] sm:$0xff] }
  0x18   :  { %1241 = vmatpush3.bf16.msra.mxu0 %v1240_v37  ;;  %v811_v37 = vld [vmem:[%s1886_s0 + $0x248] sm:$0xff]  ;;  %v798_v47 = vld [vmem:[%s1886_s0 + $0x1f0] sm:$0xff]  ;;  %v799_v48 = vld [vmem:[%s1886_s0 + $0x1f8] sm:$0xff] }
  0x19   :  { %1263 = vmatpush3.bf16.msra.mxu1 %v1262_v38  ;;  %1242 = vmatprep.subr.bf16.mxu0 %v1406_v0  ;;  %v1316_v38 = vpack.c.bf16 %v795_v35, %v794_v34  ;;  %v1338_v39 = vpack.c.bf16 %v811_v37, %v810_v36  ;;  %v814_v49 = vld [vmem:[%s1886_s0 + $0x260] sm:$0xff]  ;;  %v801_v55 = vld [vmem:[%s1886_s0 + $0x208] sm:$0xff]  ;;  %v816_v56 = vld [vmem:[%s1886_s0 + $0x270] sm:$0xff] }
  0x1a   :  { %1264 = vmatprep.subr.bf16.mxu1 %v1406_v0  ;;  %v800_v54 = vld [vmem:[%s1886_s0 + $0x200] sm:$0xff]  ;;  %v802_v60 = vld [vmem:[%s1886_s0 + $0x210] sm:$0xff]  ;;  %v803_v61 = vld [vmem:[%s1886_s0 + $0x218] sm:$0xff] }
  0x1b   :  { %v818_v62 = vld [vmem:[%s1886_s0 + $0x280] sm:$0xff]  ;;  %v805_v4 = vld [vmem:[%s1886_s0 + $0x228] sm:$0xf]  ;;  %v820_v5 = vld [vmem:[%s1886_s0 + $0x290] sm:$0xff] }
  0x1c   :  { %1245 = vmatpush3.bf16.msk.msra.mxu0 %vm1532_vm3, %v1243_v43  ;;  %v813_v43 = vld [vmem:[%s1886_s0 + $0x258] sm:$0xff]  ;;  %v804_v3 = vld [vmem:[%s1886_s0 + $0x220] sm:$0xff]  ;;  %v825_v11 = vld [vmem:[%s1886_s0 + $0x2a8] sm:$0xff] }
  0x1d   :  { %1267 = vmatpush3.bf16.msk.msra.mxu1 %vm1532_vm3, %v1265_v45  ;;  %1268 = vmatprep.subr.bf16.mxu0 %v1406_v0  ;;  %v1319_v45 = vpack.c.bf16 %v797_v41, %v796_v40  ;;  %v1341_v46 = vpack.c.bf16 %v813_v43, %v812_v42  ;;  %v821_v6 = vld [vmem:[%s1886_s0 + $0x298] sm:$0xf]  ;;  %v824_v10 = vld [vmem:[%s1886_s0 + $0x2a0] sm:$0xff]  ;;  %v840_v12 = vld [vmem:[%s1886_s0 + $0x310] sm:$0xff] }
  0x1e   :  { %1290 = vmatprep.subr.bf16.mxu1 %v1406_v0  ;;  %v841_v13 = vld [vmem:[%s1886_s0 + $0x318] sm:$0xff]  ;;  %v826_v16 = vld [vmem:[%s1886_s0 + $0x2b0] sm:$0xff]  ;;  %v842_v18 = vld [vmem:[%s1886_s0 + $0x320] sm:$0xff] }
  0x1f   :  { %1005 = vmatmul.mubr.msk.f32.vlgmr.msra.gmra.mrb[0].mxu0 %vm35_vm4, %v1554_v50  ;;  %v827_v17 = vld [vmem:[%s1886_s0 + $0x2b8] sm:$0xff]  ;;  %v843_v19 = vld [vmem:[%s1886_s0 + $0x328] sm:$0xff]  ;;  %v828_v22 = vld [vmem:[%s1886_s0 + $0x2c0] sm:$0xff] }
  0x20   :  { %1036 = vmatmul.mubr.msk.f32.vlgmr.msra.gmra.mrb[0].mxu1 %vm35_vm4, %v1554_v50  ;;  %1270 = vmatpush3.bf16.msra.mxu0 %v1269_v51  ;;  %v815_v51 = vld [vmem:[%s1886_s0 + $0x268] sm:$0xff]  ;;  %v844_v24 = vld [vmem:[%s1886_s0 + $0x330] sm:$0xff]  ;;  %v845_v25 = vld [vmem:[%s1886_s0 + $0x338] sm:$0xff] }
  0x21   :  { %1292 = vmatpush3.bf16.msra.mxu1 %v1291_v52  ;;  %1271 = vmatprep.subr.bf16.mxu0 %v1406_v0  ;;  %v1322_v52 = vpack.c.bf16 %v799_v48, %v798_v47  ;;  %v1344_v53 = vpack.c.bf16 %v815_v51, %v814_v49  ;;  %v829_v23 = vld [vmem:[%s1886_s0 + $0x2c8] sm:$0xff]  ;;  %v830_v28 = vld [vmem:[%s1886_s0 + $0x2d0] sm:$0xff]  ;;  %v831_v29 = vld [vmem:[%s1886_s0 + $0x2d8] sm:$0xff] }
  0x22   :  { %1293 = vmatprep.subr.bf16.mxu1 %v1406_v0  ;;  %1066 = vmatprep.mubr.msk.f32.mxu0 %vm1407_vm0, %v1408_v8  ;;  %v847_v30 = vld [vmem:[%s1886_s0 + $0x348] sm:$0xff]  ;;  %v1366_v31 = vpack.c.bf16 %v831_v29, %v830_v28  ;;  %v848_v35 = vld [vmem:[%s1886_s0 + $0x350] sm:$0xff]  ;;  %v849_v36 = vld [vmem:[%s1886_s0 + $0x358] sm:$0xff] }
  0x23   :  { %1097 = vmatprep.mubr.msk.f32.mxu1 %vm1407_vm0, %v1408_v8  ;;  %v833_v34 = vld [vmem:[%s1886_s0 + $0x2e8] sm:$0xff]  ;;  %v835_v40 = vld [vmem:[%s1886_s0 + $0x2f8] sm:$0xff]  ;;  %v850_v41 = vld [vmem:[%s1886_s0 + $0x360] sm:$0xff] }
  0x24   :  { %1273 = vmatpush3.bf16.msra.mxu0 %v1272_v57  ;;  %v817_v57 = vld [vmem:[%s1886_s0 + $0x278] sm:$0xff]  ;;  %v851_v42 = vld [vmem:[%s1886_s0 + $0x368] sm:$0xff]  ;;  %v852_v48 = vld [vmem:[%s1886_s0 + $0x370] sm:$0xff] }
  0x25   :  { %1295 = vmatpush3.bf16.msra.mxu1 %v1294_v58  ;;  %1274 = vmatprep.subr.bf16.mxu0 %v1406_v0  ;;  %v1325_v58 = vpack.c.bf16 %v801_v55, %v800_v54  ;;  %v1347_v59 = vpack.c.bf16 %v817_v57, %v816_v56  ;;  %v837_v47 = vld [vmem:[%s1886_s0 + $0x308] sm:$0xf]  ;;  %v853_v49 = vld [vmem:[%s1886_s0 + $0x378] sm:$0xf] }
  0x26   :  { %1296 = vmatprep.subr.bf16.mxu1 %v1406_v0 }
  0x28   :  { %1276 = vmatpush3.bf16.msra.mxu0 %v1275_v63  ;;  %v819_v63 = vld [vmem:[%s1886_s0 + $0x288] sm:$0xff] }
  0x29   :  { %1298 = vmatpush3.bf16.msra.mxu1 %v1297_v1  ;;  %1277 = vmatprep.subr.bf16.mxu0 %v1406_v0  ;;  %v1328_v1 = vpack.c.bf16 %v803_v61, %v802_v60  ;;  %v1350_v2 = vpack.c.bf16 %v819_v63, %v818_v62 }
  0x2a   :  { %1299 = vmatprep.subr.bf16.mxu1 %v1406_v0 }
  0x2c   :  { %1279 = vmatpush3.bf16.msra.mxu0 %v1278_v7  ;;  %v1331_v7 = vpack.c.bf16 %v805_v4, %v804_v3 }
  0x2d   :  { %1301 = vmatpush3.bf16.msra.mxu1 %v1300_v9  ;;  %1280 = vmatprep.subr.bf16.mxu0 %v1406_v0  ;;  %v1353_v9 = vpack.c.bf16 %v821_v6, %v820_v5 }
  0x2e   :  { %1302 = vmatprep.subr.bf16.mxu1 %v1406_v0 }
  0x30   :  { %1282 = vmatpush3.bf16.msra.mxu0 %v1281_v14  ;;  %v1357_v14 = vpack.c.bf16 %v825_v11, %v824_v10 }
  0x31   :  { %1304 = vmatpush3.bf16.msra.mxu1 %v1303_v15  ;;  %1283 = vmatprep.subr.bf16.mxu0 %v1406_v0  ;;  %v1379_v15 = vpack.c.bf16 %v841_v13, %v840_v12 }
  0x32   :  { %1305 = vmatprep.subr.bf16.mxu1 %v1406_v0 }
  0x34   :  { %1285 = vmatpush3.bf16.msra.mxu0 %v1284_v20  ;;  %v1360_v20 = vpack.c.bf16 %v827_v17, %v826_v16 }
  0x35   :  { %1307 = vmatpush3.bf16.msra.mxu1 %v1306_v21  ;;  %1286 = vmatprep.subr.bf16.mxu0 %v1406_v0  ;;  %v1382_v21 = vpack.c.bf16 %v843_v19, %v842_v18 }
  0x36   :  { %1308 = vmatprep.subr.bf16.mxu1 %v1406_v0 }
  0x38   :  { %1289 = vmatpush3.bf16.msk.msra.mxu0 %vm1532_vm3, %v1287_v26  ;;  %v1363_v26 = vpack.c.bf16 %v829_v23, %v828_v22 }
  0x39   :  { %1311 = vmatpush3.bf16.msk.msra.mxu1 %vm1532_vm3, %v1309_v27  ;;  %1312 = vmatprep.subr.bf16.mxu0 %v1406_v0  ;;  %v1385_v27 = vpack.c.bf16 %v845_v25, %v844_v24 }
  0x3a   :  { %1334 = vmatprep.subr.bf16.mxu1 %v1406_v0 }
  0x3b   :  { %1067 = vmatmul.mubr.msk.f32.vlgmr.msra.gmra.mrb[2].mxu0 %vm35_vm4, %v1554_v50 }
  0x3c   :  { %1098 = vmatmul.mubr.msk.f32.vlgmr.msra.gmra.mrb[2].mxu1 %vm35_vm4, %v1554_v50  ;;  %1314 = vmatpush3.bf16.msra.mxu0 %v1313_v32 }
  0x3d   :  { %1336 = vmatpush3.bf16.msra.mxu1 %v1335_v33  ;;  %1315 = vmatprep.subr.bf16.mxu0 %v1406_v0  ;;  %v832_v33 = vld [vmem:[%s1886_s0 + $0x2e0] sm:$0xff] }
  0x3e   :  { %1337 = vmatprep.subr.bf16.mxu1 %v1406_v0  ;;  %1128 = vmatprep.mubr.msk.f32.mxu0 %vm1407_vm0, %v1408_v8  ;;  %v1369_v37 = vpack.c.bf16 %v833_v34, %v832_v33 }
  0x3f   :  { %1159 = vmatprep.mubr.msk.f32.mxu1 %vm1407_vm0, %v1408_v8 }
  0x40   :  { %1317 = vmatpush3.bf16.msra.mxu0 %v1316_v38  ;;  %v1391_v38 = vpack.c.bf16 %v849_v36, %v848_v35 }
  0x41   :  { %1339 = vmatpush3.bf16.msra.mxu1 %v1338_v39  ;;  %1318 = vmatprep.subr.bf16.mxu0 %v1406_v0  ;;  %v834_v39 = vld [vmem:[%s1886_s0 + $0x2f0] sm:$0xff] }
  0x42   :  { %1340 = vmatprep.subr.bf16.mxu1 %v1406_v0  ;;  %v1372_v43 = vpack.c.bf16 %v835_v40, %v834_v39 }
  0x44   :  { %1320 = vmatpush3.bf16.msra.mxu0 %v1319_v45  ;;  %v1394_v45 = vpack.c.bf16 %v851_v42, %v850_v41 }
  0x45   :  { %1342 = vmatpush3.bf16.msra.mxu1 %v1341_v46  ;;  %1321 = vmatprep.subr.bf16.mxu0 %v1406_v0  ;;  %v836_v46 = vld [vmem:[%s1886_s0 + $0x300] sm:$0xff] }
  0x46   :  { %1343 = vmatprep.subr.bf16.mxu1 %v1406_v0  ;;  %v1375_v51 = vpack.c.bf16 %v837_v47, %v836_v46 }
  0x48   :  { %1323 = vmatpush3.bf16.msra.mxu0 %v1322_v52  ;;  %v1397_v52 = vpack.c.bf16 %v853_v49, %v852_v48 }
  0x49   :  { %1345 = vmatpush3.bf16.msra.mxu1 %v1344_v53  ;;  %1324 = vmatprep.subr.bf16.mxu0 %v1406_v0 }
  0x4a   :  { %1346 = vmatprep.subr.bf16.mxu1 %v1406_v0 }
  0x4c   :  { %1326 = vmatpush3.bf16.msra.mxu0 %v1325_v58 }
  0x4d   :  { %1348 = vmatpush3.bf16.msra.mxu1 %v1347_v59  ;;  %1327 = vmatprep.subr.bf16.mxu0 %v1406_v0 }
  0x4e   :  { %1349 = vmatprep.subr.bf16.mxu1 %v1406_v0 }
  0x50   :  { %1329 = vmatpush3.bf16.msra.mxu0 %v1328_v1 }
  0x51   :  { %1351 = vmatpush3.bf16.msra.mxu1 %v1350_v2  ;;  %1330 = vmatprep.subr.bf16.mxu0 %v1406_v0 }
  0x52   :  { %1352 = vmatprep.subr.bf16.mxu1 %v1406_v0 }
  0x54   :  { %1333 = vmatpush3.bf16.msk.msra.mxu0 %vm1532_vm3, %v1331_v7 }
  0x55   :  { %1355 = vmatpush3.bf16.msk.msra.mxu1 %vm1532_vm3, %v1353_v9  ;;  %1356 = vmatprep.subr.bf16.mxu0 %v1406_v0 }
  0x56   :  { %1378 = vmatprep.subr.bf16.mxu1 %v1406_v0 }
  0x57   :  { %1129 = vmatmul.mubr.msk.f32.vlgmr.msra.gmra.mrb[4].mxu0 %vm35_vm4, %v1554_v50 }
  0x58   :  { %1160 = vmatmul.mubr.msk.f32.vlgmr.msra.gmra.mrb[4].mxu1 %vm35_vm4, %v1554_v50  ;;  %1358 = vmatpush3.bf16.msra.mxu0 %v1357_v14 }
  0x59   :  { %1380 = vmatpush3.bf16.msra.mxu1 %v1379_v15  ;;  %1359 = vmatprep.subr.bf16.mxu0 %v1406_v0 }
  0x5a   :  { %1381 = vmatprep.subr.bf16.mxu1 %v1406_v0  ;;  %1190 = vmatprep.mubr.msk.f32.mxu0 %vm1407_vm0, %v1408_v8 }
  0x5b   :  { %1221 = vmatprep.mubr.msk.f32.mxu1 %vm1407_vm0, %v1408_v8  ;;  %v846_v8 = vld [vmem:[%s1886_s0 + $0x340] sm:$0xff] }
  0x5c   :  { %1361 = vmatpush3.bf16.msra.mxu0 %v1360_v20  ;;  %v1388_v32 = vpack.c.bf16 %v847_v30, %v846_v8 }
  0x5d   :  { %1383 = vmatpush3.bf16.msra.mxu1 %v1382_v21  ;;  %1362 = vmatprep.subr.bf16.mxu0 %v1406_v0 }
  0x5e   :  { %1384 = vmatprep.subr.bf16.mxu1 %v1406_v0 }
  0x60   :  { %1364 = vmatpush3.bf16.msra.mxu0 %v1363_v26 }
  0x61   :  { %1386 = vmatpush3.bf16.msra.mxu1 %v1385_v27  ;;  %1365 = vmatprep.subr.bf16.mxu0 %v1406_v0 }
  0x62   :  { %1387 = vmatprep.subr.bf16.mxu1 %v1406_v0 }
  0x64   :  { %1367 = vmatpush3.bf16.msra.mxu0 %v1366_v31 }
  0x65   :  { %1389 = vmatpush3.bf16.msra.mxu1 %v1388_v32  ;;  %1368 = vmatprep.subr.bf16.mxu0 %v1406_v0 }
  0x66   :  { %1390 = vmatprep.subr.bf16.mxu1 %v1406_v0 }
  0x68   :  { %1370 = vmatpush3.bf16.msra.mxu0 %v1369_v37 }
  0x69   :  { %1392 = vmatpush3.bf16.msra.mxu1 %v1391_v38  ;;  %1371 = vmatprep.subr.bf16.mxu0 %v1406_v0 }
  0x6a   :  { %1393 = vmatprep.subr.bf16.mxu1 %v1406_v0 }
  0x6c   :  { %1373 = vmatpush3.bf16.msra.mxu0 %v1372_v43 }
  0x6d   :  { %1395 = vmatpush3.bf16.msra.mxu1 %v1394_v45  ;;  %1374 = vmatprep.subr.bf16.mxu0 %v1406_v0 }
  0x6e   :  { %1396 = vmatprep.subr.bf16.mxu1 %v1406_v0 }
  0x70   :  { %1377 = vmatpush3.bf16.msk.msra.mxu0 %vm1532_vm3, %v1375_v51 }
  0x71   :  { %1399 = vmatpush3.bf16.msk.msra.mxu1 %vm1532_vm3, %v1397_v52 }
  0x73   :  { %1191 = vmatmul.mubr.msk.f32.vlgmr.msra.gmra.mrb[6].mxu0 %vm35_vm4, %v1554_v50 }
  0x74   :  { %1222 = vmatmul.mubr.msk.f32.vlgmr.msra.gmra.mrb[6].mxu1 %vm35_vm4, %v1554_v50 }
  0x91   :  { %v33_v53 = vpop.permute.xlu0 %32 }
  0xf2   :  { %v109_v54 = vpop.f32.mrb[0].mxu0 }
  0xf3   :  { %v1006_v55 = vpop.f32.mrb[1].mxu0  ;;  %v110_v56 = vadd.f32 %v109_v54, %v33_v53  ;;  %v197_v57 = vpop.f32.mrb[0].mxu1 }
  0xf4   :  { %v198_v58 = vadd.f32 %v197_v57, %v33_v53  ;;  %v1037_v59 = vpop.f32.mrb[1].mxu1 }
  0xf6   :  { %v201_v0 = vmax.f32 %v110_v56, %v198_v58 }
 0x10e   :  { %v286_v60 = vpop.f32.mrb[2].mxu0 }
 0x10f   :  { %v287_v61 = vadd.f32 %v286_v60, %v33_v53  ;;  %v1068_v62 = vpop.f32.mrb[3].mxu0  ;;  %v375_v63 = vpop.f32.mrb[2].mxu1 }
 0x110   :  { %v376_v44 = vadd.f32 %v375_v63, %v33_v53  ;;  %v1099_v1 = vpop.f32.mrb[3].mxu1 }
 0x111   :  { %v290_v2 = vmax.f32 %v201_v0, %v287_v61 }
 0x113   :  { %v379_v3 = vmax.f32 %v290_v2, %v376_v44 }
 0x12a   :  { %v464_v4 = vpop.f32.mrb[4].mxu0 }
 0x12b   :  { %v465_v5 = vadd.f32 %v464_v4, %v33_v53  ;;  %v1130_v6 = vpop.f32.mrb[5].mxu0  ;;  %v553_v50 = vpop.f32.mrb[4].mxu1 }
 0x12c   :  { %v554_v7 = vadd.f32 %v553_v50, %v33_v53  ;;  %v1161_v9 = vpop.f32.mrb[5].mxu1 }
 0x12d   :  { %v468_v10 = vmax.f32 %v379_v3, %v465_v5 }
 0x12f   :  { %v557_v11 = vmax.f32 %v468_v10, %v554_v7 }
 0x146   :  { %v642_v12 = vpop.f32.mrb[6].mxu0 }
 0x147   :  { %v643_v13 = vadd.f32 %v642_v12, %v33_v53  ;;  %v731_v14 = vpop.f32.mrb[6].mxu1  ;;  %v1192_v15 = vpop.f32.mrb[7].mxu0 }
 0x148   :  { %v1223_v16 = vpop.f32.mrb[7].mxu1  ;;  %v732_v18 = vadd.f32 %v731_v14, %v33_v53 }
 0x149   :  { %v646_v17 = vmax.f32 %v557_v11, %v643_v13 }
 0x14b   :  { %v735_v19 = vmax.f32 %v646_v17, %v732_v18 }
 0x14d   :  { %v736_v20 = vmax.f32 %v735_v19, 0.0 }
 0x14f   :  { %737 = vst [vmem:[%s1889_s3] sm:$0xf] %v736_v20 }

// kernel: forward.5
= control target key start
LH: loop header
LB: loop body
LE: loop exit
PB: predicated region body
PF: predicated region fallthrough
CT: control target
= control target key end

     0   :  { %s3157_s0 = inlined_call_operand.vmem [shape: f32[8,108,2], index: 0, kind: input, shape index: {}]   ;;  %s3158_s1 = inlined_call_operand.vmem [shape: f32[4,108], index: 1, kind: input, shape index: {}]   ;;  %s3159_s2 = inlined_call_operand.vmem [shape: f32[4,1], index: 2, kind: input, shape index: {}]   ;;  %s3160_s3 = inlined_call_operand.vmem [shape: f32[128,4], index: 3, kind: input, shape index: {}]   ;;  %s3161_s4 = inlined_call_operand.vmem [shape: f32[128,1], index: 4, kind: input, shape index: {}]   ;;  %s3162_s5 = inlined_call_operand.vmem [shape: f32[128,128], index: 5, kind: input, shape index: {}]   ;;  %s3163_s6 = inlined_call_operand.vmem [shape: f32[128,1], index: 6, kind: input, shape index: {}]   ;;  %s3164_s7 = inlined_call_operand.vmem [shape: f32[1,128], index: 7, kind: input, shape index: {}]   ;;  %s3165_s8 = inlined_call_operand.<no memory space> [shape: f32[1,1], index: 8, kind: input, shape index: {}]   ;;  %s3166_s9 = inlined_call_operand.hbm [shape: f32[1,2], index: 9, kind: output, shape index: {}]  }
   0x1   :  { %v14_v0 = vstv %s3165_s8 }
   0x2   :  { %15 = vst [vmem:[#allocation2] sm:$0x1] %v14_v0 }
   0x3   :  { %v37_v1 = vld [vmem:[%s3157_s0] sm:$0xff]  ;;  %v38_v2 = vld [vmem:[%s3157_s0 + $0x8] sm:$0xff]  ;;  %v1461_v3 = vld [vmem:[%s3157_s0 + $0x70] sm:$0xff]  ;;  %v2410_v4 = vmov 0.0|0.0   ;;  %vm2411_vm0 = vmmov 0   ;;  %v2412_v12 = vmov 0.0  }
   0x4   :  { %2142 = vmatprep.subr.bf16.mxu0 %v2410_v4  ;;  %2164 = vmatprep.subr.bf16.mxu1 %v2410_v4  ;;  %v2143_v5 = vpack.c.bf16 %v38_v2, %v37_v1  ;;  %v1462_v6 = vld [vmem:[%s3157_s0 + $0x78] sm:$0xff]  ;;  %v39_v7 = vld [vmem:[%s3157_s0 + $0x10] sm:$0xff]  ;;  %v1463_v10 = vld [vmem:[%s3157_s0 + $0x80] sm:$0xff]  ;;  %v2413_v14 = vmov 0   ;;  %vm60_vm1 = vcmask 1043456   ;;  %vm2414_vm2 = vmmov 1  }
   0x5   :  { %v40_v8 = vld [vmem:[%s3157_s0 + $0x18] sm:$0xff]  ;;  %v2165_v9 = vpack.c.bf16 %v1462_v6, %v1461_v3  ;;  %v1464_v11 = vld [vmem:[%s3157_s0 + $0x88] sm:$0xff]  ;;  %1805 = vmatprep.mubr.msk.f32.mxu0 %vm2411_vm0, %v2412_v12  ;;  %1836 = vmatprep.mubr.msk.f32.mxu1 %vm2411_vm0, %v2412_v12  ;;  %v41_v16 = vld [vmem:[%s3157_s0 + $0x20] sm:$0xff]  ;;  %vm56_vm4 = vcmask 883712  }
   0x6   :  { %2144 = vmatpush3.bf16.msra.mxu0 %v2143_v5  ;;  %v2146_v13 = vpack.c.bf16 %v40_v8, %v39_v7  ;;  %2380 = vset.pattern.permute.xlu0 %v2413_v14  ;;  %v2168_v15 = vpack.c.bf16 %v1464_v11, %v1463_v10  ;;  %v42_v17 = vld [vmem:[%s3157_s0 + $0x28] sm:$0xff]  ;;  %v1465_v18 = vld [vmem:[%s3157_s0 + $0x90] sm:$0xff]  ;;  %v1466_v19 = vld [vmem:[%s3157_s0 + $0x98] sm:$0xff] }
   0x7   :  { %2166 = vmatpush3.bf16.msra.mxu1 %v2165_v9  ;;  %2145 = vmatprep.subr.bf16.mxu0 %v2410_v4  ;;  %v2149_v20 = vpack.c.bf16 %v42_v17, %v41_v16  ;;  %v2171_v21 = vpack.c.bf16 %v1466_v19, %v1465_v18  ;;  %v43_v22 = vld [vmem:[%s3157_s0 + $0x30] sm:$0xff]  ;;  %v44_v23 = vld [vmem:[%s3157_s0 + $0x38] sm:$0xff]  ;;  %v1467_v24 = vld [vmem:[%s3157_s0 + $0xa0] sm:$0xff] }
   0x8   :  { %2167 = vmatprep.subr.bf16.mxu1 %v2410_v4  ;;  %2381 = vset.pattern.permute.xlu1 %v2413_v14  ;;  %v1468_v25 = vld [vmem:[%s3157_s0 + $0xa8] sm:$0xff]  ;;  %v2152_v26 = vpack.c.bf16 %v44_v23, %v43_v22  ;;  %v45_v28 = vld [vmem:[%s3157_s0 + $0x40] sm:$0xff]  ;;  %v1469_v30 = vld [vmem:[%s3157_s0 + $0xb0] sm:$0xff] }
   0x9   :  { %v2174_v27 = vpack.c.bf16 %v1468_v25, %v1467_v24  ;;  %v46_v29 = vld [vmem:[%s3157_s0 + $0x48] sm:$0xff]  ;;  %v1470_v31 = vld [vmem:[%s3157_s0 + $0xb8] sm:$0xff]  ;;  %v47_v34 = vld [vmem:[%s3157_s0 + $0x50] sm:$0xff] }
   0xa   :  { %2147 = vmatpush3.bf16.msra.mxu0 %v2146_v13  ;;  %v2155_v32 = vpack.c.bf16 %v46_v29, %v45_v28  ;;  %v2177_v33 = vpack.c.bf16 %v1470_v31, %v1469_v30  ;;  %v48_v35 = vld [vmem:[%s3157_s0 + $0x58] sm:$0xff]  ;;  %v1471_v36 = vld [vmem:[%s3157_s0 + $0xc0] sm:$0xff]  ;;  %v1472_v37 = vld [vmem:[%s3157_s0 + $0xc8] sm:$0xff] }
   0xb   :  { %2169 = vmatpush3.bf16.msra.mxu1 %v2168_v15  ;;  %2148 = vmatprep.subr.bf16.mxu0 %v2410_v4  ;;  %v2158_v38 = vpack.c.bf16 %v48_v35, %v47_v34  ;;  %v2180_v39 = vpack.c.bf16 %v1472_v37, %v1471_v36  ;;  %v49_v40 = vld [vmem:[%s3157_s0 + $0x60] sm:$0xff]  ;;  %v50_v41 = vld [vmem:[%s3157_s0 + $0x68] sm:$0xf]  ;;  %v1473_v42 = vld [vmem:[%s3157_s0 + $0xd0] sm:$0xff] }
   0xc   :  { %2170 = vmatprep.subr.bf16.mxu1 %v2410_v4  ;;  %v1474_v43 = vld [vmem:[%s3157_s0 + $0xd8] sm:$0xf]  ;;  %v2161_v44 = vpack.c.bf16 %v50_v41, %v49_v40  ;;  %vm2571_vm3 = vmpackc.low %vm60_vm1, %vm2414_vm2  ;;  %v1477_v47 = vld [vmem:[%s3157_s0 + $0xe0] sm:$0xff] }
   0xd   :  { %v2183_v46 = vpack.c.bf16 %v1474_v43, %v1473_v42  ;;  %v1478_v48 = vld [vmem:[%s3157_s0 + $0xe8] sm:$0xff]  ;;  %v1493_v49 = vld [vmem:[%s3157_s0 + $0x150] sm:$0xff]  ;;  %v1494_v50 = vld [vmem:[%s3157_s0 + $0x158] sm:$0xff] }
   0xe   :  { %2150 = vmatpush3.bf16.msra.mxu0 %v2149_v20  ;;  %v2593_v51 = vld [vmem:[%s3158_s1] sm:$0xf]  ;;  %v2187_v52 = vpack.c.bf16 %v1478_v48, %v1477_v47  ;;  %v2209_v53 = vpack.c.bf16 %v1494_v50, %v1493_v49  ;;  %v1479_v54 = vld [vmem:[%s3157_s0 + $0xf0] sm:$0xff]  ;;  %v1480_v55 = vld [vmem:[%s3157_s0 + $0xf8] sm:$0xff] }
   0xf   :  { %2172 = vmatpush3.bf16.msra.mxu1 %v2171_v21  ;;  %2151 = vmatprep.subr.bf16.mxu0 %v2410_v4  ;;  %v1495_v56 = vld [vmem:[%s3157_s0 + $0x160] sm:$0xff]  ;;  %v1496_v57 = vld [vmem:[%s3157_s0 + $0x168] sm:$0xff]  ;;  %v2190_v58 = vpack.c.bf16 %v1480_v55, %v1479_v54  ;;  %v1497_v62 = vld [vmem:[%s3157_s0 + $0x170] sm:$0xff] }
  0x10   :  { %2173 = vmatprep.subr.bf16.mxu1 %v2410_v4  ;;  %v2212_v59 = vpack.c.bf16 %v1496_v57, %v1495_v56  ;;  %v1481_v60 = vld [vmem:[%s3157_s0 + $0x100] sm:$0xff]  ;;  %v1482_v61 = vld [vmem:[%s3157_s0 + $0x108] sm:$0xff]  ;;  %v1498_v63 = vld [vmem:[%s3157_s0 + $0x178] sm:$0xff] }
  0x11   :  { %v2193_v0 = vpack.c.bf16 %v1482_v61, %v1481_v60  ;;  %v2215_v1 = vpack.c.bf16 %v1498_v63, %v1497_v62  ;;  %v1483_v2 = vld [vmem:[%s3157_s0 + $0x110] sm:$0xff]  ;;  %v1484_v3 = vld [vmem:[%s3157_s0 + $0x118] sm:$0xff]  ;;  %v1499_v5 = vld [vmem:[%s3157_s0 + $0x180] sm:$0xff] }
  0x12   :  { %2153 = vmatpush3.bf16.msra.mxu0 %v2152_v26  ;;  %v1500_v6 = vld [vmem:[%s3157_s0 + $0x188] sm:$0xff]  ;;  %v36_v7 = vld [vmem:[%s3159_s2] sm:$0xf]  ;;  %v2196_v8 = vpack.c.bf16 %v1484_v3, %v1483_v2  ;;  %v1501_v14 = vld [vmem:[%s3157_s0 + $0x190] sm:$0xff] }
  0x13   :  { %2175 = vmatpush3.bf16.msra.mxu1 %v2174_v27  ;;  %2154 = vmatprep.subr.bf16.mxu0 %v2410_v4  ;;  %v2218_v9 = vpack.c.bf16 %v1500_v6, %v1499_v5  ;;  %v1485_v10 = vld [vmem:[%s3157_s0 + $0x120] sm:$0xff]  ;;  %v1486_v11 = vld [vmem:[%s3157_s0 + $0x128] sm:$0xff]  ;;  %v1502_v15 = vld [vmem:[%s3157_s0 + $0x198] sm:$0xff] }
  0x14   :  { %2176 = vmatprep.subr.bf16.mxu1 %v2410_v4  ;;  %53 = vperm.xlu0 %2380, %v36_v7   ;;  %v774_v13 = vld [vmem:[%s3161_s4] sm:$0xff]  ;;  %v2199_v16 = vpack.c.bf16 %v1486_v11, %v1485_v10 }
  0x16   :  { %2156 = vmatpush3.bf16.msra.mxu0 %v2155_v32 }
  0x17   :  { %2178 = vmatpush3.bf16.msra.mxu1 %v2177_v33  ;;  %2157 = vmatprep.subr.bf16.mxu0 %v2410_v4 }
  0x18   :  { %2179 = vmatprep.subr.bf16.mxu1 %v2410_v4  ;;  %792 = vperm.xlu0 %2380, %v774_v13  }
  0x1a   :  { %2159 = vmatpush3.bf16.msra.mxu0 %v2158_v38 }
  0x1b   :  { %2181 = vmatpush3.bf16.msra.mxu1 %v2180_v39  ;;  %2160 = vmatprep.subr.bf16.mxu0 %v2410_v4 }
  0x1c   :  { %2182 = vmatprep.subr.bf16.mxu1 %v2410_v4 }
  0x1e   :  { %2163 = vmatpush3.bf16.msk.msra.mxu0 %vm2571_vm3, %v2161_v44 }
  0x1f   :  { %2185 = vmatpush3.bf16.msk.msra.mxu1 %vm2571_vm3, %v2183_v46  ;;  %2186 = vmatprep.subr.bf16.mxu0 %v2410_v4 }
  0x20   :  { %2208 = vmatprep.subr.bf16.mxu1 %v2410_v4 }
  0x21   :  { %1806 = vmatmul.mubr.msk.f32.vlgmr.msra.gmra.mrb[0].mxu0 %vm56_vm4, %v2593_v51 }
  0x22   :  { %1837 = vmatmul.mubr.msk.f32.vlgmr.msra.gmra.mrb[0].mxu1 %vm56_vm4, %v2593_v51  ;;  %2188 = vmatpush3.bf16.msra.mxu0 %v2187_v52 }
  0x23   :  { %2210 = vmatpush3.bf16.msra.mxu1 %v2209_v53  ;;  %2189 = vmatprep.subr.bf16.mxu0 %v2410_v4 }
  0x24   :  { %2211 = vmatprep.subr.bf16.mxu1 %v2410_v4  ;;  %1867 = vmatprep.mubr.msk.f32.mxu0 %vm2411_vm0, %v2412_v12 }
  0x25   :  { %1898 = vmatprep.mubr.msk.f32.mxu1 %vm2411_vm0, %v2412_v12 }
  0x26   :  { %2191 = vmatpush3.bf16.msra.mxu0 %v2190_v58 }
  0x27   :  { %2213 = vmatpush3.bf16.msra.mxu1 %v2212_v59  ;;  %2192 = vmatprep.subr.bf16.mxu0 %v2410_v4 }
  0x28   :  { %2214 = vmatprep.subr.bf16.mxu1 %v2410_v4 }
  0x2a   :  { %2194 = vmatpush3.bf16.msra.mxu0 %v2193_v0 }
  0x2b   :  { %2216 = vmatpush3.bf16.msra.mxu1 %v2215_v1  ;;  %2195 = vmatprep.subr.bf16.mxu0 %v2410_v4 }
  0x2c   :  { %2217 = vmatprep.subr.bf16.mxu1 %v2410_v4 }
  0x2e   :  { %2197 = vmatpush3.bf16.msra.mxu0 %v2196_v8 }
  0x2f   :  { %16 = vsyncpa [#allocation4], 0  ;;  %2219 = vmatpush3.bf16.msra.mxu1 %v2218_v9  ;;  %2198 = vmatprep.subr.bf16.mxu0 %v2410_v4  ;;  %v2221_v17 = vpack.c.bf16 %v1502_v15, %v1501_v14  ;;  %v1487_v18 = vld [vmem:[%s3157_s0 + $0x130] sm:$0xff]  ;;  %v1488_v19 = vld [vmem:[%s3157_s0 + $0x138] sm:$0xff]  ;;  %vm870_vm5 = vcmask 31744   ;;  %s2415_s24 = smov [#allocation3]  }
  0x30   :  { %v777_v20 = vld [vmem:[%s3161_s4 + $0x18] sm:$0xff]  ;;  %2220 = vmatprep.subr.bf16.mxu1 %v2410_v4  ;;  %v1503_v21 = vld [vmem:[%s3157_s0 + $0x1a0] sm:$0xff]  ;;  %v1504_v22 = vld [vmem:[%s3157_s0 + $0x1a8] sm:$0xff]  ;;  %v2202_v23 = vpack.c.bf16 %v1488_v19, %v1487_v18  ;;  %s1451_s25 = sshll.u32 %s2415_s24, 4  ;;  %vm1443_vm6 = vcmask 8192   ;;  %s1452_s25 = int_to_ptr.vmem [resolvable:$true] %s1451_s25 }
  0x31   :  { %807 = vperm.xlu0 %2380, %v777_v20   ;;  %v2224_v24 = vpack.c.bf16 %v1504_v22, %v1503_v21  ;;  %v1489_v25 = vld [vmem:[%s3157_s0 + $0x140] sm:$0xff]  ;;  %v1490_v26 = vld [vmem:[%s3157_s0 + $0x148] sm:$0xf]  ;;  %v1505_v28 = vld [vmem:[%s3157_s0 + $0x1b0] sm:$0xff]  ;;  %s2390_s26 = scalar_lea.vmem %s1452_s25, 32  ;;  %p2391_p1 = scmp.lt.s32.totalorder %s1452_s25, %s1452_s25 }
  0x32   :  { %2200 = vmatpush3.bf16.msra.mxu0 %v2199_v16  ;;  %v779_v27 = vld [vmem:[%s3161_s4 + $0x28] sm:$0xff]  ;;  %v1506_v29 = vld [vmem:[%s3157_s0 + $0x1b8] sm:$0xf]  ;;  %v2205_v30 = vpack.c.bf16 %v1490_v26, %v1489_v25  ;;  %v1509_v32 = vld [vmem:[%s3157_s0 + $0x1c0] sm:$0xff] }
  0x33   :  { %2222 = vmatpush3.bf16.msra.mxu1 %v2221_v17  ;;  %2201 = vmatprep.subr.bf16.mxu0 %v2410_v4  ;;  %v2227_v31 = vpack.c.bf16 %v1506_v29, %v1505_v28  ;;  %v1510_v33 = vld [vmem:[%s3157_s0 + $0x1c8] sm:$0xff]  ;;  %v781_v34 = vld [vmem:[%s3161_s4 + $0x38] sm:$0xff]  ;;  %v1525_v35 = vld [vmem:[%s3157_s0 + $0x230] sm:$0xff] }
  0x34   :  { %2223 = vmatprep.subr.bf16.mxu1 %v2410_v4  ;;  %v1526_v36 = vld [vmem:[%s3157_s0 + $0x238] sm:$0xff]  ;;  %v2231_v37 = vpack.c.bf16 %v1510_v33, %v1509_v32  ;;  %v1511_v39 = vld [vmem:[%s3157_s0 + $0x1d0] sm:$0xff]  ;;  %v1527_v41 = vld [vmem:[%s3157_s0 + $0x240] sm:$0xff] }
  0x35   :  { %817 = vperm.xlu0 %2380, %v779_v27   ;;  %v2253_v38 = vpack.c.bf16 %v1526_v36, %v1525_v35  ;;  %v1512_v40 = vld [vmem:[%s3157_s0 + $0x1d8] sm:$0xff]  ;;  %v1528_v42 = vld [vmem:[%s3157_s0 + $0x248] sm:$0xff]  ;;  %v1513_v47 = vld [vmem:[%s3157_s0 + $0x1e0] sm:$0xff] }
  0x36   :  { %2203 = vmatpush3.bf16.msra.mxu0 %v2202_v23  ;;  %v2234_v43 = vpack.c.bf16 %v1512_v40, %v1511_v39  ;;  %v783_v44 = vld [vmem:[%s3161_s4 + $0x48] sm:$0xff]  ;;  %v2256_v46 = vpack.c.bf16 %v1528_v42, %v1527_v41  ;;  %v1529_v49 = vld [vmem:[%s3157_s0 + $0x250] sm:$0xff]  ;;  %v1530_v50 = vld [vmem:[%s3157_s0 + $0x258] sm:$0xff] }
  0x37   :  { %2225 = vmatpush3.bf16.msra.mxu1 %v2224_v24  ;;  %2204 = vmatprep.subr.bf16.mxu0 %v2410_v4  ;;  %v1514_v48 = vld [vmem:[%s3157_s0 + $0x1e8] sm:$0xff]  ;;  %v785_v53 = vld [vmem:[%s3161_s4 + $0x58] sm:$0xff]  ;;  %v2259_v54 = vpack.c.bf16 %v1530_v50, %v1529_v49  ;;  %v1515_v55 = vld [vmem:[%s3157_s0 + $0x1f0] sm:$0xff] }
  0x38   :  { %2226 = vmatprep.subr.bf16.mxu1 %v2410_v4  ;;  %v2237_v52 = vpack.c.bf16 %v1514_v48, %v1513_v47  ;;  %v1516_v56 = vld [vmem:[%s3157_s0 + $0x1f8] sm:$0xff]  ;;  %v1531_v57 = vld [vmem:[%s3157_s0 + $0x260] sm:$0xff]  ;;  %v1532_v58 = vld [vmem:[%s3157_s0 + $0x268] sm:$0xff] }
  0x39   :  { %827 = vperm.xlu0 %2380, %v781_v34   ;;  %v2240_v59 = vpack.c.bf16 %v1516_v56, %v1515_v55  ;;  %v787_v60 = vld [vmem:[%s3161_s4 + $0x68] sm:$0xff]  ;;  %v2262_v61 = vpack.c.bf16 %v1532_v58, %v1531_v57  ;;  %v1517_v62 = vld [vmem:[%s3157_s0 + $0x200] sm:$0xff]  ;;  %v1533_v0 = vld [vmem:[%s3157_s0 + $0x270] sm:$0xff] }
  0x3a   :  { %2207 = vmatpush3.bf16.msk.msra.mxu0 %vm2571_vm3, %v2205_v30  ;;  %v1518_v63 = vld [vmem:[%s3157_s0 + $0x208] sm:$0xff]  ;;  %v1534_v1 = vld [vmem:[%s3157_s0 + $0x278] sm:$0xff]  ;;  %v1519_v6 = vld [vmem:[%s3157_s0 + $0x210] sm:$0xff] }
  0x3b   :  { %2229 = vmatpush3.bf16.msk.msra.mxu1 %vm2571_vm3, %v2227_v31  ;;  %2230 = vmatprep.subr.bf16.mxu0 %v2410_v4  ;;  %v2243_v2 = vpack.c.bf16 %v1518_v63, %v1517_v62  ;;  %v789_v3 = vld [vmem:[%s3161_s4 + $0x78] sm:$0xff]  ;;  %v2265_v5 = vpack.c.bf16 %v1534_v1, %v1533_v0  ;;  %v1535_v8 = vld [vmem:[%s3157_s0 + $0x280] sm:$0xff]  ;;  %v1536_v9 = vld [vmem:[%s3157_s0 + $0x288] sm:$0xff] }
  0x3c   :  { %2252 = vmatprep.subr.bf16.mxu1 %v2410_v4  ;;  %v1520_v7 = vld [vmem:[%s3157_s0 + $0x218] sm:$0xff]  ;;  %v1100_v11 = vld [vmem:[%s3163_s6 + $0x8] sm:$0xff]  ;;  %v2268_v13 = vpack.c.bf16 %v1536_v9, %v1535_v8  ;;  %v1521_v14 = vld [vmem:[%s3157_s0 + $0x220] sm:$0xff] }
  0x3d   :  { %1868 = vmatmul.mubr.msk.f32.vlgmr.msra.gmra.mrb[2].mxu0 %vm56_vm4, %v2593_v51  ;;  %837 = vperm.xlu0 %2380, %v783_v44   ;;  %v2246_v10 = vpack.c.bf16 %v1520_v7, %v1519_v6  ;;  %v1522_v15 = vld [vmem:[%s3157_s0 + $0x228] sm:$0xf]  ;;  %v1537_v16 = vld [vmem:[%s3157_s0 + $0x290] sm:$0xff]  ;;  %v1538_v17 = vld [vmem:[%s3157_s0 + $0x298] sm:$0xf] }
  0x3e   :  { %1899 = vmatmul.mubr.msk.f32.vlgmr.msra.gmra.mrb[2].mxu1 %vm56_vm4, %v2593_v51  ;;  %2232 = vmatpush3.bf16.msra.mxu0 %v2231_v37  ;;  %v2249_v18 = vpack.c.bf16 %v1522_v15, %v1521_v14  ;;  %v1102_v19 = vld [vmem:[%s3163_s6 + $0x18] sm:$0xff]  ;;  %v2271_v20 = vpack.c.bf16 %v1538_v17, %v1537_v16  ;;  %v1541_v21 = vld [vmem:[%s3157_s0 + $0x2a0] sm:$0xff]  ;;  %v1542_v22 = vld [vmem:[%s3157_s0 + $0x2a8] sm:$0xff] }
  0x3f   :  { %2254 = vmatpush3.bf16.msra.mxu1 %v2253_v38  ;;  %2233 = vmatprep.subr.bf16.mxu0 %v2410_v4  ;;  %v1557_v23 = vld [vmem:[%s3157_s0 + $0x310] sm:$0xff]  ;;  %v1558_v24 = vld [vmem:[%s3157_s0 + $0x318] sm:$0xff]  ;;  %v2275_v25 = vpack.c.bf16 %v1542_v22, %v1541_v21  ;;  %v1104_v26 = vld [vmem:[%s3163_s6 + $0x28] sm:$0xff] }
  0x40   :  { %2255 = vmatprep.subr.bf16.mxu1 %v2410_v4  ;;  %1929 = vmatprep.mubr.msk.f32.mxu0 %vm2411_vm0, %v2412_v12  ;;  %v2297_v27 = vpack.c.bf16 %v1558_v24, %v1557_v23  ;;  %v1543_v28 = vld [vmem:[%s3157_s0 + $0x2b0] sm:$0xff]  ;;  %v1544_v29 = vld [vmem:[%s3157_s0 + $0x2b8] sm:$0xff]  ;;  %v1559_v30 = vld [vmem:[%s3157_s0 + $0x320] sm:$0xff] }
  0x41   :  { %1960 = vmatprep.mubr.msk.f32.mxu1 %vm2411_vm0, %v2412_v12  ;;  %847 = vperm.xlu0 %2380, %v785_v53   ;;  %v1560_v31 = vld [vmem:[%s3157_s0 + $0x328] sm:$0xff]  ;;  %v2278_v32 = vpack.c.bf16 %v1544_v29, %v1543_v28  ;;  %v1106_v33 = vld [vmem:[%s3163_s6 + $0x38] sm:$0xff]  ;;  %v1545_v35 = vld [vmem:[%s3157_s0 + $0x2c0] sm:$0xff] }
  0x42   :  { %2235 = vmatpush3.bf16.msra.mxu0 %v2234_v43  ;;  %v2300_v34 = vpack.c.bf16 %v1560_v31, %v1559_v30  ;;  %v1546_v36 = vld [vmem:[%s3157_s0 + $0x2c8] sm:$0xff]  ;;  %v1561_v37 = vld [vmem:[%s3157_s0 + $0x330] sm:$0xff]  ;;  %v1562_v38 = vld [vmem:[%s3157_s0 + $0x338] sm:$0xff] }
  0x43   :  { %2257 = vmatpush3.bf16.msra.mxu1 %v2256_v46  ;;  %2236 = vmatprep.subr.bf16.mxu0 %v2410_v4  ;;  %v2281_v39 = vpack.c.bf16 %v1546_v36, %v1545_v35  ;;  %v1108_v40 = vld [vmem:[%s3163_s6 + $0x48] sm:$0xff]  ;;  %v2303_v41 = vpack.c.bf16 %v1562_v38, %v1561_v37  ;;  %v1547_v42 = vld [vmem:[%s3157_s0 + $0x2d0] sm:$0xff]  ;;  %v1548_v43 = vld [vmem:[%s3157_s0 + $0x2d8] sm:$0xff] }
  0x44   :  { %2258 = vmatprep.subr.bf16.mxu1 %v2410_v4  ;;  %v1563_v44 = vld [vmem:[%s3157_s0 + $0x340] sm:$0xff]  ;;  %v1564_v46 = vld [vmem:[%s3157_s0 + $0x348] sm:$0xff]  ;;  %v2284_v47 = vpack.c.bf16 %v1548_v43, %v1547_v42  ;;  %v1110_v48 = vld [vmem:[%s3163_s6 + $0x58] sm:$0xff] }
  0x45   :  { %857 = vperm.xlu0 %2380, %v787_v60   ;;  %v2306_v49 = vpack.c.bf16 %v1564_v46, %v1563_v44  ;;  %v1549_v50 = vld [vmem:[%s3157_s0 + $0x2e0] sm:$0xff]  ;;  %v1565_v53 = vld [vmem:[%s3157_s0 + $0x350] sm:$0xff]  ;;  %v1112_v56 = vld [vmem:[%s3163_s6 + $0x68] sm:$0xff] }
  0x46   :  { %2238 = vmatpush3.bf16.msra.mxu0 %v2237_v52  ;;  %v1550_v52 = vld [vmem:[%s3157_s0 + $0x2e8] sm:$0xff]  ;;  %v1551_v58 = vld [vmem:[%s3157_s0 + $0x2f0] sm:$0xff]  ;;  %v1567_v60 = vld [vmem:[%s3157_s0 + $0x360] sm:$0xff] }
  0x47   :  { %2260 = vmatpush3.bf16.msra.mxu1 %v2259_v54  ;;  %2239 = vmatprep.subr.bf16.mxu0 %v2410_v4  ;;  %v1566_v54 = vld [vmem:[%s3157_s0 + $0x358] sm:$0xff]  ;;  %v2287_v55 = vpack.c.bf16 %v1550_v52, %v1549_v50  ;;  %v1553_v1 = vld [vmem:[%s3157_s0 + $0x300] sm:$0xff]  ;;  %v775_v9 = vld [vmem:[%s3161_s4 + $0x8] sm:$0xff] }
  0x48   :  { %2261 = vmatprep.subr.bf16.mxu1 %v2410_v4  ;;  %v2309_v57 = vpack.c.bf16 %v1566_v54, %v1565_v53  ;;  %v1114_v63 = vld [vmem:[%s3163_s6 + $0x78] sm:$0xff]  ;;  %v758_v8 = vld [vmem:[%s3160_s3] sm:$0xff]  ;;  %797 = vperm.xlu1 %2381, %v775_v9   ;;  %v776_v45 = vld [vmem:[%s3161_s4 + $0x10] sm:$0xff] }
  0x49   :  { %867 = vperm.xlu0 %2380, %v789_v3   ;;  %v1569_v3 = vld [vmem:[%s3157_s0 + $0x370] sm:$0xff]  ;;  %v782_v17 = vld [vmem:[%s3161_s4 + $0x40] sm:$0xff]  ;;  %v771_v9 = vld [vmem:[%s3160_s3 + $0x68] sm:$0xff] }
  0x4a   :  { %2241 = vmatpush3.bf16.msra.mxu0 %v2240_v59  ;;  %v1552_v59 = vld [vmem:[%s3157_s0 + $0x2f8] sm:$0xff]  ;;  %v784_v21 = vld [vmem:[%s3161_s4 + $0x50] sm:$0xff]  ;;  %v786_v22 = vld [vmem:[%s3161_s4 + $0x60] sm:$0xff] }
  0x4b   :  { %2263 = vmatpush3.bf16.msra.mxu1 %v2262_v61  ;;  %2242 = vmatprep.subr.bf16.mxu0 %v2410_v4  ;;  %v1568_v61 = vld [vmem:[%s3157_s0 + $0x368] sm:$0xff]  ;;  %v2290_v62 = vpack.c.bf16 %v1552_v59, %v1551_v58  ;;  %v788_v23 = vld [vmem:[%s3161_s4 + $0x70] sm:$0xff]  ;;  %v1099_v24 = vld [vmem:[%s3163_s6] sm:$0xff] }
  0x4c   :  { %2264 = vmatprep.subr.bf16.mxu1 %v2410_v4  ;;  %v2312_v0 = vpack.c.bf16 %v1568_v61, %v1567_v60  ;;  %802 = vperm.xlu1 %2381, %v776_v45   ;;  %v1105_v31 = vld [vmem:[%s3163_s6 + $0x30] sm:$0xff]  ;;  %v1107_v36 = vld [vmem:[%s3163_s6 + $0x40] sm:$0xff]  ;;  %v759_v60 = vld [vmem:[%s3160_s3 + $0x8] sm:$0xff] }
  0x4d   :  { %1122 = vperm.xlu0 %2380, %v1100_v11   ;;  %v1109_v37 = vld [vmem:[%s3163_s6 + $0x50] sm:$0xff]  ;;  %v1111_v38 = vld [vmem:[%s3163_s6 + $0x60] sm:$0xff] }
  0x4e   :  { %2244 = vmatpush3.bf16.msra.mxu0 %v2243_v2  ;;  %v1554_v2 = vld [vmem:[%s3157_s0 + $0x308] sm:$0xf]  ;;  %v760_v61 = vld [vmem:[%s3160_s3 + $0x10] sm:$0xff] }
  0x4f   :  { %2266 = vmatpush3.bf16.msra.mxu1 %v2265_v5  ;;  %2245 = vmatprep.subr.bf16.mxu0 %v2410_v4  ;;  %v1570_v5 = vld [vmem:[%s3157_s0 + $0x378] sm:$0xf]  ;;  %v2293_v6 = vpack.c.bf16 %v1554_v2, %v1553_v1  ;;  %v764_v1 = vld [vmem:[%s3160_s3 + $0x30] sm:$0xff] }
  0x50   :  { %2267 = vmatprep.subr.bf16.mxu1 %v2410_v4  ;;  %v2315_v7 = vpack.c.bf16 %v1570_v5, %v1569_v3  ;;  %v765_v2 = vld [vmem:[%s3160_s3 + $0x38] sm:$0xff]  ;;  %v766_v3 = vld [vmem:[%s3160_s3 + $0x40] sm:$0xff]  ;;  %v767_v5 = vld [vmem:[%s3160_s3 + $0x48] sm:$0xff] }
  0x51   :  { %1132 = vperm.xlu0 %2380, %v1102_v19   ;;  %v772_v45 = vld [vmem:[%s3160_s3 + $0x70] sm:$0xff] }
  0x52   :  { %2247 = vmatpush3.bf16.msra.mxu0 %v2246_v10  ;;  %v780_v10 = vld [vmem:[%s3161_s4 + $0x30] sm:$0xff] }
  0x53   :  { %2269 = vmatpush3.bf16.msra.mxu1 %v2268_v13  ;;  %2248 = vmatprep.subr.bf16.mxu0 %v2410_v4 }
  0x54   :  { %2270 = vmatprep.subr.bf16.mxu1 %v2410_v4 }
  0x55   :  { %1142 = vperm.xlu0 %2380, %v1104_v26   ;;  %v1103_v26 = vld [vmem:[%s3163_s6 + $0x20] sm:$0xff] }
  0x56   :  { %2251 = vmatpush3.bf16.msk.msra.mxu0 %vm2571_vm3, %v2249_v18 }
  0x57   :  { %2273 = vmatpush3.bf16.msk.msra.mxu1 %vm2571_vm3, %v2271_v20  ;;  %2274 = vmatprep.subr.bf16.mxu0 %v2410_v4 }
  0x58   :  { %2296 = vmatprep.subr.bf16.mxu1 %v2410_v4 }
  0x59   :  { %1930 = vmatmul.mubr.msk.f32.vlgmr.msra.gmra.mrb[4].mxu0 %vm56_vm4, %v2593_v51  ;;  %1152 = vperm.xlu0 %2380, %v1106_v33  }
  0x5a   :  { %1961 = vmatmul.mubr.msk.f32.vlgmr.msra.gmra.mrb[4].mxu1 %vm56_vm4, %v2593_v51  ;;  %2276 = vmatpush3.bf16.msra.mxu0 %v2275_v25  ;;  %v1101_v25 = vld [vmem:[%s3163_s6 + $0x10] sm:$0xff] }
  0x5b   :  { %2298 = vmatpush3.bf16.msra.mxu1 %v2297_v27  ;;  %2277 = vmatprep.subr.bf16.mxu0 %v2410_v4 }
  0x5c   :  { %2299 = vmatprep.subr.bf16.mxu1 %v2410_v4  ;;  %1991 = vmatprep.mubr.msk.f32.mxu0 %vm2411_vm0, %v2412_v12 }
  0x5d   :  { %2022 = vmatprep.mubr.msk.f32.mxu1 %vm2411_vm0, %v2412_v12  ;;  %1162 = vperm.xlu0 %2380, %v1108_v40   ;;  %v1357_v40 = vld [vmem:[#allocation2] sm:$0x1] }
  0x5e   :  { %2279 = vmatpush3.bf16.msra.mxu0 %v2278_v32 }
  0x5f   :  { %2301 = vmatpush3.bf16.msra.mxu1 %v2300_v34  ;;  %2280 = vmatprep.subr.bf16.mxu0 %v2410_v4 }
  0x60   :  { %2302 = vmatprep.subr.bf16.mxu1 %v2410_v4 }
  0x61   :  { %1172 = vperm.xlu0 %2380, %v1110_v48  }
  0x62   :  { %2282 = vmatpush3.bf16.msra.mxu0 %v2281_v39  ;;  %v1113_v39 = vld [vmem:[%s3163_s6 + $0x70] sm:$0xff] }
  0x63   :  { %2304 = vmatpush3.bf16.msra.mxu1 %v2303_v41  ;;  %2283 = vmatprep.subr.bf16.mxu0 %v2410_v4 }
  0x64   :  { %2305 = vmatprep.subr.bf16.mxu1 %v2410_v4 }
  0x65   :  { %1182 = vperm.xlu0 %2380, %v1112_v56  }
  0x66   :  { %2285 = vmatpush3.bf16.msra.mxu0 %v2284_v47 }
  0x67   :  { %2307 = vmatpush3.bf16.msra.mxu1 %v2306_v49  ;;  %2286 = vmatprep.subr.bf16.mxu0 %v2410_v4 }
  0x68   :  { %2308 = vmatprep.subr.bf16.mxu1 %v2410_v4 }
  0x69   :  { %1192 = vperm.xlu0 %2380, %v1114_v63   ;;  %v762_v63 = vld [vmem:[%s3160_s3 + $0x20] sm:$0xff] }
  0x6a   :  { %2288 = vmatpush3.bf16.msra.mxu0 %v2287_v55 }
  0x6b   :  { %2310 = vmatpush3.bf16.msra.mxu1 %v2309_v57  ;;  %2289 = vmatprep.subr.bf16.mxu0 %v2410_v4 }
  0x6c   :  { %2311 = vmatprep.subr.bf16.mxu1 %v2410_v4 }
  0x6e   :  { %2291 = vmatpush3.bf16.msra.mxu0 %v2290_v62  ;;  %v761_v62 = vld [vmem:[%s3160_s3 + $0x18] sm:$0xff] }
  0x6f   :  { %2313 = vmatpush3.bf16.msra.mxu1 %v2312_v0  ;;  %2292 = vmatprep.subr.bf16.mxu0 %v2410_v4  ;;  %v763_v0 = vld [vmem:[%s3160_s3 + $0x28] sm:$0xff] }
  0x70   :  { %2314 = vmatprep.subr.bf16.mxu1 %v2410_v4 }
  0x72   :  { %2295 = vmatpush3.bf16.msk.msra.mxu0 %vm2571_vm3, %v2293_v6  ;;  %v768_v6 = vld [vmem:[%s3160_s3 + $0x50] sm:$0xff] }
  0x73   :  { %2317 = vmatpush3.bf16.msk.msra.mxu1 %vm2571_vm3, %v2315_v7  ;;  %v769_v7 = vld [vmem:[%s3160_s3 + $0x58] sm:$0xff] }
  0x75   :  { %1992 = vmatmul.mubr.msk.f32.vlgmr.msra.gmra.mrb[6].mxu0 %vm56_vm4, %v2593_v51 }
  0x76   :  { %2023 = vmatmul.mubr.msk.f32.vlgmr.msra.gmra.mrb[6].mxu1 %vm56_vm4, %v2593_v51  ;;  %2027 = vmatprep.mubr.msk.f32.mxu0 %vm870_vm5, %v758_v8  ;;  %v778_v51 = vld [vmem:[%s3161_s4 + $0x20] sm:$0xff] }
  0x77   :  { %812 = vperm.xlu1 %2381, %v778_v51   ;;  %v770_v8 = vld [vmem:[%s3160_s3 + $0x60] sm:$0xff]  ;;  %v773_v51 = vld [vmem:[%s3160_s3 + $0x78] sm:$0xff] }
  0x7b   :  { %822 = vperm.xlu1 %2381, %v780_v10   ;;  %v1083_v10 = vld [vmem:[%s3162_s5] sm:$0xff] }
  0x7c   :  { %2083 = vmatprep.mubr.f32.mxu1 %v1083_v10 }
  0x7f   :  { %832 = vperm.xlu1 %2381, %v782_v17  }
  0x83   :  { %842 = vperm.xlu1 %2381, %v784_v21  }
  0x87   :  { %852 = vperm.xlu1 %2381, %v786_v22  }
  0x8b   :  { %862 = vperm.xlu1 %2381, %v788_v23  }
  0x8f   :  { %1117 = vperm.xlu1 %2381, %v1099_v24  }
  0x93   :  { %v54_v11 = vpop.permute.xlu0 %53  ;;  %1127 = vperm.xlu1 %2381, %v1101_v25  }
  0x97   :  { %1137 = vperm.xlu1 %2381, %v1103_v26  }
  0x9b   :  { %1147 = vperm.xlu1 %2381, %v1105_v31  }
  0x9f   :  { %1157 = vperm.xlu1 %2381, %v1107_v36  }
  0xa3   :  { %1167 = vperm.xlu1 %2381, %v1109_v37  }
  0xa7   :  { %1177 = vperm.xlu1 %2381, %v1111_v38  }
  0xab   :  { %1187 = vperm.xlu1 %2381, %v1113_v39  }
  0xaf   :  { %1360 = vperm.xlu1 %2381, %v1357_v40  }
  0xf4   :  { %v130_v13 = vpop.f32.mrb[0].mxu0 }
  0xf5   :  { %v1807_v14 = vpop.f32.mrb[1].mxu0  ;;  %v131_v15 = vadd.f32 %v130_v13, %v54_v11  ;;  %v218_v16 = vpop.f32.mrb[0].mxu1 }
  0xf6   :  { %v219_v18 = vadd.f32 %v218_v16, %v54_v11  ;;  %v1838_v19 = vpop.f32.mrb[1].mxu1  ;;  %v798_v13 = vpop.permute.xlu1 %797 }
  0xf8   :  { %v222_v20 = vmax.f32 %v131_v15, %v219_v18 }
  0xfa   :  { %v803_v15 = vpop.permute.xlu1 %802 }
  0xfe   :  { %v813_v17 = vpop.permute.xlu1 %812 }
 0x110   :  { %v307_v27 = vpop.f32.mrb[2].mxu0 }
 0x111   :  { %v308_v28 = vadd.f32 %v307_v27, %v54_v11  ;;  %v1869_v29 = vpop.f32.mrb[3].mxu0  ;;  %v396_v30 = vpop.f32.mrb[2].mxu1 }
 0x112   :  { %v397_v32 = vadd.f32 %v396_v30, %v54_v11  ;;  %v1900_v33 = vpop.f32.mrb[3].mxu1 }
 0x113   :  { %v311_v34 = vmax.f32 %v222_v20, %v308_v28 }
 0x115   :  { %v400_v35 = vmax.f32 %v311_v34, %v397_v32 }
 0x12c   :  { %v485_v41 = vpop.f32.mrb[4].mxu0 }
 0x12d   :  { %v486_v42 = vadd.f32 %v485_v41, %v54_v11  ;;  %v1931_v43 = vpop.f32.mrb[5].mxu0  ;;  %v574_v44 = vpop.f32.mrb[4].mxu1 }
 0x12e   :  { %v575_v46 = vadd.f32 %v574_v44, %v54_v11  ;;  %v1962_v47 = vpop.f32.mrb[5].mxu1 }
 0x12f   :  { %v489_v48 = vmax.f32 %v400_v35, %v486_v42 }
 0x131   :  { %v578_v49 = vmax.f32 %v489_v48, %v575_v46 }
 0x148   :  { %v663_v50 = vpop.f32.mrb[6].mxu0 }
 0x149   :  { %v664_v52 = vadd.f32 %v663_v50, %v54_v11  ;;  %v752_v53 = vpop.f32.mrb[6].mxu1  ;;  %v1993_v54 = vpop.f32.mrb[7].mxu0 }
 0x14a   :  { %v2024_v55 = vpop.f32.mrb[7].mxu1  ;;  %v753_v57 = vadd.f32 %v752_v53, %v54_v11  ;;  %v793_v11 = vpop.permute.xlu0 %792 }
 0x14b   :  { %v667_v56 = vmax.f32 %v578_v49, %v664_v52 }
 0x14d   :  { %v756_v58 = vmax.f32 %v667_v56, %v753_v57 }
 0x14e   :  { %v808_v14 = vpop.permute.xlu0 %807 }
 0x14f   :  { %v757_v59 = vmax.f32 %v756_v58, 0.0 }
 0x151   :  { %2025 = vmatprep.subr.msk.mxu0 %vm60_vm1, %v757_v59 }
 0x152   :  { %2026 = vmatpush3.msk.msra.mxu0 %vm60_vm1, %v757_v59  ;;  %v818_v16 = vpop.permute.xlu0 %817 }
 0x153   :  { %2028 = vmatmul.mubr.msk.f32.vlgmr.msra.gmra.mrb[8].mxu0 %vm870_vm5, %v759_v60  ;;  %2350 = vmatprep.subr.bf16.mxu0 %v2410_v4 }
 0x154   :  { %2030 = vmatprep.mubr.msk.f32.mxu0 %vm870_vm5, %v760_v61 }
 0x156   :  { %v828_v23 = vpop.permute.xlu0 %827 }
 0x157   :  { %2031 = vmatmul.mubr.msk.f32.gmra.mrb[10].mxu0 %vm870_vm5, %v761_v62 }
 0x158   :  { %2033 = vmatprep.mubr.msk.f32.mxu0 %vm870_vm5, %v762_v63 }
 0x15a   :  { %v838_v35 = vpop.permute.xlu0 %837 }
 0x15b   :  { %2034 = vmatmul.mubr.msk.f32.gmra.mrb[12].mxu0 %vm870_vm5, %v763_v0 }
 0x15c   :  { %2036 = vmatprep.mubr.msk.f32.mxu0 %vm870_vm5, %v764_v1 }
 0x15e   :  { %v848_v48 = vpop.permute.xlu0 %847 }
 0x15f   :  { %2037 = vmatmul.mubr.msk.f32.gmra.mrb[14].mxu0 %vm870_vm5, %v765_v2 }
 0x160   :  { %2039 = vmatprep.mubr.msk.f32.mxu0 %vm870_vm5, %v766_v3 }
 0x162   :  { %v858_v62 = vpop.permute.xlu0 %857 }
 0x163   :  { %2040 = vmatmul.mubr.msk.f32.gmra.mrb[16].mxu0 %vm870_vm5, %v767_v5 }
 0x164   :  { %2042 = vmatprep.mubr.msk.f32.mxu0 %vm870_vm5, %v768_v6 }
 0x167   :  { %2043 = vmatmul.mubr.msk.f32.gmra.mrb[18].mxu0 %vm870_vm5, %v769_v7 }
 0x168   :  { %2045 = vmatprep.mubr.msk.f32.mxu0 %vm870_vm5, %v770_v8 }
 0x16b   :  { %2046 = vmatmul.mubr.msk.f32.gmra.mrb[20].mxu0 %vm870_vm5, %v771_v9 }
 0x16c   :  { %2048 = vmatprep.mubr.msk.f32.mxu0 %vm870_vm5, %v772_v45 }
 0x16f   :  { %2049 = vmatmul.mubr.msk.f32.gmra.mrb[22].mxu0 %vm870_vm5, %v773_v51  ;;  %v868_v51 = vpop.permute.xlu0 %867 }
 0x170   :  { %2139 = vmatprep.mubr.msk.f32.mxu0 %vm2411_vm0, %v2412_v12  ;;  %v823_v12 = vpop.permute.xlu1 %822 }
 0x174   :  { %v833_v38 = vpop.permute.xlu1 %832 }
 0x178   :  { %v843_v52 = vpop.permute.xlu1 %842 }
 0x17c   :  { %v853_v1 = vpop.permute.xlu1 %852 }
 0x226   :  { %v2029_v18 = vpop.f32.mrb[8].mxu0 }
 0x227   :  { %v994_v19 = vadd.f32 %v2029_v18, %v798_v13  ;;  %v988_v20 = vpop.f32.mrb[9].mxu0  ;;  %v863_v13 = vpop.permute.xlu1 %862 }
 0x228   :  { %v989_v21 = vadd.f32 %v988_v20, %v793_v11 }
 0x229   :  { %v1068_v22 = vmax.f32 %v994_v19, 0.0 }
 0x22a   :  { %v1067_v24 = vmax.f32 %v989_v21, 0.0  ;;  %v2032_v25 = vpop.f32.mrb[10].mxu0  ;;  %v1084_v21 = vld [vmem:[%s3162_s5 + $0x8] sm:$0xff] }
 0x22b   :  { %v1004_v26 = vadd.f32 %v2032_v25, %v808_v14  ;;  %v998_v27 = vpop.f32.mrb[11].mxu0  ;;  %v1088_v25 = vld [vmem:[%s3162_s5 + $0x28] sm:$0xff] }
 0x22c   :  { %v2318_v28 = vpack.c.bf16 %v1068_v22, %v1067_v24  ;;  %v999_v29 = vadd.f32 %v998_v27, %v803_v15  ;;  %v1085_v22 = vld [vmem:[%s3162_s5 + $0x10] sm:$0xff]  ;;  %v1087_v24 = vld [vmem:[%s3162_s5 + $0x20] sm:$0xff] }
 0x22d   :  { %v1070_v30 = vmax.f32 %v1004_v26, 0.0  ;;  %v1090_v26 = vld [vmem:[%s3162_s5 + $0x38] sm:$0xff]  ;;  %v1091_v27 = vld [vmem:[%s3162_s5 + $0x40] sm:$0xff] }
 0x22e   :  { %v1069_v31 = vmax.f32 %v999_v29, 0.0  ;;  %v2035_v32 = vpop.f32.mrb[12].mxu0  ;;  %2319 = vmatprep.subr.bf16.mxu1 %v2318_v28  ;;  %v1093_v29 = vld [vmem:[%s3162_s5 + $0x50] sm:$0xff] }
 0x22f   :  { %v1014_v33 = vadd.f32 %v2035_v32, %v818_v16  ;;  %v1008_v34 = vpop.f32.mrb[13].mxu0  ;;  %2321 = vmatpush3.bf16.msra.mxu1 %v2318_v28  ;;  %v1092_v28 = vld [vmem:[%s3162_s5 + $0x48] sm:$0xff] }
 0x230   :  { %v2322_v36 = vpack.c.bf16 %v1070_v30, %v1069_v31  ;;  %v1009_v37 = vadd.f32 %v1008_v34, %v813_v17  ;;  %v1094_v30 = vld [vmem:[%s3162_s5 + $0x58] sm:$0xff]  ;;  %v1095_v31 = vld [vmem:[%s3162_s5 + $0x60] sm:$0xff]  ;;  %v1096_v32 = vld [vmem:[%s3162_s5 + $0x68] sm:$0xff] }
 0x231   :  { %v1072_v39 = vmax.f32 %v1014_v33, 0.0  ;;  %v1097_v33 = vld [vmem:[%s3162_s5 + $0x70] sm:$0xff]  ;;  %v1098_v34 = vld [vmem:[%s3162_s5 + $0x78] sm:$0xff] }
 0x232   :  { %v1071_v40 = vmax.f32 %v1009_v37, 0.0  ;;  %v2038_v41 = vpop.f32.mrb[14].mxu0  ;;  %2323 = vmatprep.subr.bf16.mxu1 %v2322_v36 }
 0x233   :  { %v1024_v42 = vadd.f32 %v2038_v41, %v828_v23  ;;  %v1018_v43 = vpop.f32.mrb[15].mxu0  ;;  %2325 = vmatpush3.bf16.msra.mxu1 %v2322_v36  ;;  %v1086_v23 = vld [vmem:[%s3162_s5 + $0x18] sm:$0xff]  ;;  %v1118_v36 = vpop.permute.xlu1 %1117 }
 0x234   :  { %v2326_v44 = vpack.c.bf16 %v1072_v39, %v1071_v40  ;;  %v1019_v46 = vadd.f32 %v1018_v43, %v823_v12  ;;  %v1089_v12 = vld [vmem:[%s3162_s5 + $0x30] sm:$0xff] }
 0x235   :  { %v1074_v47 = vmax.f32 %v1024_v42, 0.0 }
 0x236   :  { %v1073_v49 = vmax.f32 %v1019_v46, 0.0  ;;  %v2041_v50 = vpop.f32.mrb[16].mxu0  ;;  %2327 = vmatprep.subr.bf16.mxu1 %v2326_v44 }
 0x237   :  { %v1034_v53 = vadd.f32 %v2041_v50, %v838_v35  ;;  %v1028_v54 = vpop.f32.mrb[17].mxu0  ;;  %2329 = vmatpush3.bf16.msra.mxu1 %v2326_v44  ;;  %v1123_v35 = vpop.permute.xlu0 %1122 }
 0x238   :  { %v2330_v55 = vpack.c.bf16 %v1074_v47, %v1073_v49  ;;  %v1029_v56 = vadd.f32 %v1028_v54, %v833_v38  ;;  %v1128_v38 = vpop.permute.xlu1 %1127 }
 0x239   :  { %v1076_v57 = vmax.f32 %v1034_v53, 0.0 }
 0x23a   :  { %v1075_v58 = vmax.f32 %v1029_v56, 0.0  ;;  %v2044_v59 = vpop.f32.mrb[18].mxu0  ;;  %2331 = vmatprep.subr.bf16.mxu1 %v2330_v55 }
 0x23b   :  { %v1044_v60 = vadd.f32 %v2044_v59, %v848_v48  ;;  %v1038_v61 = vpop.f32.mrb[19].mxu0  ;;  %2333 = vmatpush3.bf16.msra.mxu1 %v2330_v55  ;;  %v1133_v37 = vpop.permute.xlu0 %1132 }
 0x23c   :  { %v2334_v63 = vpack.c.bf16 %v1076_v57, %v1075_v58  ;;  %v1039_v0 = vadd.f32 %v1038_v61, %v843_v52  ;;  %v1138_v40 = vpop.permute.xlu1 %1137 }
 0x23d   :  { %v1078_v2 = vmax.f32 %v1044_v60, 0.0 }
 0x23e   :  { %v1077_v3 = vmax.f32 %v1039_v0, 0.0  ;;  %v2047_v5 = vpop.f32.mrb[20].mxu0  ;;  %2335 = vmatprep.subr.bf16.mxu1 %v2334_v63 }
 0x23f   :  { %v1054_v6 = vadd.f32 %v2047_v5, %v858_v62  ;;  %v1048_v7 = vpop.f32.mrb[21].mxu0  ;;  %2337 = vmatpush3.bf16.msra.mxu1 %v2334_v63  ;;  %v1143_v39 = vpop.permute.xlu0 %1142 }
 0x240   :  { %v2338_v8 = vpack.c.bf16 %v1078_v2, %v1077_v3  ;;  %v1049_v9 = vadd.f32 %v1048_v7, %v853_v1  ;;  %v1148_v50 = vpop.permute.xlu1 %1147 }
 0x241   :  { %v1080_v45 = vmax.f32 %v1054_v6, 0.0 }
 0x242   :  { %v1079_v10 = vmax.f32 %v1049_v9, 0.0  ;;  %v2050_v11 = vpop.f32.mrb[22].mxu0  ;;  %2339 = vmatprep.subr.bf16.mxu1 %v2338_v8 }
 0x243   :  { %v1064_v14 = vadd.f32 %v2050_v11, %v868_v51  ;;  %v1058_v15 = vpop.f32.mrb[23].mxu0  ;;  %2341 = vmatpush3.bf16.msra.mxu1 %v2338_v8  ;;  %v1153_v47 = vpop.permute.xlu0 %1152 }
 0x244   :  { %v2342_v16 = vpack.c.bf16 %v1080_v45, %v1079_v10  ;;  %v1059_v17 = vadd.f32 %v1058_v15, %v863_v13  ;;  %v1158_v0 = vpop.permute.xlu1 %1157 }
 0x245   :  { %v1082_v18 = vmax.f32 %v1064_v14, 0.0 }
 0x246   :  { %v1081_v19 = vmax.f32 %v1059_v17, 0.0  ;;  %2343 = vmatprep.subr.bf16.mxu1 %v2342_v16 }
 0x247   :  { %2345 = vmatpush3.bf16.msra.mxu1 %v2342_v16  ;;  %v1163_v61 = vpop.permute.xlu0 %1162 }
 0x248   :  { %v2346_v20 = vpack.c.bf16 %v1082_v18, %v1081_v19  ;;  %v1168_v11 = vpop.permute.xlu1 %1167 }
 0x24a   :  { %2347 = vmatprep.subr.bf16.mxu1 %v2346_v20 }
 0x24b   :  { %2349 = vmatpush3.bf16.msra.mxu1 %v2346_v20  ;;  %v1173_v45 = vpop.permute.xlu0 %1172 }
 0x24e   :  { %2084 = vmatmul.mubr.f32.vlgmr.msra.gmra.mrb[8].mxu1 %v1084_v21 }
 0x24f   :  { %2086 = vmatprep.mubr.f32.mxu1 %v1085_v22  ;;  %v1183_v22 = vpop.permute.xlu0 %1182 }
 0x252   :  { %2087 = vmatmul.mubr.f32.gmra.mrb[10].mxu1 %v1086_v23 }
 0x253   :  { %2089 = vmatprep.mubr.f32.mxu1 %v1087_v24 }
 0x256   :  { %2090 = vmatmul.mubr.f32.gmra.mrb[12].mxu1 %v1088_v25  ;;  %v1178_v25 = vpop.permute.xlu1 %1177 }
 0x257   :  { %2092 = vmatprep.mubr.f32.mxu1 %v1089_v12 }
 0x25a   :  { %2093 = vmatmul.mubr.f32.gmra.mrb[14].mxu1 %v1090_v26 }
 0x25b   :  { %2095 = vmatprep.mubr.f32.mxu1 %v1091_v27 }
 0x25e   :  { %2096 = vmatmul.mubr.f32.gmra.mrb[16].mxu1 %v1092_v28 }
 0x25f   :  { %2098 = vmatprep.mubr.f32.mxu1 %v1093_v29 }
 0x262   :  { %2099 = vmatmul.mubr.f32.gmra.mrb[18].mxu1 %v1094_v30 }
 0x263   :  { %2101 = vmatprep.mubr.f32.mxu1 %v1095_v31 }
 0x266   :  { %2102 = vmatmul.mubr.f32.gmra.mrb[20].mxu1 %v1096_v32 }
 0x267   :  { %2104 = vmatprep.mubr.f32.mxu1 %v1097_v33  ;;  %v1193_v33 = vpop.permute.xlu0 %1192 }
 0x26a   :  { %2105 = vmatmul.mubr.f32.gmra.mrb[22].mxu1 %v1098_v34 }
 0x321   :  { %v2085_v41 = vpop.f32.mrb[8].mxu1 }
 0x322   :  { %v1267_v42 = vadd.f32 %v2085_v41, %v1123_v35  ;;  %v1261_v43 = vpop.f32.mrb[9].mxu1 }
 0x323   :  { %v1262_v44 = vadd.f32 %v1261_v43, %v1118_v36  ;;  %v1188_v36 = vpop.permute.xlu1 %1187 }
 0x324   :  { %v1341_v46 = vmax.f32 %v1267_v42, 0.0 }
 0x325   :  { %v1340_v48 = vmax.f32 %v1262_v44, 0.0  ;;  %v2088_v49 = vpop.f32.mrb[10].mxu1  ;;  %v1356_v44 = vld [vmem:[%s3164_s7] sm:$0x1]  ;;  %s2386_s7 = scalar_lea.vmem %s1452_s25, 16 }
 0x326   :  { %v1277_v52 = vadd.f32 %v2088_v49, %v1133_v37  ;;  %v1271_v53 = vpop.f32.mrb[11].mxu1  ;;  %p2387_p0 = scmp.ne.s32.totalorder %s1452_s25, %s2386_s7  ;;  %p2392_p2 = scmp.lt.s32.totalorder %s2390_s26, %s2386_s7 }
 0x327   :  { %v2351_v54 = vpack.c.bf16 %v1341_v46, %v1340_v48  ;;  %v1272_v55 = vadd.f32 %v1271_v53, %v1128_v38  ;;  %v1363_v46 = vlaneseq  ;;  %v1361_v49 = vpop.permute.xlu1 %1360 }
 0x328   :  { %v1343_v56 = vmax.f32 %v1277_v52, 0.0  ;;  %p2393_p3 = por %p2392_p2, %p2391_p1 }
 0x329   :  { %v1342_v57 = vmax.f32 %v1272_v55, 0.0  ;;  %v2091_v58 = vpop.f32.mrb[12].mxu1  ;;  %2352 = vmatpush3.bf16.msra.mxu0 %v2351_v54 }
 0x32a   :  { %v1287_v59 = vadd.f32 %v2091_v58, %v1143_v39  ;;  %v1281_v60 = vpop.f32.mrb[13].mxu1  ;;  %2353 = vmatprep.subr.bf16.mxu0 %v2410_v4  ;;  %p2394_p4 = pnand %p2393_p3, %p2387_p0 }
 0x32b   :  { %v2354_v62 = vpack.c.bf16 %v1343_v56, %v1342_v57  ;;  %v1282_v63 = vadd.f32 %v1281_v60, %v1138_v40 }
 0x32c   :  { %v1345_v1 = vmax.f32 %v1287_v59, 0.0 }
 0x32d   :  { %v1344_v2 = vmax.f32 %v1282_v63, 0.0  ;;  %v2094_v3 = vpop.f32.mrb[14].mxu1  ;;  %2355 = vmatpush3.bf16.msra.mxu0 %v2354_v62 }
 0x32e   :  { %v1297_v5 = vadd.f32 %v2094_v3, %v1153_v47  ;;  %v1291_v6 = vpop.f32.mrb[15].mxu1  ;;  %2356 = vmatprep.subr.bf16.mxu0 %v2410_v4  ;;  %v1364_v47 = vshrl.u32 %v1363_v46, 7 }
 0x32f   :  { %v2357_v7 = vpack.c.bf16 %v1345_v1, %v1344_v2  ;;  %v1292_v8 = vadd.f32 %v1291_v6, %v1148_v50 }
 0x330   :  { %v1347_v9 = vmax.f32 %v1297_v5, 0.0  ;;  %v1365_v48 = vsub.s32 0, %v1364_v47 }
 0x331   :  { %v1346_v51 = vmax.f32 %v1292_v8, 0.0  ;;  %v2097_v10 = vpop.f32.mrb[16].mxu1  ;;  %2358 = vmatpush3.bf16.msra.mxu0 %v2357_v7 }
 0x332   :  { %v1307_v13 = vadd.f32 %v2097_v10, %v1163_v61  ;;  %v1301_v14 = vpop.f32.mrb[17].mxu1  ;;  %2359 = vmatprep.subr.bf16.mxu0 %v2410_v4  ;;  %v1366_v50 = vrot.slane %v1361_v49, %v1365_v48 }
 0x333   :  { %v2360_v15 = vpack.c.bf16 %v1347_v9, %v1346_v51  ;;  %v1302_v16 = vadd.f32 %v1301_v14, %v1158_v0 }
 0x334   :  { %v1349_v17 = vmax.f32 %v1307_v13, 0.0 }
 0x335   :  { %v1348_v18 = vmax.f32 %v1302_v16, 0.0  ;;  %v2100_v19 = vpop.f32.mrb[18].mxu1  ;;  %2361 = vmatpush3.bf16.msra.mxu0 %v2360_v15 }
 0x336   :  { %v1317_v20 = vadd.f32 %v2100_v19, %v1173_v45  ;;  %v1311_v21 = vpop.f32.mrb[19].mxu1  ;;  %2362 = vmatprep.subr.bf16.mxu0 %v2410_v4 }
 0x337   :  { %v2363_v23 = vpack.c.bf16 %v1349_v17, %v1348_v18  ;;  %v1312_v24 = vadd.f32 %v1311_v21, %v1168_v11 }
 0x338   :  { %v1351_v12 = vmax.f32 %v1317_v20, 0.0 }
 0x339   :  { %v1350_v26 = vmax.f32 %v1312_v24, 0.0  ;;  %v2103_v27 = vpop.f32.mrb[20].mxu1  ;;  %2364 = vmatpush3.bf16.msra.mxu0 %v2363_v23 }
 0x33a   :  { %v1327_v28 = vadd.f32 %v2103_v27, %v1183_v22  ;;  %v1321_v29 = vpop.f32.mrb[21].mxu1  ;;  %2365 = vmatprep.subr.bf16.mxu0 %v2410_v4 }
 0x33b   :  { %v2366_v30 = vpack.c.bf16 %v1351_v12, %v1350_v26  ;;  %v1322_v31 = vadd.f32 %v1321_v29, %v1178_v25 }
 0x33c   :  { %v1353_v32 = vmax.f32 %v1327_v28, 0.0 }
 0x33d   :  { %v1352_v34 = vmax.f32 %v1322_v31, 0.0  ;;  %v2106_v35 = vpop.f32.mrb[22].mxu1  ;;  %2367 = vmatpush3.bf16.msra.mxu0 %v2366_v30 }
 0x33e   :  { %v1337_v37 = vadd.f32 %v2106_v35, %v1193_v33  ;;  %v1331_v38 = vpop.f32.mrb[23].mxu1  ;;  %2368 = vmatprep.subr.bf16.mxu0 %v2410_v4 }
 0x33f   :  { %v2369_v39 = vpack.c.bf16 %v1353_v32, %v1352_v34  ;;  %v1332_v40 = vadd.f32 %v1331_v38, %v1188_v36 }
 0x340   :  { %v1355_v41 = vmax.f32 %v1337_v37, 0.0 }
 0x341   :  { %v1354_v42 = vmax.f32 %v1332_v40, 0.0  ;;  %2370 = vmatpush3.bf16.msra.mxu0 %v2369_v39 }
 0x342   :  { %2371 = vmatprep.subr.bf16.mxu0 %v2410_v4 }
 0x343   :  { %v2372_v43 = vpack.c.bf16 %v1355_v41, %v1354_v42 }
 0x345   :  { %2373 = vmatpush3.bf16.msra.mxu0 %v2372_v43 }
 0x348   :  { %2140 = vmatmul.mubr.f32.vlgmr.msra.gmra.mrb[24].mxu0 %v1356_v44 }
 0x41b   :  { %v1433_v52 = vpop.f32.mrb[24].mxu0 }
 0x41c   :  { %v1434_v53 = vadd.f32 %v1433_v52, %v1366_v50  ;;  %v2141_v54 = vpop.f32.mrb[25].mxu0 }
 0x41e   :  { %v1590_v55 = vmul.f32 -1.442695, %v1434_v53 }
 0x420   :  { %2382 = vpow2.f32 %v1590_v55 }
 0x42a   :  { %v2383_v56 = vpop.eup %2382 }
 0x42b   :  { %v1440_v57 = vadd.f32 1.0, %v2383_v56 }
 0x42d   :  { %2384 = vrcp.f32 %v1440_v57 }
 0x437   :  { %v2385_v4 = vpop.eup %2384 }
 0x438   :  { %1444 = vst.msk [vmem:[#allocation3] sm:$0x1] %vm1443_vm6, %v2385_v4 }
 0x439   :  { %2397 = shalt.err (!%p2394_p4)
}
 0x43a   :  { %s2398_s29 = scalar_lea.hbm %s3166_s9, 16 }
 0x43b   :  { %p2399_p5 = scmp.ne.s32.totalorder %s3166_s9, %s2398_s29  ;;  %p2402_p6 = scmp.lt.u32.totalorder %s2398_s29, %s3166_s9 }
 0x43d   :  { %p2404_p7 = pnand %p2402_p6, %p2399_p5 }
 0x43f   :  { %2407 = shalt.err (!%p2404_p7)
}
 0x440   :  { %1454 = dma.vmem_to_hbm [thread:$0]  %s1452_s25, 16, %s3166_s9, [#allocation4]  }
 0x441   :  { %2408 = dma.done.wait [#allocation4], 16  }
 0x442   :  { %2409 = vsyncadd [#allocation4], 4294967280 }
 0x443   :  { %1458 = vsyncpa [#allocation4], 1 }

</bundles_post_ra>
